<compile_context>
chip_gen: v7x
topology: tpu7x:2x2x1
jax: 0.10.0
libtpu: 0.0.40
codegen_flags: <defaults>
</compile_context>

<pallas_src>
import functools

import jax
import jax.numpy as jnp
import numpy as np
from jax.experimental import pallas as pl
from jax.experimental.pallas import tpu as pltpu


def double_conv_kernel(x_ref, w1_ref, s1_ref, b1_ref, w2_ref, s2_ref, b2_ref,
                       o_ref, xp_ref, a1p_ref, cols_ref):
    """Fused DoubleConv for one batch element (NHWC, channels on the lane axis).

    x_ref    : (1, H, W, Cin)         input tile
    w1_ref   : (9, Cin, Cout)         conv1 weights, tap-major (ky*3+kx)
    s1_ref   : (1, Cout)              folded BN1 scale  (gamma / sqrt(var+eps))
    b1_ref   : (1, Cout)              folded BN1 shift  (includes conv1 bias)
    w2_ref   : (9*Cout, Cout)         conv2 weights, im2col row order (ky,kx,cin)
    s2_ref   : (1, Cout)              folded BN2 scale
    b2_ref   : (1, Cout)              folded BN2 shift  (includes conv2 bias)
    o_ref    : (1, H, W, Cout)        output tile
    xp_ref   : (H+2, W+2, Cin)  VMEM  zero-padded input (halo built in-kernel)
    a1p_ref  : (H+2, W+2, Cout) VMEM  zero-padded intermediate activation
    cols_ref : (H, W, 9*Cout)   VMEM  im2col patches for conv2
    """
    _, h, w, cin = x_ref.shape
    cout = o_ref.shape[-1]
    hw = h * w

    # ---------------- conv1 (3x3, pad=1) + BN(eval) + ReLU ----------------
    # Halo handled in VMEM scratch; no jnp.pad / extra HBM pass in the wrapper.
    xp_ref[...] = jnp.zeros_like(xp_ref)
    xp_ref[1:h + 1, 1:w + 1, :] = x_ref[0]

    acc1 = jnp.zeros((hw, cout), jnp.float32)
    for ky in range(3):
        for kx in range(3):
            patch = xp_ref[ky:ky + h, kx:kx + w, :].reshape(hw, cin)
            acc1 = acc1 + jnp.dot(patch, w1_ref[ky * 3 + kx],
                                  preferred_element_type=jnp.float32)
    y1 = jnp.maximum(acc1 * s1_ref[...] + b1_ref[...], 0.0)

    # ---------------- conv2 (3x3, pad=1) + BN(eval) + ReLU ----------------
    # Intermediate activation stays resident in VMEM (no HBM round trip).
    a1p_ref[...] = jnp.zeros_like(a1p_ref)
    a1p_ref[1:h + 1, 1:w + 1, :] = y1.reshape(h, w, cout)

    # im2col -> a single deep-K matmul (K = 9*Cout) to fill the MXU depth.
    for ky in range(3):
        for kx in range(3):
            t = ky * 3 + kx
            cols_ref[:, :, t * cout:(t + 1) * cout] = (
                a1p_ref[ky:ky + h, kx:kx + w, :])

    y2 = jnp.dot(cols_ref[...].reshape(hw, 9 * cout), w2_ref[...],
                 preferred_element_type=jnp.float32)
    y2 = jnp.maximum(y2 * s2_ref[...] + b2_ref[...], 0.0)

    o_ref[0] = y2.reshape(h, w, cout)


def double_conv(x_nhwc, w1_hwio, scale1, shift1, w2_hwio, scale2, shift2):
    """Fused DoubleConv.  x_nhwc: (N,H,W,Cin), weights HWIO, scales/shifts (Cout,)."""
    n, h, w, cin = x_nhwc.shape
    cout = w1_hwio.shape[-1]

    w1_taps = w1_hwio.reshape(9, cin, cout)            # tap-major
    w2_cols = w2_hwio.reshape(9 * cout, cout)          # im2col row order (ky,kx,cin)
    s1 = scale1.reshape(1, cout).astype(jnp.float32)
    b1 = shift1.reshape(1, cout).astype(jnp.float32)
    s2 = scale2.reshape(1, cout).astype(jnp.float32)
    b2 = shift2.reshape(1, cout).astype(jnp.float32)

    flops = 2 * n * h * w * 9 * (cin * cout + cout * cout)
    bytes_accessed = 4 * (n * h * w * cin + 9 * cin * cout + 9 * cout * cout
                          + 4 * cout + n * h * w * cout)

    return pl.pallas_call(
        double_conv_kernel,
        out_shape=jax.ShapeDtypeStruct((n, h, w, cout), jnp.float32),
        grid_spec=pltpu.PrefetchScalarGridSpec(
            num_scalar_prefetch=0,
            grid=(n,),
            in_specs=[
                pl.BlockSpec((1, h, w, cin), lambda bi: (bi, 0, 0, 0)),
                pl.BlockSpec((9, cin, cout), lambda bi: (0, 0, 0)),
                pl.BlockSpec((1, cout), lambda bi: (0, 0)),
                pl.BlockSpec((1, cout), lambda bi: (0, 0)),
                pl.BlockSpec((9 * cout, cout), lambda bi: (0, 0)),
                pl.BlockSpec((1, cout), lambda bi: (0, 0)),
                pl.BlockSpec((1, cout), lambda bi: (0, 0)),
            ],
            out_specs=pl.BlockSpec((1, h, w, cout), lambda bi: (bi, 0, 0, 0)),
            scratch_shapes=[
                pltpu.VMEM((h + 2, w + 2, cin), jnp.float32),    # padded input
                pltpu.VMEM((h + 2, w + 2, cout), jnp.float32),   # padded intermediate
                pltpu.VMEM((h, w, 9 * cout), jnp.float32),       # im2col for conv2
            ],
        ),
        compiler_params=pltpu.CompilerParams(
            dimension_semantics=("parallel",),   # lets v7x split batch over 2 TCs
        ),
        cost_estimate=pl.CostEstimate(
            flops=int(flops), transcendentals=0,
            bytes_accessed=int(bytes_accessed)),
    )(x_nhwc, w1_taps, s1, b1, w2_cols, s2, b2)


def fold_bn(bias, gamma, beta, mean, var, eps=1e-5):
    scale = gamma / jnp.sqrt(var + eps)
    shift = beta + (bias - mean) * scale
    return scale, shift


def init_double_conv_params(key, in_ch, out_ch):
    """Deterministic synthetic parameters for DoubleConv (conv+BN twice)."""
    ks = jax.random.split(key, 12)

    def conv_params(kw, kb, cin, cout):
        fan_in = cin * 9
        w = jax.random.normal(kw, (3, 3, cin, cout), jnp.float32) / np.sqrt(fan_in)
        b = jax.random.normal(kb, (cout,), jnp.float32) * 0.05
        return w, b

    def bn_params(kg, kb, km, kv, c):
        gamma = 1.0 + 0.1 * jax.random.normal(kg, (c,), jnp.float32)
        beta = 0.1 * jax.random.normal(kb, (c,), jnp.float32)
        mean = 0.1 * jax.random.normal(km, (c,), jnp.float32)
        var = jax.random.uniform(kv, (c,), jnp.float32, 0.5, 1.5)
        return gamma, beta, mean, var

    w1, b1 = conv_params(ks[0], ks[1], in_ch, out_ch)
    g1, be1, m1, v1 = bn_params(ks[2], ks[3], ks[4], ks[5], out_ch)
    w2, b2 = conv_params(ks[6], ks[7], out_ch, out_ch)
    g2, be2, m2, v2 = bn_params(ks[8], ks[9], ks[10], ks[11], out_ch)
    return (w1, b1, g1, be1, m1, v1), (w2, b2, g2, be2, m2, v2)


def in_conv_forward(x_nchw, params):
    """InConv.forward: x (N,C,H,W) -> DoubleConv -> (N,out_ch,H,W)."""
    (w1, b1, g1, be1, m1, v1), (w2, b2, g2, be2, m2, v2) = params
    s1, sh1 = fold_bn(b1, g1, be1, m1, v1)
    s2, sh2 = fold_bn(b2, g2, be2, m2, v2)

    x = jnp.transpose(x_nchw, (0, 2, 3, 1))          # NCHW -> NHWC (boundary only)
    y = double_conv(x, w1, s1, sh1, w2, s2, sh2)     # both layers, one kernel
    return jnp.transpose(y, (0, 3, 1, 2))            # NHWC -> NCHW


# ----------------------------- reference (plain JAX) -----------------------------
def _ref_block(x_nhwc, w, bias, gamma, beta, mean, var, eps=1e-5):
    y = jax.lax.conv_general_dilated(
        x_nhwc, w, (1, 1), "SAME",
        dimension_numbers=("NHWC", "HWIO", "NHWC"),
    ) + bias
    y = gamma * (y - mean) / jnp.sqrt(var + eps) + beta
    return jnp.maximum(y, 0.0)


def in_conv_reference(x_nchw, params):
    (w1, b1, g1, be1, m1, v1), (w2, b2, g2, be2, m2, v2) = params
    x = jnp.transpose(x_nchw, (0, 2, 3, 1))
    x = _ref_block(x, w1, b1, g1, be1, m1, v1)
    x = _ref_block(x, w2, b2, g2, be2, m2, v2)
    return jnp.transpose(x, (0, 3, 1, 2))


if __name__ == "__main__":
    N, IN_CH, OUT_CH, H, W = 2, 4, 32, 16, 16

    root = jax.random.PRNGKey(0)
    kx, kp = jax.random.split(root)
    x = jax.random.normal(kx, (N, IN_CH, H, W), jnp.float32)   # NCHW like PyTorch
    params = init_double_conv_params(kp, IN_CH, OUT_CH)

    out = jax.jit(functools.partial(in_conv_forward, params=params))(x)
    out = jax.block_until_ready(out)

    ref = in_conv_reference(x, params)
    assert out.shape == (N, OUT_CH, H, W)
    np.testing.assert_allclose(np.asarray(out), np.asarray(ref), rtol=1e-3, atol=1e-3)

    print("KERNEL_OK")
</pallas_src>

<mosaic_0001>
module attributes {stable_mosaic.version = 11 : i64} {
  func.func @double_conv_kernel(%arg0: i32, %arg1: memref<1x16x16x4xf32, #tpu.memory_space<vmem>>, %arg2: memref<9x4x32xf32, #tpu.memory_space<vmem>>, %arg3: memref<1x32xf32, #tpu.memory_space<vmem>>, %arg4: memref<1x32xf32, #tpu.memory_space<vmem>>, %arg5: memref<288x32xf32, #tpu.memory_space<vmem>>, %arg6: memref<1x32xf32, #tpu.memory_space<vmem>>, %arg7: memref<1x32xf32, #tpu.memory_space<vmem>>, %arg8: memref<1x16x16x32xf32, #tpu.memory_space<vmem>>, %arg9: memref<18x18x4xf32, #tpu.memory_space<vmem>>, %arg10: memref<18x18x32xf32, #tpu.memory_space<vmem>>, %arg11: memref<16x16x288xf32, #tpu.memory_space<vmem>>) attributes {dimension_semantics = [#tpu.dimension_semantics<parallel>], iteration_bounds = array<i64: 2>, scalar_prefetch = 0 : i64, scratch_operands = 3 : i64, tpu.core_type = #tpu.core_type<tc>, window_params = [{transform_indices = @transform_0, window_bounds = array<i64: 1, 16, 16, 4>}, {pipeline_mode = #tpu.pipeline_mode<synchronous>, transform_indices = @transform_1, window_bounds = array<i64: 9, 4, 32>}, {pipeline_mode = #tpu.pipeline_mode<synchronous>, transform_indices = @transform_2, window_bounds = array<i64: 1, 32>}, {pipeline_mode = #tpu.pipeline_mode<synchronous>, transform_indices = @transform_3, window_bounds = array<i64: 1, 32>}, {pipeline_mode = #tpu.pipeline_mode<synchronous>, transform_indices = @transform_4, window_bounds = array<i64: 288, 32>}, {pipeline_mode = #tpu.pipeline_mode<synchronous>, transform_indices = @transform_5, window_bounds = array<i64: 1, 32>}, {pipeline_mode = #tpu.pipeline_mode<synchronous>, transform_indices = @transform_6, window_bounds = array<i64: 1, 32>}, {transform_indices = @transform_7, window_bounds = array<i64: 1, 16, 16, 32>}]} {
    %cst = arith.constant 0.000000e+00 : f32
    %0 = vector.broadcast %cst : f32 to vector<18x18x4xf32>
    %c0 = arith.constant 0 : index
    %c0_0 = arith.constant 0 : index
    %c0_1 = arith.constant 0 : index
    %1 = vector.load %arg9[%c0, %c0_0, %c0_1] : memref<18x18x4xf32, #tpu.memory_space<vmem>>, vector<18x18x4xf32>
    tpu.vector_store %arg9[%c0, %c0_0, %c0_1], %0 {strides = array<i32>} : memref<18x18x4xf32, #tpu.memory_space<vmem>>, vector<18x18x4xf32>,
    %c0_2 = arith.constant 0 : index
    %c0_3 = arith.constant 0 : index
    %c0_4 = arith.constant 0 : index
    %c0_5 = arith.constant 0 : index
    %2 = vector.load %arg1[%c0_2, %c0_3, %c0_4, %c0_5] : memref<1x16x16x4xf32, #tpu.memory_space<vmem>>, vector<1x16x16x4xf32>
    %3 = vector.shape_cast %2 : vector<1x16x16x4xf32> to vector<16x16x4xf32>
    %c1 = arith.constant 1 : index
    %c1_6 = arith.constant 1 : index
    %c0_7 = arith.constant 0 : index
    %4 = vector.load %arg9[%c1, %c1_6, %c0_7] : memref<18x18x4xf32, #tpu.memory_space<vmem>>, vector<16x16x4xf32>
    tpu.vector_store %arg9[%c1, %c1_6, %c0_7], %3 {strides = array<i32>} : memref<18x18x4xf32, #tpu.memory_space<vmem>>, vector<16x16x4xf32>,
    %cst_8 = arith.constant 0.000000e+00 : f32
    %5 = vector.broadcast %cst_8 : f32 to vector<256x32xf32>
    %c0_9 = arith.constant 0 : index
    %c0_10 = arith.constant 0 : index
    %c0_11 = arith.constant 0 : index
    %6 = vector.load %arg9[%c0_9, %c0_10, %c0_11] : memref<18x18x4xf32, #tpu.memory_space<vmem>>, vector<16x16x4xf32>
    %7 = vector.shape_cast %6 : vector<16x16x4xf32> to vector<256x4xf32>
    %c0_12 = arith.constant 0 : index
    %c0_13 = arith.constant 0 : index
    %c0_14 = arith.constant 0 : index
    %8 = vector.load %arg2[%c0_12, %c0_13, %c0_14] : memref<9x4x32xf32, #tpu.memory_space<vmem>>, vector<1x4x32xf32>
    %9 = vector.shape_cast %8 : vector<1x4x32xf32> to vector<4x32xf32>
    %cst_15 = arith.constant dense<0.000000e+00> : vector<256x32xf32>
    %10 = tpu.matmul %7, %9, %cst_15 {dimension_numbers = #tpu.dot_dimension_numbers<[1], [0], [0], [1], [0, 0, 1, 1], [], []>} : vector<256x4xf32>, vector<4x32xf32>, vector<256x32xf32> -> vector<256x32xf32>
    %11 = arith.addf %5, %10 : vector<256x32xf32>
    %c0_16 = arith.constant 0 : index
    %c1_17 = arith.constant 1 : index
    %c0_18 = arith.constant 0 : index
    %12 = vector.load %arg9[%c0_16, %c1_17, %c0_18] : memref<18x18x4xf32, #tpu.memory_space<vmem>>, vector<16x16x4xf32>
    %13 = vector.shape_cast %12 : vector<16x16x4xf32> to vector<256x4xf32>
    %c1_19 = arith.constant 1 : index
    %c0_20 = arith.constant 0 : index
    %c0_21 = arith.constant 0 : index
    %14 = vector.load %arg2[%c1_19, %c0_20, %c0_21] : memref<9x4x32xf32, #tpu.memory_space<vmem>>, vector<1x4x32xf32>
    %15 = vector.shape_cast %14 : vector<1x4x32xf32> to vector<4x32xf32>
    %cst_22 = arith.constant dense<0.000000e+00> : vector<256x32xf32>
    %16 = tpu.matmul %13, %15, %cst_22 {dimension_numbers = #tpu.dot_dimension_numbers<[1], [0], [0], [1], [0, 0, 1, 1], [], []>} : vector<256x4xf32>, vector<4x32xf32>, vector<256x32xf32> -> vector<256x32xf32>
    %17 = arith.addf %11, %16 : vector<256x32xf32>
    %c0_23 = arith.constant 0 : index
    %c2 = arith.constant 2 : index
    %c0_24 = arith.constant 0 : index
    %18 = vector.load %arg9[%c0_23, %c2, %c0_24] : memref<18x18x4xf32, #tpu.memory_space<vmem>>, vector<16x16x4xf32>
    %19 = vector.shape_cast %18 : vector<16x16x4xf32> to vector<256x4xf32>
    %c2_25 = arith.constant 2 : index
    %c0_26 = arith.constant 0 : index
    %c0_27 = arith.constant 0 : index
    %20 = vector.load %arg2[%c2_25, %c0_26, %c0_27] : memref<9x4x32xf32, #tpu.memory_space<vmem>>, vector<1x4x32xf32>
    %21 = vector.shape_cast %20 : vector<1x4x32xf32> to vector<4x32xf32>
    %cst_28 = arith.constant dense<0.000000e+00> : vector<256x32xf32>
    %22 = tpu.matmul %19, %21, %cst_28 {dimension_numbers = #tpu.dot_dimension_numbers<[1], [0], [0], [1], [0, 0, 1, 1], [], []>} : vector<256x4xf32>, vector<4x32xf32>, vector<256x32xf32> -> vector<256x32xf32>
    %23 = arith.addf %17, %22 : vector<256x32xf32>
    %c1_29 = arith.constant 1 : index
    %c0_30 = arith.constant 0 : index
    %c0_31 = arith.constant 0 : index
    %24 = vector.load %arg9[%c1_29, %c0_30, %c0_31] : memref<18x18x4xf32, #tpu.memory_space<vmem>>, vector<16x16x4xf32>
    %25 = vector.shape_cast %24 : vector<16x16x4xf32> to vector<256x4xf32>
    %c3 = arith.constant 3 : index
    %c0_32 = arith.constant 0 : index
    %c0_33 = arith.constant 0 : index
    %26 = vector.load %arg2[%c3, %c0_32, %c0_33] : memref<9x4x32xf32, #tpu.memory_space<vmem>>, vector<1x4x32xf32>
    %27 = vector.shape_cast %26 : vector<1x4x32xf32> to vector<4x32xf32>
    %cst_34 = arith.constant dense<0.000000e+00> : vector<256x32xf32>
    %28 = tpu.matmul %25, %27, %cst_34 {dimension_numbers = #tpu.dot_dimension_numbers<[1], [0], [0], [1], [0, 0, 1, 1], [], []>} : vector<256x4xf32>, vector<4x32xf32>, vector<256x32xf32> -> vector<256x32xf32>
    %29 = arith.addf %23, %28 : vector<256x32xf32>
    %c1_35 = arith.constant 1 : index
    %c1_36 = arith.constant 1 : index
    %c0_37 = arith.constant 0 : index
    %30 = vector.load %arg9[%c1_35, %c1_36, %c0_37] : memref<18x18x4xf32, #tpu.memory_space<vmem>>, vector<16x16x4xf32>
    %31 = vector.shape_cast %30 : vector<16x16x4xf32> to vector<256x4xf32>
    %c4 = arith.constant 4 : index
    %c0_38 = arith.constant 0 : index
    %c0_39 = arith.constant 0 : index
    %32 = vector.load %arg2[%c4, %c0_38, %c0_39] : memref<9x4x32xf32, #tpu.memory_space<vmem>>, vector<1x4x32xf32>
    %33 = vector.shape_cast %32 : vector<1x4x32xf32> to vector<4x32xf32>
    %cst_40 = arith.constant dense<0.000000e+00> : vector<256x32xf32>
    %34 = tpu.matmul %31, %33, %cst_40 {dimension_numbers = #tpu.dot_dimension_numbers<[1], [0], [0], [1], [0, 0, 1, 1], [], []>} : vector<256x4xf32>, vector<4x32xf32>, vector<256x32xf32> -> vector<256x32xf32>
    %35 = arith.addf %29, %34 : vector<256x32xf32>
    %c1_41 = arith.constant 1 : index
    %c2_42 = arith.constant 2 : index
    %c0_43 = arith.constant 0 : index
    %36 = vector.load %arg9[%c1_41, %c2_42, %c0_43] : memref<18x18x4xf32, #tpu.memory_space<vmem>>, vector<16x16x4xf32>
    %37 = vector.shape_cast %36 : vector<16x16x4xf32> to vector<256x4xf32>
    %c5 = arith.constant 5 : index
    %c0_44 = arith.constant 0 : index
    %c0_45 = arith.constant 0 : index
    %38 = vector.load %arg2[%c5, %c0_44, %c0_45] : memref<9x4x32xf32, #tpu.memory_space<vmem>>, vector<1x4x32xf32>
    %39 = vector.shape_cast %38 : vector<1x4x32xf32> to vector<4x32xf32>
    %cst_46 = arith.constant dense<0.000000e+00> : vector<256x32xf32>
    %40 = tpu.matmul %37, %39, %cst_46 {dimension_numbers = #tpu.dot_dimension_numbers<[1], [0], [0], [1], [0, 0, 1, 1], [], []>} : vector<256x4xf32>, vector<4x32xf32>, vector<256x32xf32> -> vector<256x32xf32>
    %41 = arith.addf %35, %40 : vector<256x32xf32>
    %c2_47 = arith.constant 2 : index
    %c0_48 = arith.constant 0 : index
    %c0_49 = arith.constant 0 : index
    %42 = vector.load %arg9[%c2_47, %c0_48, %c0_49] : memref<18x18x4xf32, #tpu.memory_space<vmem>>, vector<16x16x4xf32>
    %43 = vector.shape_cast %42 : vector<16x16x4xf32> to vector<256x4xf32>
    %c6 = arith.constant 6 : index
    %c0_50 = arith.constant 0 : index
    %c0_51 = arith.constant 0 : index
    %44 = vector.load %arg2[%c6, %c0_50, %c0_51] : memref<9x4x32xf32, #tpu.memory_space<vmem>>, vector<1x4x32xf32>
    %45 = vector.shape_cast %44 : vector<1x4x32xf32> to vector<4x32xf32>
    %cst_52 = arith.constant dense<0.000000e+00> : vector<256x32xf32>
    %46 = tpu.matmul %43, %45, %cst_52 {dimension_numbers = #tpu.dot_dimension_numbers<[1], [0], [0], [1], [0, 0, 1, 1], [], []>} : vector<256x4xf32>, vector<4x32xf32>, vector<256x32xf32> -> vector<256x32xf32>
    %47 = arith.addf %41, %46 : vector<256x32xf32>
    %c2_53 = arith.constant 2 : index
    %c1_54 = arith.constant 1 : index
    %c0_55 = arith.constant 0 : index
    %48 = vector.load %arg9[%c2_53, %c1_54, %c0_55] : memref<18x18x4xf32, #tpu.memory_space<vmem>>, vector<16x16x4xf32>
    %49 = vector.shape_cast %48 : vector<16x16x4xf32> to vector<256x4xf32>
    %c7 = arith.constant 7 : index
    %c0_56 = arith.constant 0 : index
    %c0_57 = arith.constant 0 : index
    %50 = vector.load %arg2[%c7, %c0_56, %c0_57] : memref<9x4x32xf32, #tpu.memory_space<vmem>>, vector<1x4x32xf32>
    %51 = vector.shape_cast %50 : vector<1x4x32xf32> to vector<4x32xf32>
    %cst_58 = arith.constant dense<0.000000e+00> : vector<256x32xf32>
    %52 = tpu.matmul %49, %51, %cst_58 {dimension_numbers = #tpu.dot_dimension_numbers<[1], [0], [0], [1], [0, 0, 1, 1], [], []>} : vector<256x4xf32>, vector<4x32xf32>, vector<256x32xf32> -> vector<256x32xf32>
    %53 = arith.addf %47, %52 : vector<256x32xf32>
    %c2_59 = arith.constant 2 : index
    %c2_60 = arith.constant 2 : index
    %c0_61 = arith.constant 0 : index
    %54 = vector.load %arg9[%c2_59, %c2_60, %c0_61] : memref<18x18x4xf32, #tpu.memory_space<vmem>>, vector<16x16x4xf32>
    %55 = vector.shape_cast %54 : vector<16x16x4xf32> to vector<256x4xf32>
    %c8 = arith.constant 8 : index
    %c0_62 = arith.constant 0 : index
    %c0_63 = arith.constant 0 : index
    %56 = vector.load %arg2[%c8, %c0_62, %c0_63] : memref<9x4x32xf32, #tpu.memory_space<vmem>>, vector<1x4x32xf32>
    %57 = vector.shape_cast %56 : vector<1x4x32xf32> to vector<4x32xf32>
    %cst_64 = arith.constant dense<0.000000e+00> : vector<256x32xf32>
    %58 = tpu.matmul %55, %57, %cst_64 {dimension_numbers = #tpu.dot_dimension_numbers<[1], [0], [0], [1], [0, 0, 1, 1], [], []>} : vector<256x4xf32>, vector<4x32xf32>, vector<256x32xf32> -> vector<256x32xf32>
    %59 = arith.addf %53, %58 : vector<256x32xf32>
    %c0_65 = arith.constant 0 : index
    %c0_66 = arith.constant 0 : index
    %60 = vector.load %arg3[%c0_65, %c0_66] : memref<1x32xf32, #tpu.memory_space<vmem>>, vector<1x32xf32>
    %61 = vector.broadcast %60 : vector<1x32xf32> to vector<256x32xf32>
    %62 = arith.mulf %59, %61 : vector<256x32xf32>
    %c0_67 = arith.constant 0 : index
    %c0_68 = arith.constant 0 : index
    %63 = vector.load %arg4[%c0_67, %c0_68] : memref<1x32xf32, #tpu.memory_space<vmem>>, vector<1x32xf32>
    %64 = vector.broadcast %63 : vector<1x32xf32> to vector<256x32xf32>
    %65 = arith.addf %62, %64 : vector<256x32xf32>
    %cst_69 = arith.constant 0.000000e+00 : f32
    %66 = vector.broadcast %cst_69 : f32 to vector<256x32xf32>
    %67 = arith.maximumf %65, %66 : vector<256x32xf32>
    %cst_70 = arith.constant 0.000000e+00 : f32
    %68 = vector.broadcast %cst_70 : f32 to vector<18x18x32xf32>
    %c0_71 = arith.constant 0 : index
    %c0_72 = arith.constant 0 : index
    %c0_73 = arith.constant 0 : index
    %69 = vector.load %arg10[%c0_71, %c0_72, %c0_73] : memref<18x18x32xf32, #tpu.memory_space<vmem>>, vector<18x18x32xf32>
    tpu.vector_store %arg10[%c0_71, %c0_72, %c0_73], %68 {strides = array<i32>} : memref<18x18x32xf32, #tpu.memory_space<vmem>>, vector<18x18x32xf32>,
    %70 = vector.shape_cast %67 : vector<256x32xf32> to vector<16x16x32xf32>
    %c1_74 = arith.constant 1 : index
    %c1_75 = arith.constant 1 : index
    %c0_76 = arith.constant 0 : index
    %71 = vector.load %arg10[%c1_74, %c1_75, %c0_76] : memref<18x18x32xf32, #tpu.memory_space<vmem>>, vector<16x16x32xf32>
    tpu.vector_store %arg10[%c1_74, %c1_75, %c0_76], %70 {strides = array<i32>} : memref<18x18x32xf32, #tpu.memory_space<vmem>>, vector<16x16x32xf32>,
    %c0_77 = arith.constant 0 : index
    %c0_78 = arith.constant 0 : index
    %c0_79 = arith.constant 0 : index
    %72 = vector.load %arg10[%c0_77, %c0_78, %c0_79] : memref<18x18x32xf32, #tpu.memory_space<vmem>>, vector<16x16x32xf32>
    %c0_80 = arith.constant 0 : index
    %c0_81 = arith.constant 0 : index
    %c0_82 = arith.constant 0 : index
    %73 = vector.load %arg11[%c0_80, %c0_81, %c0_82] : memref<16x16x288xf32, #tpu.memory_space<vmem>>, vector<16x16x32xf32>
    tpu.vector_store %arg11[%c0_80, %c0_81, %c0_82], %72 {strides = array<i32>} : memref<16x16x288xf32, #tpu.memory_space<vmem>>, vector<16x16x32xf32>,
    %c0_83 = arith.constant 0 : index
    %c1_84 = arith.constant 1 : index
    %c0_85 = arith.constant 0 : index
    %74 = vector.load %arg10[%c0_83, %c1_84, %c0_85] : memref<18x18x32xf32, #tpu.memory_space<vmem>>, vector<16x16x32xf32>
    %c0_86 = arith.constant 0 : index
    %c0_87 = arith.constant 0 : index
    %c32 = arith.constant 32 : index
    %75 = vector.load %arg11[%c0_86, %c0_87, %c32] : memref<16x16x288xf32, #tpu.memory_space<vmem>>, vector<16x16x32xf32>
    tpu.vector_store %arg11[%c0_86, %c0_87, %c32], %74 {strides = array<i32>} : memref<16x16x288xf32, #tpu.memory_space<vmem>>, vector<16x16x32xf32>,
    %c0_88 = arith.constant 0 : index
    %c2_89 = arith.constant 2 : index
    %c0_90 = arith.constant 0 : index
    %76 = vector.load %arg10[%c0_88, %c2_89, %c0_90] : memref<18x18x32xf32, #tpu.memory_space<vmem>>, vector<16x16x32xf32>
    %c0_91 = arith.constant 0 : index
    %c0_92 = arith.constant 0 : index
    %c64 = arith.constant 64 : index
    %77 = vector.load %arg11[%c0_91, %c0_92, %c64] : memref<16x16x288xf32, #tpu.memory_space<vmem>>, vector<16x16x32xf32>
    tpu.vector_store %arg11[%c0_91, %c0_92, %c64], %76 {strides = array<i32>} : memref<16x16x288xf32, #tpu.memory_space<vmem>>, vector<16x16x32xf32>,
    %c1_93 = arith.constant 1 : index
    %c0_94 = arith.constant 0 : index
    %c0_95 = arith.constant 0 : index
    %78 = vector.load %arg10[%c1_93, %c0_94, %c0_95] : memref<18x18x32xf32, #tpu.memory_space<vmem>>, vector<16x16x32xf32>
    %c0_96 = arith.constant 0 : index
    %c0_97 = arith.constant 0 : index
    %c96 = arith.constant 96 : index
    %79 = vector.load %arg11[%c0_96, %c0_97, %c96] : memref<16x16x288xf32, #tpu.memory_space<vmem>>, vector<16x16x32xf32>
    tpu.vector_store %arg11[%c0_96, %c0_97, %c96], %78 {strides = array<i32>} : memref<16x16x288xf32, #tpu.memory_space<vmem>>, vector<16x16x32xf32>,
    %c1_98 = arith.constant 1 : index
    %c1_99 = arith.constant 1 : index
    %c0_100 = arith.constant 0 : index
    %80 = vector.load %arg10[%c1_98, %c1_99, %c0_100] : memref<18x18x32xf32, #tpu.memory_space<vmem>>, vector<16x16x32xf32>
    %c0_101 = arith.constant 0 : index
    %c0_102 = arith.constant 0 : index
    %c128 = arith.constant 128 : index
    %81 = vector.load %arg11[%c0_101, %c0_102, %c128] : memref<16x16x288xf32, #tpu.memory_space<vmem>>, vector<16x16x32xf32>
    tpu.vector_store %arg11[%c0_101, %c0_102, %c128], %80 {strides = array<i32>} : memref<16x16x288xf32, #tpu.memory_space<vmem>>, vector<16x16x32xf32>,
    %c1_103 = arith.constant 1 : index
    %c2_104 = arith.constant 2 : index
    %c0_105 = arith.constant 0 : index
    %82 = vector.load %arg10[%c1_103, %c2_104, %c0_105] : memref<18x18x32xf32, #tpu.memory_space<vmem>>, vector<16x16x32xf32>
    %c0_106 = arith.constant 0 : index
    %c0_107 = arith.constant 0 : index
    %c160 = arith.constant 160 : index
    %83 = vector.load %arg11[%c0_106, %c0_107, %c160] : memref<16x16x288xf32, #tpu.memory_space<vmem>>, vector<16x16x32xf32>
    tpu.vector_store %arg11[%c0_106, %c0_107, %c160], %82 {strides = array<i32>} : memref<16x16x288xf32, #tpu.memory_space<vmem>>, vector<16x16x32xf32>,
    %c2_108 = arith.constant 2 : index
    %c0_109 = arith.constant 0 : index
    %c0_110 = arith.constant 0 : index
    %84 = vector.load %arg10[%c2_108, %c0_109, %c0_110] : memref<18x18x32xf32, #tpu.memory_space<vmem>>, vector<16x16x32xf32>
    %c0_111 = arith.constant 0 : index
    %c0_112 = arith.constant 0 : index
    %c192 = arith.constant 192 : index
    %85 = vector.load %arg11[%c0_111, %c0_112, %c192] : memref<16x16x288xf32, #tpu.memory_space<vmem>>, vector<16x16x32xf32>
    tpu.vector_store %arg11[%c0_111, %c0_112, %c192], %84 {strides = array<i32>} : memref<16x16x288xf32, #tpu.memory_space<vmem>>, vector<16x16x32xf32>,
    %c2_113 = arith.constant 2 : index
    %c1_114 = arith.constant 1 : index
    %c0_115 = arith.constant 0 : index
    %86 = vector.load %arg10[%c2_113, %c1_114, %c0_115] : memref<18x18x32xf32, #tpu.memory_space<vmem>>, vector<16x16x32xf32>
    %c0_116 = arith.constant 0 : index
    %c0_117 = arith.constant 0 : index
    %c224 = arith.constant 224 : index
    %87 = vector.load %arg11[%c0_116, %c0_117, %c224] : memref<16x16x288xf32, #tpu.memory_space<vmem>>, vector<16x16x32xf32>
    tpu.vector_store %arg11[%c0_116, %c0_117, %c224], %86 {strides = array<i32>} : memref<16x16x288xf32, #tpu.memory_space<vmem>>, vector<16x16x32xf32>,
    %c2_118 = arith.constant 2 : index
    %c2_119 = arith.constant 2 : index
    %c0_120 = arith.constant 0 : index
    %88 = vector.load %arg10[%c2_118, %c2_119, %c0_120] : memref<18x18x32xf32, #tpu.memory_space<vmem>>, vector<16x16x32xf32>
    %c0_121 = arith.constant 0 : index
    %c0_122 = arith.constant 0 : index
    %c256 = arith.constant 256 : index
    %89 = vector.load %arg11[%c0_121, %c0_122, %c256] : memref<16x16x288xf32, #tpu.memory_space<vmem>>, vector<16x16x32xf32>
    tpu.vector_store %arg11[%c0_121, %c0_122, %c256], %88 {strides = array<i32>} : memref<16x16x288xf32, #tpu.memory_space<vmem>>, vector<16x16x32xf32>,
    %c0_123 = arith.constant 0 : index
    %c0_124 = arith.constant 0 : index
    %c0_125 = arith.constant 0 : index
    %90 = vector.load %arg11[%c0_123, %c0_124, %c0_125] : memref<16x16x288xf32, #tpu.memory_space<vmem>>, vector<16x16x288xf32>
    %91 = vector.shape_cast %90 : vector<16x16x288xf32> to vector<256x288xf32>
    %c0_126 = arith.constant 0 : index
    %c0_127 = arith.constant 0 : index
    %92 = vector.load %arg5[%c0_126, %c0_127] : memref<288x32xf32, #tpu.memory_space<vmem>>, vector<288x32xf32>
    %cst_128 = arith.constant dense<0.000000e+00> : vector<256x32xf32>
    %93 = tpu.matmul %91, %92, %cst_128 {dimension_numbers = #tpu.dot_dimension_numbers<[1], [0], [0], [1], [0, 0, 1, 1], [], []>} : vector<256x288xf32>, vector<288x32xf32>, vector<256x32xf32> -> vector<256x32xf32>
    %c0_129 = arith.constant 0 : index
    %c0_130 = arith.constant 0 : index
    %94 = vector.load %arg6[%c0_129, %c0_130] : memref<1x32xf32, #tpu.memory_space<vmem>>, vector<1x32xf32>
    %95 = vector.broadcast %94 : vector<1x32xf32> to vector<256x32xf32>
    %96 = arith.mulf %93, %95 : vector<256x32xf32>
    %c0_131 = arith.constant 0 : index
    %c0_132 = arith.constant 0 : index
    %97 = vector.load %arg7[%c0_131, %c0_132] : memref<1x32xf32, #tpu.memory_space<vmem>>, vector<1x32xf32>
    %98 = vector.broadcast %97 : vector<1x32xf32> to vector<256x32xf32>
    %99 = arith.addf %96, %98 : vector<256x32xf32>
    %cst_133 = arith.constant 0.000000e+00 : f32
    %100 = vector.broadcast %cst_133 : f32 to vector<256x32xf32>
    %101 = arith.maximumf %99, %100 : vector<256x32xf32>
    %102 = vector.shape_cast %101 : vector<256x32xf32> to vector<16x16x32xf32>
    %c0_134 = arith.constant 0 : index
    %c0_135 = arith.constant 0 : index
    %c0_136 = arith.constant 0 : index
    %c0_137 = arith.constant 0 : index
    %103 = vector.load %arg8[%c0_134, %c0_135, %c0_136, %c0_137] : memref<1x16x16x32xf32, #tpu.memory_space<vmem>>, vector<1x16x16x32xf32>
    %104 = vector.shape_cast %103 : vector<1x16x16x32xf32> to vector<16x16x32xf32>
    %105 = vector.shape_cast %102 : vector<16x16x32xf32> to vector<1x16x16x32xf32>
    tpu.vector_store %arg8[%c0_134, %c0_135, %c0_136, %c0_137], %105 {strides = array<i32>} : memref<1x16x16x32xf32, #tpu.memory_space<vmem>>, vector<1x16x16x32xf32>,
    return
  }
  func.func @transform_0(%arg0: i32) -> (i32, i32, i32, i32) {
    %c0_i32 = arith.constant 0 : i32
    %c0_i32_0 = arith.constant 0 : i32
    %c0_i32_1 = arith.constant 0 : i32
    %c0_i32_2 = arith.constant 0 : i32
    return %arg0, %c0_i32, %c0_i32_0, %c0_i32_1 : i32, i32, i32, i32
  }
  func.func @transform_1(%arg0: i32) -> (i32, i32, i32) {
    %c0_i32 = arith.constant 0 : i32
    %c0_i32_0 = arith.constant 0 : i32
    %c0_i32_1 = arith.constant 0 : i32
    %c0_i32_2 = arith.constant 0 : i32
    return %c0_i32, %c0_i32_0, %c0_i32_1 : i32, i32, i32
  }
  func.func @transform_2(%arg0: i32) -> (i32, i32) {
    %c0_i32 = arith.constant 0 : i32
    %c0_i32_0 = arith.constant 0 : i32
    %c0_i32_1 = arith.constant 0 : i32
    return %c0_i32, %c0_i32_0 : i32, i32
  }
  func.func @transform_3(%arg0: i32) -> (i32, i32) {
    %c0_i32 = arith.constant 0 : i32
    %c0_i32_0 = arith.constant 0 : i32
    %c0_i32_1 = arith.constant 0 : i32
    return %c0_i32, %c0_i32_0 : i32, i32
  }
  func.func @transform_4(%arg0: i32) -> (i32, i32) {
    %c0_i32 = arith.constant 0 : i32
    %c0_i32_0 = arith.constant 0 : i32
    %c0_i32_1 = arith.constant 0 : i32
    return %c0_i32, %c0_i32_0 : i32, i32
  }
  func.func @transform_5(%arg0: i32) -> (i32, i32) {
    %c0_i32 = arith.constant 0 : i32
    %c0_i32_0 = arith.constant 0 : i32
    %c0_i32_1 = arith.constant 0 : i32
    return %c0_i32, %c0_i32_0 : i32, i32
  }
  func.func @transform_6(%arg0: i32) -> (i32, i32) {
    %c0_i32 = arith.constant 0 : i32
    %c0_i32_0 = arith.constant 0 : i32
    %c0_i32_1 = arith.constant 0 : i32
    return %c0_i32, %c0_i32_0 : i32, i32
  }
  func.func @transform_7(%arg0: i32) -> (i32, i32, i32, i32) {
    %c0_i32 = arith.constant 0 : i32
    %c0_i32_0 = arith.constant 0 : i32
    %c0_i32_1 = arith.constant 0 : i32
    %c0_i32_2 = arith.constant 0 : i32
    return %arg0, %c0_i32, %c0_i32_0, %c0_i32_1 : i32, i32, i32, i32
  }
}

</mosaic_0001>

<bundles_post_ra>
// kernel: in_conv_forward.1
= control target key start
LH: loop header
LB: loop body
LE: loop exit
PB: predicated region body
PF: predicated region fallthrough
CT: control target
= control target key end

     0   :  { %12 = vsyncpa [#allocation6], 0  ;;  %s10572_s0 = inlined_call_operand.vmem [shape: f32[2,16,16,4], index: 0, kind: input, shape index: {}]   ;;  %s10573_s1 = inlined_call_operand.vmem [shape: f32[9,4,32], index: 1, kind: input, shape index: {}]   ;;  %s10574_s2 = inlined_call_operand.vmem [shape: f32[1,32], index: 2, kind: input, shape index: {}]   ;;  %s10575_s3 = inlined_call_operand.vmem [shape: f32[1,32], index: 3, kind: input, shape index: {}]   ;;  %s10576_s4 = inlined_call_operand.vmem [shape: f32[288,32], index: 4, kind: input, shape index: {}]   ;;  %s10577_s5 = inlined_call_operand.vmem [shape: f32[1,32], index: 5, kind: input, shape index: {}]   ;;  %s10578_s6 = inlined_call_operand.vmem [shape: f32[1,32], index: 6, kind: input, shape index: {}]   ;;  %s10579_s7 = inlined_call_operand.hbm [shape: f32[2,16,16,32], index: 7, kind: output, shape index: {}]  }
   0x1   :  { %14 = vsyncpa [#allocation6 + $0x1], 0  ;;  %s7952_s24 = smov 0   ;;  %s7954_s25 = smov 0  }
   0x2   :  { %s7956_s26 = smov 0   ;;  %s7958_s27 = smov 0  }
   0x3 LB: > { %s7973_s28 = sadd.s32 4294967295, %s7902_s27   ;;  %s6288_s29 = sadd.s32 4294967294, %s7902_s27   ;;  %s7902_s27 = sphi %s7958_s27, %s10672_s27   ;;  %s7898_s26 = sphi %s7956_s26, %s10671_s26   ;;  %s7894_s25 = sphi %s7954_s25, %s10670_s25   ;;  %s7890_s24 = sphi %s7952_s24, %s10669_s24  }
   0x4   : > { %s7977_s30 = sadd.s32 1, %s7902_s27   ;;  %s179_s8 = sadd.s32 1, %s7898_s26 }
   0x5   : > { %s176_s9 = ssub.s32 %s7902_s27, %s7977_s30  ;;  %p189_p0 = scmp.ne.s32.totalorder %s7898_s26, %s7894_s25 }
   0x6   : > { %p177_p1 = scmp.eq.s32.totalorder %s176_s9, 0  ;;  %p190_p2 = scmp.eq.s32.totalorder %s7973_s28, 1 }
   0x7   : > { %p195_p3 = scmp.ne.s32.totalorder %s7894_s25, %s7890_s24  ;;  %p196_p4 = scmp.eq.s32.totalorder %s6288_s29, 1 }
   0x8   : > { %s7988_s10 = scalar_select %p177_p1, %s7898_s26, %s179_s8  }
   0x9   : > { %p7990_p5 = por %p190_p2, %p189_p0  ;;  %p7994_p6 = por %p196_p4, %p195_p3 }
   0xa   : > { %p6291_p7 = scmp.ge.s32.totalorder %s7902_s27, 1  ;;  %p240_p8 = scmp.lt.s32.totalorder %s7902_s27, 3 }
   0xc   : > { %p241_p9 = pnand %p6291_p7, %p240_p8 }
   0xe   : > { %244 = sbr.rel (%p241_p9) target bundleno = 1400 (0x578), region = 48 }
  0x15   : > { %vm561_vm0 = vcmask 1043456   ;;  %v6396_v0 = vld [vmem:[%s10573_s1 + $0xc] sm:$0xf]  ;;  %p272_p10 = scmp.lt.s32.totalorder %s7973_s28, 1  ;;  %vm277_vm1 = vcmask 31744   ;;  %v10580_v1 = vmov 0.0  }
  0x16   : > { %7126 = vmatprep.subr.msk.mxu0 %vm561_vm0, %v6396_v0  ;;  %282 = vst.msk [vmem:[#allocation2 + $0x18] sm:$0xff] %vm277_vm1, %v10580_v1  ;;  %283 = vst.msk [vmem:[#allocation2 + $0x20] sm:$0xff] %vm277_vm1, %v10580_v1  ;;  %v8080_v2 = vld [vmem:[%s10573_s1 + $0x10] sm:$0xf]  ;;  %vm280_vm2 = vcmask 25600   ;;  %vm3955_vm3 = vcmask 261120  }
  0x17   : > { %278 = vst.msk [vmem:[#allocation2] sm:$0xff] %vm277_vm1, %v10580_v1  ;;  %279 = vst.msk [vmem:[#allocation2 + $0x8] sm:$0xff] %vm277_vm1, %v10580_v1  ;;  %v6295_v3 = vld [vmem:[%s10573_s1 + $0x4] sm:$0xf]  ;;  %7127 = vmatpush3.msk.msra.mxu0 %vm561_vm0, %v6396_v0  ;;  %s273_s19 = scalar_select %p272_p10, %s7973_s28, 1  ;;  %vm3958_vm4 = vcmask 254976  }
  0x18   : > { %285 = vst.msk [vmem:[#allocation2 + $0x30] sm:$0xff] %vm277_vm1, %v10580_v1  ;;  %286 = vst.msk [vmem:[#allocation2 + $0x38] sm:$0xff] %vm277_vm1, %v10580_v1  ;;  %6976 = vmatprep.subr.msk.mxu1 %vm561_vm0, %v6295_v3  ;;  %7176 = vmatprep.subr.msk.mxu0 %vm561_vm0, %v8080_v2  ;;  %v8193_v31 = vld [vmem:[%s10573_s1 + $0x14] sm:$0xf]  ;;  %v430_v61 = vld [vmem:[%s10573_s1] sm:$0xf] }
  0x19   : > { %288 = vst.msk [vmem:[#allocation2 + $0x48] sm:$0xff] %vm277_vm1, %v10580_v1  ;;  %289 = vst.msk [vmem:[#allocation2 + $0x50] sm:$0xff] %vm277_vm1, %v10580_v1  ;;  %6977 = vmatpush3.msk.msra.mxu1 %vm561_vm0, %v6295_v3  ;;  %s6641_s20 = sshll.u32 %s273_s19, 8  ;;  %s7905_s22 = smov 64   ;;  %vm4268_vm5 = vcmask 523520   ;;  %vm4461_vm6 = vcmask 785920  }
  0x1a   : > { %291 = vst.msk [vmem:[#allocation2 + $0x60] sm:$0xff] %vm277_vm1, %v10580_v1  ;;  %292 = vst.msk [vmem:[#allocation2 + $0x68] sm:$0xff] %vm277_vm1, %v10580_v1  ;;  %s8132_s23 = scalar_lea.vmem %s10572_s0, %s6641_s20  ;;  %7026 = vmatprep.subr.msk.mxu1 %vm561_vm0, %v430_v61  ;;  %s7907_s29 = smov 96   ;;  %vm4654_vm7 = vcmask 1048320  }
  0x1b   : > { %294 = vst.msk [vmem:[#allocation2 + $0x78] sm:$0xff] %vm277_vm1, %v10580_v1  ;;  %295 = vst.msk [vmem:[#allocation2 + $0x80] sm:$0xff] %vm277_vm1, %v10580_v1  ;;  %v333_v4 = vld [vmem:[%s8132_s23] sm:$0xff]  ;;  %v334_v5 = vld [vmem:[%s8132_s23 + $0x8] sm:$0xff]  ;;  %s6642_s14 = sshll.u32 %s7973_s28, 12  ;;  %s7909_s20 = smov [#allocation5]  }
  0x1c   : > { %297 = vst.msk [vmem:[#allocation2 + $0x90] sm:$0xff] %vm277_vm1, %v10580_v1  ;;  %298 = vst.msk [vmem:[#allocation2 + $0x98] sm:$0xff] %vm277_vm1, %v10580_v1  ;;  %v335_v6 = vld [vmem:[%s8132_s23 + $0x10] sm:$0xff]  ;;  %v336_v7 = vld [vmem:[%s8132_s23 + $0x18] sm:$0xff]  ;;  %s10521_s18 = scalar_lea.hbm %s10579_s7, %s6642_s14 }
  0x1d   : > { %300 = vst.msk [vmem:[#allocation2 + $0xa8] sm:$0xff] %vm277_vm1, %v10580_v1  ;;  %301 = vst.msk [vmem:[#allocation2 + $0xb0] sm:$0xff] %vm277_vm1, %v10580_v1  ;;  %v337_v8 = vld [vmem:[%s8132_s23 + $0x20] sm:$0xff]  ;;  %v338_v9 = vld [vmem:[%s8132_s23 + $0x28] sm:$0xff] }
  0x1e   : > { %303 = vst.msk [vmem:[#allocation2 + $0xc0] sm:$0xff] %vm277_vm1, %v10580_v1  ;;  %304 = vst.msk [vmem:[#allocation2 + $0xc8] sm:$0xff] %vm277_vm1, %v10580_v1  ;;  %v339_v10 = vld [vmem:[%s8132_s23 + $0x30] sm:$0xff]  ;;  %v340_v11 = vld [vmem:[%s8132_s23 + $0x38] sm:$0xff] }
  0x1f   : > { %306 = vst.msk [vmem:[#allocation2 + $0xd8] sm:$0xff] %vm277_vm1, %v10580_v1  ;;  %307 = vst.msk [vmem:[#allocation2 + $0xe0] sm:$0xff] %vm277_vm1, %v10580_v1  ;;  %v341_v12 = vld [vmem:[%s8132_s23 + $0x40] sm:$0xff]  ;;  %v342_v13 = vld [vmem:[%s8132_s23 + $0x48] sm:$0xff] }
  0x20   : > { %309 = vst.msk [vmem:[#allocation2 + $0xf0] sm:$0xff] %vm277_vm1, %v10580_v1  ;;  %310 = vst.msk [vmem:[#allocation2 + $0xf8] sm:$0xff] %vm277_vm1, %v10580_v1  ;;  %v343_v14 = vld [vmem:[%s8132_s23 + $0x50] sm:$0xff]  ;;  %v344_v15 = vld [vmem:[%s8132_s23 + $0x58] sm:$0xff] }
  0x21   : > { %312 = vst.msk [vmem:[#allocation2 + $0x108] sm:$0xff] %vm277_vm1, %v10580_v1  ;;  %313 = vst.msk [vmem:[#allocation2 + $0x110] sm:$0xff] %vm277_vm1, %v10580_v1  ;;  %v345_v16 = vld [vmem:[%s8132_s23 + $0x60] sm:$0xff]  ;;  %v346_v17 = vld [vmem:[%s8132_s23 + $0x68] sm:$0xff] }
  0x22   : > { %315 = vst.msk [vmem:[#allocation2 + $0x120] sm:$0xff] %vm277_vm1, %v10580_v1  ;;  %316 = vst.msk [vmem:[#allocation2 + $0x128] sm:$0xff] %vm277_vm1, %v10580_v1  ;;  %v347_v18 = vld [vmem:[%s8132_s23 + $0x70] sm:$0xff]  ;;  %v348_v19 = vld [vmem:[%s8132_s23 + $0x78] sm:$0xff] }
  0x23   : > { %318 = vst.msk [vmem:[#allocation2 + $0x138] sm:$0xff] %vm277_vm1, %v10580_v1  ;;  %319 = vst.msk [vmem:[#allocation2 + $0x140] sm:$0xff] %vm277_vm1, %v10580_v1  ;;  %v349_v20 = vld [vmem:[%s8132_s23 + $0x80] sm:$0xff]  ;;  %v350_v21 = vld [vmem:[%s8132_s23 + $0x88] sm:$0xff] }
  0x24   : > { %321 = vst.msk [vmem:[#allocation2 + $0x150] sm:$0xff] %vm277_vm1, %v10580_v1  ;;  %322 = vst.msk [vmem:[#allocation2 + $0x158] sm:$0xff] %vm277_vm1, %v10580_v1  ;;  %v351_v22 = vld [vmem:[%s8132_s23 + $0x90] sm:$0xff]  ;;  %v352_v23 = vld [vmem:[%s8132_s23 + $0x98] sm:$0xff] }
  0x25   : > { %324 = vst.msk [vmem:[#allocation2 + $0x168] sm:$0xff] %vm277_vm1, %v10580_v1  ;;  %325 = vst.msk [vmem:[#allocation2 + $0x170] sm:$0xff] %vm277_vm1, %v10580_v1  ;;  %v353_v24 = vld [vmem:[%s8132_s23 + $0xa0] sm:$0xff]  ;;  %v354_v25 = vld [vmem:[%s8132_s23 + $0xa8] sm:$0xff] }
  0x26   : > { %327 = vst.msk [vmem:[#allocation2 + $0x180] sm:$0xff] %vm277_vm1, %v10580_v1  ;;  %328 = vst.msk [vmem:[#allocation2 + $0x188] sm:$0xff] %vm277_vm1, %v10580_v1  ;;  %v355_v26 = vld [vmem:[%s8132_s23 + $0xb0] sm:$0xff]  ;;  %v356_v27 = vld [vmem:[%s8132_s23 + $0xb8] sm:$0xff] }
  0x27   : > { %330 = vst.msk [vmem:[#allocation2 + $0x198] sm:$0xff] %vm277_vm1, %v10580_v1  ;;  %331 = vst.msk [vmem:[#allocation2 + $0x1a0] sm:$0xff] %vm277_vm1, %v10580_v1  ;;  %v357_v36 = vld [vmem:[%s8132_s23 + $0xc0] sm:$0xff]  ;;  %v358_v37 = vld [vmem:[%s8132_s23 + $0xc8] sm:$0xff] }
  0x28   : > { %284 = vst.msk [vmem:[#allocation2 + $0x28] sm:$0x3] %vm280_vm2, %v10580_v1  ;;  %281 = vst.msk [vmem:[#allocation2 + $0x10] sm:$0x3] %vm280_vm2, %v10580_v1  ;;  %v359_v38 = vld [vmem:[%s8132_s23 + $0xd0] sm:$0xff]  ;;  %v360_v39 = vld [vmem:[%s8132_s23 + $0xd8] sm:$0xff] }
  0x29   : > { %287 = vst.msk [vmem:[#allocation2 + $0x40] sm:$0x3] %vm280_vm2, %v10580_v1  ;;  %290 = vst.msk [vmem:[#allocation2 + $0x58] sm:$0x3] %vm280_vm2, %v10580_v1  ;;  %v361_v40 = vld [vmem:[%s8132_s23 + $0xe0] sm:$0xff]  ;;  %v362_v41 = vld [vmem:[%s8132_s23 + $0xe8] sm:$0xff] }
  0x2a   : > { %293 = vst.msk [vmem:[#allocation2 + $0x70] sm:$0x3] %vm280_vm2, %v10580_v1  ;;  %296 = vst.msk [vmem:[#allocation2 + $0x88] sm:$0x3] %vm280_vm2, %v10580_v1  ;;  %v363_v42 = vld [vmem:[%s8132_s23 + $0xf0] sm:$0xff]  ;;  %v364_v43 = vld [vmem:[%s8132_s23 + $0xf8] sm:$0xff] }
  0x2b   : > { %299 = vst.msk [vmem:[#allocation2 + $0xa0] sm:$0x3] %vm280_vm2, %v10580_v1  ;;  %302 = vst.msk [vmem:[#allocation2 + $0xb8] sm:$0x3] %vm280_vm2, %v10580_v1  ;;  %v431_v44 = vld [vmem:[#allocation2 + $0x1] sm:$0xff]  ;;  %s7906_s23 = smov 32  }
  0x2c   : > { %305 = vst.msk [vmem:[#allocation2 + $0xd0] sm:$0x3] %vm280_vm2, %v10580_v1  ;;  %308 = vst.msk [vmem:[#allocation2 + $0xe8] sm:$0x3] %vm280_vm2, %v10580_v1  ;;  %6978 = vmatprep.mubr.msk.f32.mxu1 %vm277_vm1, %v431_v44 }
  0x2d   : > { %311 = vst.msk [vmem:[#allocation2 + $0x100] sm:$0x3] %vm280_vm2, %v10580_v1  ;;  %314 = vst.msk [vmem:[#allocation2 + $0x118] sm:$0x3] %vm280_vm2, %v10580_v1 }
  0x2e   : > { %317 = vst.msk [vmem:[#allocation2 + $0x130] sm:$0x3] %vm280_vm2, %v10580_v1  ;;  %320 = vst.msk [vmem:[#allocation2 + $0x148] sm:$0x3] %vm280_vm2, %v10580_v1 }
  0x2f   : > { %323 = vst.msk [vmem:[#allocation2 + $0x160] sm:$0x3] %vm280_vm2, %v10580_v1  ;;  %326 = vst.msk [vmem:[#allocation2 + $0x178] sm:$0x3] %vm280_vm2, %v10580_v1  ;;  %v432_v46 = vld [vmem:[#allocation2 + $0x9] sm:$0xff] }
  0x30   : > { %329 = vst.msk [vmem:[#allocation2 + $0x190] sm:$0x3] %vm280_vm2, %v10580_v1  ;;  %332 = vst.msk [vmem:[#allocation2 + $0x1a8] sm:$0x3] %vm280_vm2, %v10580_v1  ;;  %6979 = vmatmul.mubr.msk.f32.vlgmr.msra.gmra.mrb[0].mxu1 %vm277_vm1, %v432_v46  ;;  %v8459_v46 = vld [vmem:[%s10573_s1 + $0x18] sm:$0xf] }
  0x31   : > { %366 = vst.msk [vmem:[#allocation2 + $0x19] sm:$0xff] %vm277_vm1, %v333_v4  ;;  %367 = vst.msk [vmem:[#allocation2 + $0x21] sm:$0xff] %vm277_vm1, %v334_v5  ;;  %7027 = vmatpush3.msk.msra.mxu1 %vm561_vm0, %v430_v61  ;;  %v399_v1 = vld [vmem:[#allocation2 + $0x8] sm:$0xff] }
  0x32   : > { %368 = vst.msk [vmem:[#allocation2 + $0x31] sm:$0xff] %vm277_vm1, %v335_v6  ;;  %369 = vst.msk [vmem:[#allocation2 + $0x39] sm:$0xff] %vm277_vm1, %v336_v7 }
  0x33   : > { %370 = vst.msk [vmem:[#allocation2 + $0x49] sm:$0xff] %vm277_vm1, %v337_v8  ;;  %371 = vst.msk [vmem:[#allocation2 + $0x51] sm:$0xff] %vm277_vm1, %v338_v9 }
  0x34   : > { %372 = vst.msk [vmem:[#allocation2 + $0x61] sm:$0xff] %vm277_vm1, %v339_v10  ;;  %373 = vst.msk [vmem:[#allocation2 + $0x69] sm:$0xff] %vm277_vm1, %v340_v11 }
  0x35   : > { %374 = vst.msk [vmem:[#allocation2 + $0x79] sm:$0xff] %vm277_vm1, %v341_v12  ;;  %375 = vst.msk [vmem:[#allocation2 + $0x81] sm:$0xff] %vm277_vm1, %v342_v13 }
  0x36   : > { %376 = vst.msk [vmem:[#allocation2 + $0x91] sm:$0xff] %vm277_vm1, %v343_v14  ;;  %377 = vst.msk [vmem:[#allocation2 + $0x99] sm:$0xff] %vm277_vm1, %v344_v15 }
  0x37   : > { %378 = vst.msk [vmem:[#allocation2 + $0xa9] sm:$0xff] %vm277_vm1, %v345_v16  ;;  %379 = vst.msk [vmem:[#allocation2 + $0xb1] sm:$0xff] %vm277_vm1, %v346_v17 }
  0x38   : > { %380 = vst.msk [vmem:[#allocation2 + $0xc1] sm:$0xff] %vm277_vm1, %v347_v18  ;;  %381 = vst.msk [vmem:[#allocation2 + $0xc9] sm:$0xff] %vm277_vm1, %v348_v19  ;;  %v8179_v28 = vld [vmem:[#allocation2 + $0x18] sm:$0xff]  ;;  %v8181_v29 = vld [vmem:[#allocation2 + $0x20] sm:$0xff] }
  0x39   : > { %382 = vst.msk [vmem:[#allocation2 + $0xd9] sm:$0xff] %vm277_vm1, %v349_v20  ;;  %383 = vst.msk [vmem:[#allocation2 + $0xe1] sm:$0xff] %vm277_vm1, %v350_v21  ;;  %v8183_v30 = vld [vmem:[#allocation2 + $0x30] sm:$0xff]  ;;  %7128 = vmatprep.mubr.msk.f32.mxu0 %vm277_vm1, %v8179_v28  ;;  %v8201_v32 = vld [vmem:[#allocation2 + $0x38] sm:$0xff] }
  0x3a   : > { %384 = vst.msk [vmem:[#allocation2 + $0xf1] sm:$0xff] %vm277_vm1, %v351_v22  ;;  %385 = vst.msk [vmem:[#allocation2 + $0xf9] sm:$0xff] %vm277_vm1, %v352_v23  ;;  %7129 = vmatmul.mubr.msk.f32.vlgmr.msra.gmra.mrb[0].mxu0 %vm277_vm1, %v8181_v29  ;;  %v8203_v33 = vld [vmem:[#allocation2 + $0x48] sm:$0xff]  ;;  %v8211_v34 = vld [vmem:[#allocation2 + $0x50] sm:$0xff] }
  0x3b   : > { %386 = vst.msk [vmem:[#allocation2 + $0x109] sm:$0xff] %vm277_vm1, %v353_v24  ;;  %387 = vst.msk [vmem:[#allocation2 + $0x111] sm:$0xff] %vm277_vm1, %v354_v25  ;;  %7177 = vmatpush3.msk.msra.mxu0 %vm561_vm0, %v8080_v2  ;;  %7131 = vmatprep.mubr.msk.f32.mxu0 %vm277_vm1, %v8183_v30  ;;  %v8213_v35 = vld [vmem:[#allocation2 + $0x60] sm:$0xff]  ;;  %v8233_v45 = vld [vmem:[#allocation2 + $0x68] sm:$0xff] }
  0x3c   : > { %388 = vst.msk [vmem:[#allocation2 + $0x121] sm:$0xff] %vm277_vm1, %v355_v26  ;;  %389 = vst.msk [vmem:[#allocation2 + $0x129] sm:$0xff] %vm277_vm1, %v356_v27  ;;  %7226 = vmatprep.subr.msk.mxu0 %vm561_vm0, %v8193_v31  ;;  %v8238_v47 = vld [vmem:[#allocation2 + $0x78] sm:$0xff]  ;;  %v8249_v49 = vld [vmem:[#allocation2 + $0x80] sm:$0xff] }
  0x3d   : > { %390 = vst.msk [vmem:[#allocation2 + $0x139] sm:$0xff] %vm277_vm1, %v357_v36  ;;  %391 = vst.msk [vmem:[#allocation2 + $0x141] sm:$0xff] %vm277_vm1, %v358_v37  ;;  %v8241_v48 = vld [vmem:[#allocation2 + $0x19] sm:$0xff]  ;;  %v8251_v50 = vld [vmem:[#allocation2 + $0x21] sm:$0xff] }
  0x3e   : > { %7132 = vmatmul.mubr.msk.f32.gmra.mrb[2].mxu0 %vm277_vm1, %v8201_v32  ;;  %392 = vst.msk [vmem:[#allocation2 + $0x151] sm:$0xff] %vm277_vm1, %v359_v38  ;;  %393 = vst.msk [vmem:[#allocation2 + $0x159] sm:$0xff] %vm277_vm1, %v360_v39  ;;  %6981 = vmatprep.mubr.msk.f32.mxu1 %vm277_vm1, %v8241_v48  ;;  %v8253_v51 = vld [vmem:[#allocation2 + $0x90] sm:$0xff]  ;;  %v8265_v53 = vld [vmem:[#allocation2 + $0x98] sm:$0xff] }
  0x3f   : > { %7134 = vmatprep.mubr.msk.f32.mxu0 %vm277_vm1, %v8203_v33  ;;  %394 = vst.msk [vmem:[#allocation2 + $0x169] sm:$0xff] %vm277_vm1, %v361_v40  ;;  %395 = vst.msk [vmem:[#allocation2 + $0x171] sm:$0xff] %vm277_vm1, %v362_v41  ;;  %6982 = vmatmul.mubr.msk.f32.gmra.mrb[2].mxu1 %vm277_vm1, %v8251_v50  ;;  %v8257_v52 = vld [vmem:[#allocation2 + $0x31] sm:$0xff]  ;;  %v8267_v54 = vld [vmem:[#allocation2 + $0x39] sm:$0xff] }
  0x40   : > { %396 = vst.msk [vmem:[#allocation2 + $0x181] sm:$0xff] %vm277_vm1, %v363_v42  ;;  %397 = vst.msk [vmem:[#allocation2 + $0x189] sm:$0xff] %vm277_vm1, %v364_v43  ;;  %6984 = vmatprep.mubr.msk.f32.mxu1 %vm277_vm1, %v8257_v52  ;;  %v8269_v55 = vld [vmem:[#allocation2 + $0xa8] sm:$0xff]  ;;  %v8281_v57 = vld [vmem:[#allocation2 + $0xb0] sm:$0xff] }
  0x41   : > { %v8273_v56 = vld [vmem:[#allocation2 + $0x49] sm:$0xff]  ;;  %v8283_v58 = vld [vmem:[#allocation2 + $0x51] sm:$0xff]  ;;  %v8285_v59 = vld [vmem:[#allocation2 + $0xc0] sm:$0xff] }
  0x42   : > { %7135 = vmatmul.mubr.msk.f32.gmra.mrb[4].mxu0 %vm277_vm1, %v8211_v34  ;;  %v8289_v60 = vld [vmem:[#allocation2 + $0x61] sm:$0xff]  ;;  %v8304_v63 = vld [vmem:[#allocation2 + $0x69] sm:$0xff]  ;;  %v8306_v0 = vld [vmem:[#allocation2 + $0xd8] sm:$0xff] }
  0x43   : > { %7137 = vmatprep.mubr.msk.f32.mxu0 %vm277_vm1, %v8213_v35  ;;  %6985 = vmatmul.mubr.msk.f32.gmra.mrb[4].mxu1 %vm277_vm1, %v8267_v54  ;;  %v8302_v62 = vld [vmem:[#allocation2 + $0xc8] sm:$0xff]  ;;  %v8310_v2 = vld [vmem:[#allocation2 + $0x79] sm:$0xff]  ;;  %v8322_v5 = vld [vmem:[#allocation2 + $0xf0] sm:$0xff] }
  0x44   : > { %6987 = vmatprep.mubr.msk.f32.mxu1 %vm277_vm1, %v8273_v56  ;;  %v8318_v3 = vld [vmem:[#allocation2 + $0xe0] sm:$0xff]  ;;  %v8326_v6 = vld [vmem:[#allocation2 + $0x91] sm:$0xff]  ;;  %v8338_v9 = vld [vmem:[#allocation2 + $0x108] sm:$0xff] }
  0x45   : > { %v8320_v4 = vld [vmem:[#allocation2 + $0x81] sm:$0xff]  ;;  %v8334_v7 = vld [vmem:[#allocation2 + $0xf8] sm:$0xff]  ;;  %v8342_v10 = vld [vmem:[#allocation2 + $0xa9] sm:$0xff] }
  0x46   : > { %7138 = vmatmul.mubr.msk.f32.gmra.mrb[6].mxu0 %vm277_vm1, %v8233_v45  ;;  %v8336_v8 = vld [vmem:[#allocation2 + $0x99] sm:$0xff]  ;;  %v8350_v11 = vld [vmem:[#allocation2 + $0x110] sm:$0xff]  ;;  %v8358_v14 = vld [vmem:[#allocation2 + $0xc1] sm:$0xff] }
  0x47   : > { %7140 = vmatprep.mubr.msk.f32.mxu0 %vm277_vm1, %v8238_v47  ;;  %6988 = vmatmul.mubr.msk.f32.gmra.mrb[6].mxu1 %vm277_vm1, %v8283_v58  ;;  %v8352_v12 = vld [vmem:[#allocation2 + $0xb1] sm:$0xff]  ;;  %v8354_v13 = vld [vmem:[#allocation2 + $0x120] sm:$0xff]  ;;  %v8366_v15 = vld [vmem:[#allocation2 + $0x128] sm:$0xff] }
  0x48   : > { %6990 = vmatprep.mubr.msk.f32.mxu1 %vm277_vm1, %v8289_v60  ;;  %v8368_v16 = vld [vmem:[#allocation2 + $0xc9] sm:$0xff]  ;;  %v8370_v17 = vld [vmem:[#allocation2 + $0x138] sm:$0xff]  ;;  %v8382_v19 = vld [vmem:[#allocation2 + $0x140] sm:$0xff] }
  0x49   : > { %v8374_v18 = vld [vmem:[#allocation2 + $0xd9] sm:$0xff]  ;;  %v8384_v20 = vld [vmem:[#allocation2 + $0xe1] sm:$0xff]  ;;  %v8386_v21 = vld [vmem:[#allocation2 + $0x150] sm:$0xff] }
  0x4a   : > { %7141 = vmatmul.mubr.msk.f32.gmra.mrb[8].mxu0 %vm277_vm1, %v8249_v49  ;;  %v8390_v22 = vld [vmem:[#allocation2 + $0xf1] sm:$0xff]  ;;  %v8400_v24 = vld [vmem:[#allocation2 + $0xf9] sm:$0xff]  ;;  %v8402_v25 = vld [vmem:[#allocation2 + $0x168] sm:$0xff] }
  0x4b   : > { %7143 = vmatprep.mubr.msk.f32.mxu0 %vm277_vm1, %v8253_v51  ;;  %6991 = vmatmul.mubr.msk.f32.gmra.mrb[8].mxu1 %vm277_vm1, %v8304_v63  ;;  %v8398_v23 = vld [vmem:[#allocation2 + $0x158] sm:$0xff]  ;;  %v8406_v26 = vld [vmem:[#allocation2 + $0x109] sm:$0xff]  ;;  %v8418_v37 = vld [vmem:[#allocation2 + $0x180] sm:$0xff] }
  0x4c   : > { %6993 = vmatprep.mubr.msk.f32.mxu1 %vm277_vm1, %v8310_v2  ;;  %v8414_v27 = vld [vmem:[#allocation2 + $0x170] sm:$0xff]  ;;  %v8422_v38 = vld [vmem:[#allocation2 + $0x121] sm:$0xff]  ;;  %v8436_v41 = vld [vmem:[#allocation2 + $0x139] sm:$0xff] }
  0x4d   : > { %v8416_v36 = vld [vmem:[#allocation2 + $0x111] sm:$0xff]  ;;  %v8430_v39 = vld [vmem:[#allocation2 + $0x188] sm:$0xff]  ;;  %10613 = vst [vmem:[#allocation9_spill] sm:$0xff] %v8436_v41 }
  0x4e   : > { %7144 = vmatmul.mubr.msk.f32.gmra.mrb[10].mxu0 %vm277_vm1, %v8265_v53  ;;  %v8432_v40 = vld [vmem:[#allocation2 + $0x129] sm:$0xff]  ;;  %v8447_v43 = vld [vmem:[#allocation2 + $0x141] sm:$0xff]  ;;  %v8452_v44 = vld [vmem:[#allocation2 + $0x151] sm:$0xff] }
  0x4f   : > { %7146 = vmatprep.mubr.msk.f32.mxu0 %vm277_vm1, %v8269_v55  ;;  %6994 = vmatmul.mubr.msk.f32.gmra.mrb[10].mxu1 %vm277_vm1, %v8320_v4  ;;  %10612 = vst [vmem:[#allocation8_spill] sm:$0xff] %v8432_v40  ;;  %v6362_v42 = vld [vmem:[%s10573_s1 + $0x8] sm:$0xf]  ;;  %10614 = vst [vmem:[#allocation10_spill] sm:$0xff] %v8447_v43 }
  0x50   : > { %6996 = vmatprep.mubr.msk.f32.mxu1 %vm277_vm1, %v8326_v6  ;;  %7076 = vmatprep.subr.msk.mxu1 %vm561_vm0, %v6362_v42  ;;  %10615 = vst [vmem:[#allocation11_spill] sm:$0xff] %v8452_v44  ;;  %v8471_v61 = vld [vmem:[#allocation2 + $0x169] sm:$0xff] }
  0x51   : > { %10617 = vst [vmem:[#allocation13_spill] sm:$0xff] %v8471_v61 }
  0x52   : > { %7147 = vmatmul.mubr.msk.f32.gmra.mrb[12].mxu0 %vm277_vm1, %v8281_v57 }
  0x53   : > { %7149 = vmatprep.mubr.msk.f32.mxu0 %vm277_vm1, %v8285_v59  ;;  %6997 = vmatmul.mubr.msk.f32.gmra.mrb[12].mxu1 %vm277_vm1, %v8336_v8 }
  0x54   : > { %6999 = vmatprep.mubr.msk.f32.mxu1 %vm277_vm1, %v8342_v10 }
  0x56   : > { %7150 = vmatmul.mubr.msk.f32.gmra.mrb[14].mxu0 %vm277_vm1, %v8302_v62 }
  0x57   : > { %7152 = vmatprep.mubr.msk.f32.mxu0 %vm277_vm1, %v8306_v0  ;;  %7000 = vmatmul.mubr.msk.f32.gmra.mrb[14].mxu1 %vm277_vm1, %v8352_v12 }
  0x58   : > { %7002 = vmatprep.mubr.msk.f32.mxu1 %vm277_vm1, %v8358_v14 }
  0x5a   : > { %7153 = vmatmul.mubr.msk.f32.gmra.mrb[16].mxu0 %vm277_vm1, %v8318_v3 }
  0x5b   : > { %7155 = vmatprep.mubr.msk.f32.mxu0 %vm277_vm1, %v8322_v5  ;;  %7003 = vmatmul.mubr.msk.f32.gmra.mrb[16].mxu1 %vm277_vm1, %v8368_v16 }
  0x5c   : > { %7005 = vmatprep.mubr.msk.f32.mxu1 %vm277_vm1, %v8374_v18 }
  0x5e   : > { %7156 = vmatmul.mubr.msk.f32.gmra.mrb[18].mxu0 %vm277_vm1, %v8334_v7 }
  0x5f   : > { %7158 = vmatprep.mubr.msk.f32.mxu0 %vm277_vm1, %v8338_v9  ;;  %7006 = vmatmul.mubr.msk.f32.gmra.mrb[18].mxu1 %vm277_vm1, %v8384_v20 }
  0x60   : > { %7008 = vmatprep.mubr.msk.f32.mxu1 %vm277_vm1, %v8390_v22 }
  0x62   : > { %7159 = vmatmul.mubr.msk.f32.gmra.mrb[20].mxu0 %vm277_vm1, %v8350_v11 }
  0x63   : > { %7161 = vmatprep.mubr.msk.f32.mxu0 %vm277_vm1, %v8354_v13  ;;  %7009 = vmatmul.mubr.msk.f32.gmra.mrb[20].mxu1 %vm277_vm1, %v8400_v24 }
  0x64   : > { %7011 = vmatprep.mubr.msk.f32.mxu1 %vm277_vm1, %v8406_v26 }
  0x66   : > { %7162 = vmatmul.mubr.msk.f32.gmra.mrb[22].mxu0 %vm277_vm1, %v8366_v15 }
  0x67   : > { %7164 = vmatprep.mubr.msk.f32.mxu0 %vm277_vm1, %v8370_v17  ;;  %7012 = vmatmul.mubr.msk.f32.gmra.mrb[22].mxu1 %vm277_vm1, %v8416_v36 }
  0x68   : > { %7014 = vmatprep.mubr.msk.f32.mxu1 %vm277_vm1, %v8422_v38 }
  0x6a   : > { %7165 = vmatmul.mubr.msk.f32.gmra.mrb[24].mxu0 %vm277_vm1, %v8382_v19 }
  0x6b   : > { %7167 = vmatprep.mubr.msk.f32.mxu0 %vm277_vm1, %v8386_v21  ;;  %7015 = vmatmul.mubr.msk.f32.gmra.mrb[24].mxu1 %vm277_vm1, %v8432_v40 }
  0x6c   : > { %7017 = vmatprep.mubr.msk.f32.mxu1 %vm277_vm1, %v8436_v41 }
  0x6e   : > { %7168 = vmatmul.mubr.msk.f32.gmra.mrb[26].mxu0 %vm277_vm1, %v8398_v23 }
  0x6f   : > { %7170 = vmatprep.mubr.msk.f32.mxu0 %vm277_vm1, %v8402_v25  ;;  %7018 = vmatmul.mubr.msk.f32.gmra.mrb[26].mxu1 %vm277_vm1, %v8447_v43 }
  0x70   : > { %7020 = vmatprep.mubr.msk.f32.mxu1 %vm277_vm1, %v8452_v44 }
  0x72   : > { %7171 = vmatmul.mubr.msk.f32.gmra.mrb[28].mxu0 %vm277_vm1, %v8414_v27 }
  0x73   : > { %7173 = vmatprep.mubr.msk.f32.mxu0 %vm277_vm1, %v8418_v37 }
  0x76   : > { %7174 = vmatmul.mubr.msk.f32.gmra.mrb[30].mxu0 %vm277_vm1, %v8430_v39 }
  0x77   : > { %7178 = vmatprep.mubr.msk.f32.mxu0 %vm277_vm1, %v8241_v48  ;;  %v8467_v48 = vld [vmem:[#allocation2 + $0x159] sm:$0xff] }
  0x78   : > { %10616 = vst [vmem:[#allocation12_spill] sm:$0xff] %v8467_v48  ;;  %7021 = vmatmul.mubr.msk.f32.gmra.mrb[28].mxu1 %vm277_vm1, %v8467_v48 }
  0x79   : > { %7023 = vmatprep.mubr.msk.f32.mxu1 %vm277_vm1, %v8471_v61 }
  0x7a   : > { %7179 = vmatmul.mubr.msk.f32.vlgmr.msra.gmra.mrb[0].mxu0 %vm277_vm1, %v8251_v50  ;;  %v8481_v50 = vld [vmem:[#allocation2 + $0x171] sm:$0xff] }
  0x7b   : > { %7227 = vmatpush3.msk.msra.mxu0 %vm561_vm0, %v8193_v31  ;;  %7181 = vmatprep.mubr.msk.f32.mxu0 %vm277_vm1, %v8257_v52  ;;  %v398_v31 = vld [vmem:[#allocation2] sm:$0xff]  ;;  %10618 = vst [vmem:[#allocation14_spill] sm:$0xff] %v8481_v50 }
  0x7c   : > { %7276 = vmatprep.subr.msk.mxu0 %vm561_vm0, %v8459_v46  ;;  %7024 = vmatmul.mubr.msk.f32.gmra.mrb[30].mxu1 %vm277_vm1, %v8481_v50 }
  0x7d   : > { %7028 = vmatprep.mubr.msk.f32.mxu1 %vm277_vm1, %v398_v31  ;;  %v8597_v31 = vld [vmem:[#allocation2 + $0x32] sm:$0xff] }
  0x7e   : > { %7182 = vmatmul.mubr.msk.f32.gmra.mrb[2].mxu0 %vm277_vm1, %v8267_v54  ;;  %10621 = vst [vmem:[#allocation17_spill] sm:$0xff] %v8597_v31 }
  0x7f   : > { %7184 = vmatprep.mubr.msk.f32.mxu0 %vm277_vm1, %v8273_v56 }
  0x80   : > { %7029 = vmatmul.mubr.msk.f32.vlgmr.msra.gmra.mrb[0].mxu1 %vm277_vm1, %v399_v1  ;;  %v8578_v1 = vld [vmem:[#allocation2 + $0x181] sm:$0xff] }
  0x81   : > { %7031 = vmatprep.mubr.msk.f32.mxu1 %vm277_vm1, %v8179_v28  ;;  %7077 = vmatpush3.msk.msra.mxu1 %vm561_vm0, %v6362_v42  ;;  %10619 = vst [vmem:[#allocation15_spill] sm:$0xff] %v8578_v1  ;;  %v8588_v28 = vld [vmem:[#allocation2 + $0x189] sm:$0xff] }
  0x82   : > { %7185 = vmatmul.mubr.msk.f32.gmra.mrb[4].mxu0 %vm277_vm1, %v8283_v58  ;;  %10620 = vst [vmem:[#allocation16_spill] sm:$0xff] %v8588_v28  ;;  %v2285_v42 = vld [vmem:[#allocation2 + $0x22] sm:$0xff] }
  0x83   : > { %7187 = vmatprep.mubr.msk.f32.mxu0 %vm277_vm1, %v8289_v60 }
  0x84   : > { %7032 = vmatmul.mubr.msk.f32.gmra.mrb[2].mxu1 %vm277_vm1, %v8181_v29  ;;  %v2284_v29 = vld [vmem:[#allocation2 + $0x1a] sm:$0xff] }
  0x85   : > { %7034 = vmatprep.mubr.msk.f32.mxu1 %vm277_vm1, %v8183_v30 }
  0x86   : > { %7188 = vmatmul.mubr.msk.f32.gmra.mrb[6].mxu0 %vm277_vm1, %v8304_v63 }
  0x87   : > { %7190 = vmatprep.mubr.msk.f32.mxu0 %vm277_vm1, %v8310_v2 }
  0x88   : > { %7035 = vmatmul.mubr.msk.f32.gmra.mrb[4].mxu1 %vm277_vm1, %v8201_v32 }
  0x89   : > { %7037 = vmatprep.mubr.msk.f32.mxu1 %vm277_vm1, %v8203_v33 }
  0x8a   : > { %7191 = vmatmul.mubr.msk.f32.gmra.mrb[8].mxu0 %vm277_vm1, %v8320_v4 }
  0x8b   : > { %7193 = vmatprep.mubr.msk.f32.mxu0 %vm277_vm1, %v8326_v6 }
  0x8c   : > { %7038 = vmatmul.mubr.msk.f32.gmra.mrb[6].mxu1 %vm277_vm1, %v8211_v34 }
  0x8d   : > { %7040 = vmatprep.mubr.msk.f32.mxu1 %vm277_vm1, %v8213_v35 }
  0x8e   : > { %7194 = vmatmul.mubr.msk.f32.gmra.mrb[10].mxu0 %vm277_vm1, %v8336_v8 }
  0x8f   : > { %7196 = vmatprep.mubr.msk.f32.mxu0 %vm277_vm1, %v8342_v10 }
  0x90   : > { %7041 = vmatmul.mubr.msk.f32.gmra.mrb[8].mxu1 %vm277_vm1, %v8233_v45 }
  0x91   : > { %7043 = vmatprep.mubr.msk.f32.mxu1 %vm277_vm1, %v8238_v47 }
  0x92   : > { %7197 = vmatmul.mubr.msk.f32.gmra.mrb[12].mxu0 %vm277_vm1, %v8352_v12 }
  0x93   : > { %7199 = vmatprep.mubr.msk.f32.mxu0 %vm277_vm1, %v8358_v14 }
  0x94   : > { %7044 = vmatmul.mubr.msk.f32.gmra.mrb[10].mxu1 %vm277_vm1, %v8249_v49 }
  0x95   : > { %7046 = vmatprep.mubr.msk.f32.mxu1 %vm277_vm1, %v8253_v51 }
  0x96   : > { %7200 = vmatmul.mubr.msk.f32.gmra.mrb[14].mxu0 %vm277_vm1, %v8368_v16 }
  0x97   : > { %7202 = vmatprep.mubr.msk.f32.mxu0 %vm277_vm1, %v8374_v18 }
  0x98   : > { %7047 = vmatmul.mubr.msk.f32.gmra.mrb[12].mxu1 %vm277_vm1, %v8265_v53 }
  0x99   : > { %7049 = vmatprep.mubr.msk.f32.mxu1 %vm277_vm1, %v8269_v55 }
  0x9a   : > { %7203 = vmatmul.mubr.msk.f32.gmra.mrb[16].mxu0 %vm277_vm1, %v8384_v20 }
  0x9b   : > { %7205 = vmatprep.mubr.msk.f32.mxu0 %vm277_vm1, %v8390_v22 }
  0x9c   : > { %7050 = vmatmul.mubr.msk.f32.gmra.mrb[14].mxu1 %vm277_vm1, %v8281_v57 }
  0x9d   : > { %7052 = vmatprep.mubr.msk.f32.mxu1 %vm277_vm1, %v8285_v59 }
  0x9e   : > { %7206 = vmatmul.mubr.msk.f32.gmra.mrb[18].mxu0 %vm277_vm1, %v8400_v24 }
  0x9f   : > { %7208 = vmatprep.mubr.msk.f32.mxu0 %vm277_vm1, %v8406_v26 }
  0xa0   : > { %7053 = vmatmul.mubr.msk.f32.gmra.mrb[16].mxu1 %vm277_vm1, %v8302_v62 }
  0xa1   : > { %7055 = vmatprep.mubr.msk.f32.mxu1 %vm277_vm1, %v8306_v0 }
  0xa2   : > { %7209 = vmatmul.mubr.msk.f32.gmra.mrb[20].mxu0 %vm277_vm1, %v8416_v36 }
  0xa3   : > { %7211 = vmatprep.mubr.msk.f32.mxu0 %vm277_vm1, %v8422_v38 }
  0xa4   : > { %7056 = vmatmul.mubr.msk.f32.gmra.mrb[18].mxu1 %vm277_vm1, %v8318_v3 }
  0xa5   : > { %7058 = vmatprep.mubr.msk.f32.mxu1 %vm277_vm1, %v8322_v5 }
  0xa6   : > { %7212 = vmatmul.mubr.msk.f32.gmra.mrb[22].mxu0 %vm277_vm1, %v8432_v40  ;;  %v8650_v40 = vld [vmem:[#allocation2 + $0x92] sm:$0xff] }
  0xa7   : > { %7214 = vmatprep.mubr.msk.f32.mxu0 %vm277_vm1, %v8436_v41  ;;  %v8640_v41 = vld [vmem:[#allocation2 + $0x7a] sm:$0xff]  ;;  %10629 = vst [vmem:[#allocation25_spill] sm:$0xff] %v8650_v40 }
  0xa8   : > { %7059 = vmatmul.mubr.msk.f32.gmra.mrb[20].mxu1 %vm277_vm1, %v8334_v7  ;;  %10627 = vst [vmem:[#allocation23_spill] sm:$0xff] %v8640_v41 }
  0xa9   : > { %7061 = vmatprep.mubr.msk.f32.mxu1 %vm277_vm1, %v8338_v9 }
  0xaa   : > { %7215 = vmatmul.mubr.msk.f32.gmra.mrb[24].mxu0 %vm277_vm1, %v8447_v43  ;;  %v8638_v43 = vld [vmem:[#allocation2 + $0x6a] sm:$0xff] }
  0xab   : > { %7217 = vmatprep.mubr.msk.f32.mxu0 %vm277_vm1, %v8452_v44  ;;  %v1115_v44 = vld [vmem:[#allocation2 + $0xa] sm:$0xff]  ;;  %10626 = vst [vmem:[#allocation22_spill] sm:$0xff] %v8638_v43 }
  0xac   : > { %7062 = vmatmul.mubr.msk.f32.gmra.mrb[22].mxu1 %vm277_vm1, %v8350_v11 }
  0xad   : > { %7064 = vmatprep.mubr.msk.f32.mxu1 %vm277_vm1, %v8354_v13 }
  0xae   : > { %7218 = vmatmul.mubr.msk.f32.gmra.mrb[26].mxu0 %vm277_vm1, %v8467_v48  ;;  %v8629_v48 = vld [vmem:[#allocation2 + $0x62] sm:$0xff] }
  0xaf   : > { %7220 = vmatprep.mubr.msk.f32.mxu0 %vm277_vm1, %v8471_v61  ;;  %v8627_v61 = vld [vmem:[#allocation2 + $0x52] sm:$0xff]  ;;  %10625 = vst [vmem:[#allocation21_spill] sm:$0xff] %v8629_v48 }
  0xb0   : > { %7065 = vmatmul.mubr.msk.f32.gmra.mrb[24].mxu1 %vm277_vm1, %v8366_v15  ;;  %10624 = vst [vmem:[#allocation20_spill] sm:$0xff] %v8627_v61 }
  0xb1   : > { %7067 = vmatprep.mubr.msk.f32.mxu1 %vm277_vm1, %v8370_v17 }
  0xb2   : > { %7221 = vmatmul.mubr.msk.f32.gmra.mrb[28].mxu0 %vm277_vm1, %v8481_v50  ;;  %v8615_v50 = vld [vmem:[#allocation2 + $0x4a] sm:$0xff] }
  0xb3   : > { %7223 = vmatprep.mubr.msk.f32.mxu0 %vm277_vm1, %v8578_v1  ;;  %v8606_v1 = vld [vmem:[%s10573_s1 + $0x1c] sm:$0xf]  ;;  %10623 = vst [vmem:[#allocation19_spill] sm:$0xff] %v8615_v50 }
  0xb4   : > { %7068 = vmatmul.mubr.msk.f32.gmra.mrb[26].mxu1 %vm277_vm1, %v8382_v19 }
  0xb5   : > { %7070 = vmatprep.mubr.msk.f32.mxu1 %vm277_vm1, %v8386_v21 }
  0xb6   : > { %7224 = vmatmul.mubr.msk.f32.gmra.mrb[30].mxu0 %vm277_vm1, %v8588_v28  ;;  %v8613_v28 = vld [vmem:[#allocation2 + $0x3a] sm:$0xff] }
  0xb7   : > { %7228 = vmatprep.mubr.msk.f32.mxu0 %vm277_vm1, %v2284_v29  ;;  %10622 = vst [vmem:[#allocation18_spill] sm:$0xff] %v8613_v28 }
  0xb8   : > { %7071 = vmatmul.mubr.msk.f32.gmra.mrb[28].mxu1 %vm277_vm1, %v8398_v23 }
  0xb9   : > { %7073 = vmatprep.mubr.msk.f32.mxu1 %vm277_vm1, %v8402_v25 }
  0xba   : > { %7229 = vmatmul.mubr.msk.f32.vlgmr.msra.gmra.mrb[0].mxu0 %vm277_vm1, %v2285_v42 }
  0xbb   : > { %7277 = vmatpush3.msk.msra.mxu0 %vm561_vm0, %v8459_v46  ;;  %7231 = vmatprep.mubr.msk.f32.mxu0 %vm277_vm1, %v8597_v31  ;;  %v1114_v46 = vld [vmem:[#allocation2 + $0x2] sm:$0xff] }
  0xbc   : > { %7326 = vmatprep.subr.msk.mxu0 %vm561_vm0, %v8606_v1  ;;  %7074 = vmatmul.mubr.msk.f32.gmra.mrb[30].mxu1 %vm277_vm1, %v8414_v27 }
  0xbd   : > { %7078 = vmatprep.mubr.msk.f32.mxu1 %vm277_vm1, %v1114_v46  ;;  %v8648_v46 = vld [vmem:[#allocation2 + $0x82] sm:$0xff] }
  0xbe   : > { %7232 = vmatmul.mubr.msk.f32.gmra.mrb[2].mxu0 %vm277_vm1, %v8613_v28  ;;  %10628 = vst [vmem:[#allocation24_spill] sm:$0xff] %v8648_v46 }
  0xbf   : > { %7234 = vmatprep.mubr.msk.f32.mxu0 %vm277_vm1, %v8615_v50 }
  0xc0   : > { %7079 = vmatmul.mubr.msk.f32.vlgmr.msra.gmra.mrb[0].mxu1 %vm277_vm1, %v1115_v44  ;;  %v8659_v44 = vld [vmem:[#allocation2 + $0x9a] sm:$0xff] }
  0xc1   : > { %7081 = vmatprep.mubr.msk.f32.mxu1 %vm277_vm1, %v2284_v29  ;;  %10630 = vst [vmem:[#allocation26_spill] sm:$0xff] %v8659_v44  ;;  %v8661_v29 = vld [vmem:[#allocation2 + $0xaa] sm:$0xff] }
  0xc2   : > { %7235 = vmatmul.mubr.msk.f32.gmra.mrb[4].mxu0 %vm277_vm1, %v8627_v61  ;;  %10631 = vst [vmem:[#allocation27_spill] sm:$0xff] %v8661_v29 }
  0xc3   : > { %7237 = vmatprep.mubr.msk.f32.mxu0 %vm277_vm1, %v8629_v48 }
  0xc4   : > { %7082 = vmatmul.mubr.msk.f32.gmra.mrb[2].mxu1 %vm277_vm1, %v2285_v42  ;;  %v8671_v42 = vld [vmem:[#allocation2 + $0xb2] sm:$0xff] }
  0xc5   : > { %7084 = vmatprep.mubr.msk.f32.mxu1 %vm277_vm1, %v8597_v31  ;;  %10632 = vst [vmem:[#allocation28_spill] sm:$0xff] %v8671_v42  ;;  %v8673_v31 = vld [vmem:[#allocation2 + $0xc2] sm:$0xff] }
  0xc6   : > { %7238 = vmatmul.mubr.msk.f32.gmra.mrb[6].mxu0 %vm277_vm1, %v8638_v43  ;;  %10633 = vst [vmem:[#allocation29_spill] sm:$0xff] %v8673_v31 }
  0xc7   : > { %7240 = vmatprep.mubr.msk.f32.mxu0 %vm277_vm1, %v8640_v41 }
  0xc8   : > { %7085 = vmatmul.mubr.msk.f32.gmra.mrb[4].mxu1 %vm277_vm1, %v8613_v28  ;;  %v8685_v28 = vld [vmem:[#allocation2 + $0xda] sm:$0xff] }
  0xc9   : > { %7087 = vmatprep.mubr.msk.f32.mxu1 %vm277_vm1, %v8615_v50  ;;  %v8683_v50 = vld [vmem:[#allocation2 + $0xca] sm:$0xff]  ;;  %10635 = vst [vmem:[#allocation31_spill] sm:$0xff] %v8685_v28 }
  0xca   : > { %7241 = vmatmul.mubr.msk.f32.gmra.mrb[8].mxu0 %vm277_vm1, %v8648_v46  ;;  %10634 = vst [vmem:[#allocation30_spill] sm:$0xff] %v8683_v50 }
  0xcb   : > { %7243 = vmatprep.mubr.msk.f32.mxu0 %vm277_vm1, %v8650_v40 }
  0xcc   : > { %7088 = vmatmul.mubr.msk.f32.gmra.mrb[6].mxu1 %vm277_vm1, %v8627_v61  ;;  %v8697_v61 = vld [vmem:[#allocation2 + $0xf2] sm:$0xff] }
  0xcd   : > { %7090 = vmatprep.mubr.msk.f32.mxu1 %vm277_vm1, %v8629_v48  ;;  %v8695_v48 = vld [vmem:[#allocation2 + $0xe2] sm:$0xff]  ;;  %10637 = vst [vmem:[#allocation33_spill] sm:$0xff] %v8697_v61 }
  0xce   : > { %7244 = vmatmul.mubr.msk.f32.gmra.mrb[10].mxu0 %vm277_vm1, %v8659_v44  ;;  %10636 = vst [vmem:[#allocation32_spill] sm:$0xff] %v8695_v48 }
  0xcf   : > { %7246 = vmatprep.mubr.msk.f32.mxu0 %vm277_vm1, %v8661_v29 }
  0xd0   : > { %7091 = vmatmul.mubr.msk.f32.gmra.mrb[8].mxu1 %vm277_vm1, %v8638_v43  ;;  %v8709_v43 = vld [vmem:[#allocation2 + $0x10a] sm:$0xff] }
  0xd1   : > { %7093 = vmatprep.mubr.msk.f32.mxu1 %vm277_vm1, %v8640_v41  ;;  %v8707_v41 = vld [vmem:[#allocation2 + $0xfa] sm:$0xff]  ;;  %10638 = vst [vmem:[#allocation34_spill] sm:$0xff] %v8709_v43 }
  0xd2   : > { %7247 = vmatmul.mubr.msk.f32.gmra.mrb[12].mxu0 %vm277_vm1, %v8671_v42 }
  0xd3   : > { %7249 = vmatprep.mubr.msk.f32.mxu0 %vm277_vm1, %v8673_v31 }
  0xd4   : > { %7094 = vmatmul.mubr.msk.f32.gmra.mrb[10].mxu1 %vm277_vm1, %v8648_v46  ;;  %v8721_v46 = vld [vmem:[#allocation2 + $0x122] sm:$0xff] }
  0xd5   : > { %7096 = vmatprep.mubr.msk.f32.mxu1 %vm277_vm1, %v8650_v40  ;;  %v8719_v40 = vld [vmem:[#allocation2 + $0x112] sm:$0xff] }
  0xd6   : > { %7250 = vmatmul.mubr.msk.f32.gmra.mrb[14].mxu0 %vm277_vm1, %v8683_v50 }
  0xd7   : > { %7252 = vmatprep.mubr.msk.f32.mxu0 %vm277_vm1, %v8685_v28 }
  0xd8   : > { %7097 = vmatmul.mubr.msk.f32.gmra.mrb[12].mxu1 %vm277_vm1, %v8659_v44  ;;  %v8733_v44 = vld [vmem:[#allocation2 + $0x13a] sm:$0xff] }
  0xd9   : > { %7099 = vmatprep.mubr.msk.f32.mxu1 %vm277_vm1, %v8661_v29  ;;  %v8731_v29 = vld [vmem:[#allocation2 + $0x12a] sm:$0xff] }
  0xda   : > { %7253 = vmatmul.mubr.msk.f32.gmra.mrb[16].mxu0 %vm277_vm1, %v8695_v48 }
  0xdb   : > { %7255 = vmatprep.mubr.msk.f32.mxu0 %vm277_vm1, %v8697_v61 }
  0xdc   : > { %7100 = vmatmul.mubr.msk.f32.gmra.mrb[14].mxu1 %vm277_vm1, %v8671_v42  ;;  %v8745_v42 = vld [vmem:[#allocation2 + $0x152] sm:$0xff] }
  0xdd   : > { %7102 = vmatprep.mubr.msk.f32.mxu1 %vm277_vm1, %v8673_v31  ;;  %v8743_v31 = vld [vmem:[#allocation2 + $0x142] sm:$0xff] }
  0xde   : > { %7256 = vmatmul.mubr.msk.f32.gmra.mrb[18].mxu0 %vm277_vm1, %v8707_v41 }
  0xdf   : > { %7258 = vmatprep.mubr.msk.f32.mxu0 %vm277_vm1, %v8709_v43 }
  0xe0   : > { %7103 = vmatmul.mubr.msk.f32.gmra.mrb[16].mxu1 %vm277_vm1, %v8683_v50  ;;  %v8757_v50 = vld [vmem:[#allocation2 + $0x16a] sm:$0xff] }
  0xe1   : > { %7105 = vmatprep.mubr.msk.f32.mxu1 %vm277_vm1, %v8685_v28  ;;  %v8755_v28 = vld [vmem:[#allocation2 + $0x15a] sm:$0xff] }
  0xe2   : > { %7259 = vmatmul.mubr.msk.f32.gmra.mrb[20].mxu0 %vm277_vm1, %v8719_v40 }
  0xe3   : > { %7261 = vmatprep.mubr.msk.f32.mxu0 %vm277_vm1, %v8721_v46 }
  0xe4   : > { %7106 = vmatmul.mubr.msk.f32.gmra.mrb[18].mxu1 %vm277_vm1, %v8695_v48  ;;  %v8769_v48 = vld [vmem:[#allocation2 + $0x182] sm:$0xff] }
  0xe5   : > { %7108 = vmatprep.mubr.msk.f32.mxu1 %vm277_vm1, %v8697_v61  ;;  %v8767_v61 = vld [vmem:[#allocation2 + $0x172] sm:$0xff]  ;;  %10639 = vst [vmem:[#allocation35_spill] sm:$0xff] %v8769_v48 }
  0xe6   : > { %7262 = vmatmul.mubr.msk.f32.gmra.mrb[22].mxu0 %vm277_vm1, %v8731_v29 }
  0xe7   : > { %7264 = vmatprep.mubr.msk.f32.mxu0 %vm277_vm1, %v8733_v44 }
  0xe8   : > { %7109 = vmatmul.mubr.msk.f32.gmra.mrb[20].mxu1 %vm277_vm1, %v8707_v41 }
  0xe9   : > { %7111 = vmatprep.mubr.msk.f32.mxu1 %vm277_vm1, %v8709_v43  ;;  %v8779_v43 = vld [vmem:[#allocation2 + $0x18a] sm:$0xff] }
  0xea   : > { %7265 = vmatmul.mubr.msk.f32.gmra.mrb[24].mxu0 %vm277_vm1, %v8743_v31 }
  0xeb   : > { %7267 = vmatprep.mubr.msk.f32.mxu0 %vm277_vm1, %v8745_v42 }
  0xec   : > { %7112 = vmatmul.mubr.msk.f32.gmra.mrb[22].mxu1 %vm277_vm1, %v8719_v40 }
  0xed   : > { %7114 = vmatprep.mubr.msk.f32.mxu1 %vm277_vm1, %v8721_v46 }
  0xee   : > { %7268 = vmatmul.mubr.msk.f32.gmra.mrb[26].mxu0 %vm277_vm1, %v8755_v28 }
  0xef   : > { %7270 = vmatprep.mubr.msk.f32.mxu0 %vm277_vm1, %v8757_v50 }
  0xf0   : > { %7115 = vmatmul.mubr.msk.f32.gmra.mrb[24].mxu1 %vm277_vm1, %v8731_v29 }
  0xf1   : > { %7117 = vmatprep.mubr.msk.f32.mxu1 %vm277_vm1, %v8733_v44 }
  0xf2   : > { %7271 = vmatmul.mubr.msk.f32.gmra.mrb[28].mxu0 %vm277_vm1, %v8767_v61 }
  0xf3   : > { %7273 = vmatprep.mubr.msk.f32.mxu0 %vm277_vm1, %v8769_v48  ;;  %v6566_v48 = vld [vmem:[%s10573_s1 + $0x20] sm:$0xf] }
  0xf4   : > { %7118 = vmatmul.mubr.msk.f32.gmra.mrb[26].mxu1 %vm277_vm1, %v8743_v31 }
  0xf5   : > { %7120 = vmatprep.mubr.msk.f32.mxu1 %vm277_vm1, %v8745_v42 }
  0xf6   : > { %7274 = vmatmul.mubr.msk.f32.gmra.mrb[30].mxu0 %vm277_vm1, %v8779_v43 }
  0xf7   : > { %7278 = vmatprep.mubr.msk.f32.mxu0 %vm277_vm1, %v8183_v30  ;;  %v2705_v30 = vld [vmem:[#allocation2 + $0x198] sm:$0xff] }
  0xf8   : > { %7121 = vmatmul.mubr.msk.f32.gmra.mrb[28].mxu1 %vm277_vm1, %v8755_v28 }
  0xf9   : > { %7123 = vmatprep.mubr.msk.f32.mxu1 %vm277_vm1, %v8757_v50 }
  0xfa   : > { %7279 = vmatmul.mubr.msk.f32.vlgmr.msra.gmra.mrb[0].mxu0 %vm277_vm1, %v8201_v32  ;;  %v2706_v32 = vld [vmem:[#allocation2 + $0x1a0] sm:$0xff] }
  0xfb   : > { %7327 = vmatpush3.msk.msra.mxu0 %vm561_vm0, %v8606_v1  ;;  %7281 = vmatprep.mubr.msk.f32.mxu0 %vm277_vm1, %v8203_v33  ;;  %v10640_v33 = vld [vmem:[#allocation8_spill] sm:$0xff] }
  0xfc   : > { %7376 = vmatprep.subr.msk.mxu0 %vm561_vm0, %v6566_v48  ;;  %7124 = vmatmul.mubr.msk.f32.gmra.mrb[30].mxu1 %vm277_vm1, %v8767_v61 }
  0xfe   : > { %7282 = vmatmul.mubr.msk.f32.gmra.mrb[2].mxu0 %vm277_vm1, %v8211_v34  ;;  %v10641_v34 = vld [vmem:[#allocation9_spill] sm:$0xff] }
  0xff   : > { %7284 = vmatprep.mubr.msk.f32.mxu0 %vm277_vm1, %v8213_v35  ;;  %v10642_v35 = vld [vmem:[#allocation10_spill] sm:$0xff] }
 0x102   : > { %7285 = vmatmul.mubr.msk.f32.gmra.mrb[4].mxu0 %vm277_vm1, %v8233_v45  ;;  %v10643_v45 = vld [vmem:[#allocation11_spill] sm:$0xff] }
 0x103   : > { %7287 = vmatprep.mubr.msk.f32.mxu0 %vm277_vm1, %v8238_v47  ;;  %v10644_v47 = vld [vmem:[#allocation12_spill] sm:$0xff] }
 0x106   : > { %7288 = vmatmul.mubr.msk.f32.gmra.mrb[6].mxu0 %vm277_vm1, %v8249_v49  ;;  %v10645_v49 = vld [vmem:[#allocation13_spill] sm:$0xff] }
 0x107   : > { %7290 = vmatprep.mubr.msk.f32.mxu0 %vm277_vm1, %v8253_v51  ;;  %v10646_v51 = vld [vmem:[#allocation14_spill] sm:$0xff] }
 0x10a   : > { %7291 = vmatmul.mubr.msk.f32.gmra.mrb[8].mxu0 %vm277_vm1, %v8265_v53  ;;  %v3095_v53 = vld [vmem:[#allocation2 + $0x199] sm:$0xff] }
 0x10b   : > { %7293 = vmatprep.mubr.msk.f32.mxu0 %vm277_vm1, %v8269_v55  ;;  %v3096_v55 = vld [vmem:[#allocation2 + $0x1a1] sm:$0xff] }
 0x10e   : > { %7294 = vmatmul.mubr.msk.f32.gmra.mrb[10].mxu0 %vm277_vm1, %v8281_v57  ;;  %v10650_v57 = vld [vmem:[#allocation18_spill] sm:$0xff] }
 0x10f   : > { %7296 = vmatprep.mubr.msk.f32.mxu0 %vm277_vm1, %v8285_v59  ;;  %v10652_v59 = vld [vmem:[#allocation20_spill] sm:$0xff] }
 0x112   : > { %7297 = vmatmul.mubr.msk.f32.gmra.mrb[12].mxu0 %vm277_vm1, %v8302_v62  ;;  %v10654_v62 = vld [vmem:[#allocation22_spill] sm:$0xff] }
 0x113   : > { %7299 = vmatprep.mubr.msk.f32.mxu0 %vm277_vm1, %v8306_v0  ;;  %v10656_v0 = vld [vmem:[#allocation24_spill] sm:$0xff] }
 0x116   : > { %7300 = vmatmul.mubr.msk.f32.gmra.mrb[14].mxu0 %vm277_vm1, %v8318_v3  ;;  %v10658_v3 = vld [vmem:[#allocation26_spill] sm:$0xff] }
 0x117   : > { %7302 = vmatprep.mubr.msk.f32.mxu0 %vm277_vm1, %v8322_v5  ;;  %v10660_v5 = vld [vmem:[#allocation28_spill] sm:$0xff] }
 0x11a   : > { %7303 = vmatmul.mubr.msk.f32.gmra.mrb[16].mxu0 %vm277_vm1, %v8334_v7  ;;  %v10662_v7 = vld [vmem:[#allocation30_spill] sm:$0xff] }
 0x11b   : > { %7305 = vmatprep.mubr.msk.f32.mxu0 %vm277_vm1, %v8338_v9  ;;  %v10664_v9 = vld [vmem:[#allocation32_spill] sm:$0xff] }
 0x11e   : > { %7306 = vmatmul.mubr.msk.f32.gmra.mrb[18].mxu0 %vm277_vm1, %v8350_v11 }
 0x11f   : > { %7308 = vmatprep.mubr.msk.f32.mxu0 %vm277_vm1, %v8354_v13  ;;  %v10666_v13 = vld [vmem:[#allocation34_spill] sm:$0xff] }
 0x122   : > { %7309 = vmatmul.mubr.msk.f32.gmra.mrb[20].mxu0 %vm277_vm1, %v8366_v15 }
 0x123   : > { %7311 = vmatprep.mubr.msk.f32.mxu0 %vm277_vm1, %v8370_v17 }
 0x126   : > { %7312 = vmatmul.mubr.msk.f32.gmra.mrb[22].mxu0 %vm277_vm1, %v8382_v19 }
 0x127   : > { %7314 = vmatprep.mubr.msk.f32.mxu0 %vm277_vm1, %v8386_v21 }
 0x12a   : > { %7315 = vmatmul.mubr.msk.f32.gmra.mrb[24].mxu0 %vm277_vm1, %v8398_v23 }
 0x12b   : > { %7317 = vmatprep.mubr.msk.f32.mxu0 %vm277_vm1, %v8402_v25 }
 0x12e   : > { %7318 = vmatmul.mubr.msk.f32.gmra.mrb[26].mxu0 %vm277_vm1, %v8414_v27 }
 0x12f   : > { %7320 = vmatprep.mubr.msk.f32.mxu0 %vm277_vm1, %v8418_v37 }
 0x132   : > { %7321 = vmatmul.mubr.msk.f32.gmra.mrb[28].mxu0 %vm277_vm1, %v8430_v39 }
 0x133   : > { %7323 = vmatprep.mubr.msk.f32.mxu0 %vm277_vm1, %v2705_v30 }
 0x136   : > { %7324 = vmatmul.mubr.msk.f32.gmra.mrb[30].mxu0 %vm277_vm1, %v2706_v32 }
 0x137   : > { %7328 = vmatprep.mubr.msk.f32.mxu0 %vm277_vm1, %v8257_v52  ;;  %v10647_v52 = vld [vmem:[#allocation15_spill] sm:$0xff] }
 0x13a   : > { %7329 = vmatmul.mubr.msk.f32.vlgmr.msra.gmra.mrb[0].mxu0 %vm277_vm1, %v8267_v54  ;;  %v10648_v54 = vld [vmem:[#allocation16_spill] sm:$0xff] }
 0x13b   : > { %7377 = vmatpush3.msk.msra.mxu0 %vm561_vm0, %v6566_v48  ;;  %7331 = vmatprep.mubr.msk.f32.mxu0 %vm277_vm1, %v8273_v56  ;;  %v10649_v56 = vld [vmem:[#allocation17_spill] sm:$0xff] }
 0x13e   : > { %7332 = vmatmul.mubr.msk.f32.gmra.mrb[2].mxu0 %vm277_vm1, %v8283_v58  ;;  %v10651_v58 = vld [vmem:[#allocation19_spill] sm:$0xff] }
 0x13f   : > { %7334 = vmatprep.mubr.msk.f32.mxu0 %vm277_vm1, %v8289_v60  ;;  %v10653_v60 = vld [vmem:[#allocation21_spill] sm:$0xff] }
 0x142   : > { %7335 = vmatmul.mubr.msk.f32.gmra.mrb[4].mxu0 %vm277_vm1, %v8304_v63  ;;  %v10655_v63 = vld [vmem:[#allocation23_spill] sm:$0xff] }
 0x143   : > { %7337 = vmatprep.mubr.msk.f32.mxu0 %vm277_vm1, %v8310_v2  ;;  %v10657_v2 = vld [vmem:[#allocation25_spill] sm:$0xff] }
 0x146   : > { %7338 = vmatmul.mubr.msk.f32.gmra.mrb[6].mxu0 %vm277_vm1, %v8320_v4  ;;  %v10659_v4 = vld [vmem:[#allocation27_spill] sm:$0xff] }
 0x147   : > { %7340 = vmatprep.mubr.msk.f32.mxu0 %vm277_vm1, %v8326_v6  ;;  %v10661_v6 = vld [vmem:[#allocation29_spill] sm:$0xff] }
 0x14a   : > { %7341 = vmatmul.mubr.msk.f32.gmra.mrb[8].mxu0 %vm277_vm1, %v8336_v8  ;;  %v10663_v8 = vld [vmem:[#allocation31_spill] sm:$0xff] }
 0x14b   : > { %7343 = vmatprep.mubr.msk.f32.mxu0 %vm277_vm1, %v8342_v10  ;;  %v10665_v10 = vld [vmem:[#allocation33_spill] sm:$0xff] }
 0x14e   : > { %7344 = vmatmul.mubr.msk.f32.gmra.mrb[10].mxu0 %vm277_vm1, %v8352_v12 }
 0x14f   : > { %7346 = vmatprep.mubr.msk.f32.mxu0 %vm277_vm1, %v8358_v14 }
 0x152   : > { %7347 = vmatmul.mubr.msk.f32.gmra.mrb[12].mxu0 %vm277_vm1, %v8368_v16 }
 0x153   : > { %7349 = vmatprep.mubr.msk.f32.mxu0 %vm277_vm1, %v8374_v18 }
 0x156   : > { %7350 = vmatmul.mubr.msk.f32.gmra.mrb[14].mxu0 %vm277_vm1, %v8384_v20 }
 0x157   : > { %7352 = vmatprep.mubr.msk.f32.mxu0 %vm277_vm1, %v8390_v22 }
 0x15a   : > { %7353 = vmatmul.mubr.msk.f32.gmra.mrb[16].mxu0 %vm277_vm1, %v8400_v24  ;;  %v10667_v24 = vld [vmem:[#allocation35_spill] sm:$0xff] }
 0x15b   : > { %7355 = vmatprep.mubr.msk.f32.mxu0 %vm277_vm1, %v8406_v26  ;;  %v3485_v26 = vld [vmem:[#allocation2 + $0x19a] sm:$0xff] }
 0x15e   : > { %7356 = vmatmul.mubr.msk.f32.gmra.mrb[18].mxu0 %vm277_vm1, %v8416_v36  ;;  %v3486_v36 = vld [vmem:[#allocation2 + $0x1a2] sm:$0xff] }
 0x15f   : > { %7358 = vmatprep.mubr.msk.f32.mxu0 %vm277_vm1, %v8422_v38 }
 0x162   : > { %7359 = vmatmul.mubr.msk.f32.gmra.mrb[20].mxu0 %vm277_vm1, %v10640_v33 }
 0x163   : > { %7361 = vmatprep.mubr.msk.f32.mxu0 %vm277_vm1, %v10641_v34 }
 0x166   : > { %7362 = vmatmul.mubr.msk.f32.gmra.mrb[22].mxu0 %vm277_vm1, %v10642_v35 }
 0x167   : > { %7364 = vmatprep.mubr.msk.f32.mxu0 %vm277_vm1, %v10643_v45 }
 0x16a   : > { %7365 = vmatmul.mubr.msk.f32.gmra.mrb[24].mxu0 %vm277_vm1, %v10644_v47 }
 0x16b   : > { %7367 = vmatprep.mubr.msk.f32.mxu0 %vm277_vm1, %v10645_v49 }
 0x16e   : > { %7368 = vmatmul.mubr.msk.f32.gmra.mrb[26].mxu0 %vm277_vm1, %v10646_v51 }
 0x16f   : > { %7370 = vmatprep.mubr.msk.f32.mxu0 %vm277_vm1, %v10647_v52  ;;  %v5488_v52 = vld [vmem:[%s10576_s4] sm:$0xff] }
 0x172   : > { %7371 = vmatmul.mubr.msk.f32.gmra.mrb[28].mxu0 %vm277_vm1, %v10648_v54  ;;  %v7908_v54 = vmov 0.0|0.0  }
 0x173   : > { %7373 = vmatprep.mubr.msk.f32.mxu0 %vm277_vm1, %v3095_v53  ;;  %v5489_v53 = vld [vmem:[%s10576_s4 + $0x8] sm:$0xff]  ;;  %7482 = vmatprep.subr.bf16.mxu1 %v7908_v54 }
 0x176   : > { %7374 = vmatmul.mubr.msk.f32.gmra.mrb[30].mxu0 %vm277_vm1, %v3096_v55  ;;  %v7483_v55 = vpack.c.bf16 %v5489_v53, %v5488_v52 }
 0x177   : > { %7378 = vmatprep.mubr.msk.f32.mxu0 %vm277_vm1, %v10649_v56  ;;  %v5490_v56 = vld [vmem:[%s10576_s4 + $0x10] sm:$0xff] }
 0x178   : > { %7484 = vmatpush1.bf16.msra.mxu1 %v7483_v55 }
 0x179   : > { %7485 = vmatprep.subr.bf16.mxu1 %v7908_v54 }
 0x17a   : > { %7379 = vmatmul.mubr.msk.f32.vlgmr.msra.gmra.mrb[0].mxu0 %vm277_vm1, %v10650_v57  ;;  %v5491_v57 = vld [vmem:[%s10576_s4 + $0x18] sm:$0xff] }
 0x17b   : > { %7381 = vmatprep.mubr.msk.f32.mxu0 %vm277_vm1, %v10651_v58  ;;  %v7486_v58 = vpack.c.bf16 %v5491_v57, %v5490_v56  ;;  %v5500_v57 = vld [vmem:[%s10576_s4 + $0x60] sm:$0xff] }
 0x17d   : > { %7487 = vmatpush1.bf16.msra.mxu1 %v7486_v58 }
 0x17e   : > { %7382 = vmatmul.mubr.msk.f32.gmra.mrb[2].mxu0 %vm277_vm1, %v10652_v59  ;;  %7488 = vmatprep.subr.bf16.mxu1 %v7908_v54 }
 0x17f   : > { %7384 = vmatprep.mubr.msk.f32.mxu0 %vm277_vm1, %v10653_v60  ;;  %v5492_v60 = vld [vmem:[%s10576_s4 + $0x20] sm:$0xff] }
 0x182   : > { %7385 = vmatmul.mubr.msk.f32.gmra.mrb[4].mxu0 %vm277_vm1, %v10654_v62  ;;  %v5493_v62 = vld [vmem:[%s10576_s4 + $0x28] sm:$0xff] }
 0x183   : > { %7387 = vmatprep.mubr.msk.f32.mxu0 %vm277_vm1, %v10655_v63  ;;  %v7489_v63 = vpack.c.bf16 %v5493_v62, %v5492_v60 }
 0x185   : > { %7490 = vmatpush1.bf16.msra.mxu1 %v7489_v63 }
 0x186   : > { %7388 = vmatmul.mubr.msk.f32.gmra.mrb[6].mxu0 %vm277_vm1, %v10656_v0  ;;  %7491 = vmatprep.subr.bf16.mxu1 %v7908_v54 }
 0x187   : > { %7390 = vmatprep.mubr.msk.f32.mxu0 %vm277_vm1, %v10657_v2 }
 0x18a   : > { %7391 = vmatmul.mubr.msk.f32.gmra.mrb[8].mxu0 %vm277_vm1, %v10658_v3 }
 0x18b   : > { %7393 = vmatprep.mubr.msk.f32.mxu0 %vm277_vm1, %v10659_v4  ;;  %v5494_v4 = vld [vmem:[%s10576_s4 + $0x30] sm:$0xff] }
 0x18e   : > { %7394 = vmatmul.mubr.msk.f32.gmra.mrb[10].mxu0 %vm277_vm1, %v10660_v5  ;;  %v5495_v5 = vld [vmem:[%s10576_s4 + $0x38] sm:$0xff] }
 0x18f   : > { %7396 = vmatprep.mubr.msk.f32.mxu0 %vm277_vm1, %v10661_v6  ;;  %v7492_v6 = vpack.c.bf16 %v5495_v5, %v5494_v4 }
 0x191   : > { %7493 = vmatpush1.bf16.msra.mxu1 %v7492_v6  ;;  %v5503_v6 = vld [vmem:[%s10576_s4 + $0x78] sm:$0xff] }
 0x192   : > { %7397 = vmatmul.mubr.msk.f32.gmra.mrb[12].mxu0 %vm277_vm1, %v10662_v7  ;;  %7494 = vmatprep.subr.bf16.mxu1 %v7908_v54 }
 0x193   : > { %7399 = vmatprep.mubr.msk.f32.mxu0 %vm277_vm1, %v10663_v8  ;;  %v8962_v11 = vpop.f32.mrb[0].mxu1  ;;  %v5496_v8 = vld [vmem:[%s10576_s4 + $0x40] sm:$0xff] }
 0x194   : > { %v8964_v12 = vpop.f32.mrb[1].mxu1 }
 0x196   : > { %7400 = vmatmul.mubr.msk.f32.gmra.mrb[14].mxu0 %vm277_vm1, %v10664_v9  ;;  %v5497_v9 = vld [vmem:[%s10576_s4 + $0x48] sm:$0xff] }
 0x197   : > { %7402 = vmatprep.mubr.msk.f32.mxu0 %vm277_vm1, %v10665_v10  ;;  %v8970_v14 = vpop.f32.mrb[2].mxu1  ;;  %v7495_v10 = vpack.c.bf16 %v5497_v9, %v5496_v8 }
 0x198   : > { %v8972_v15 = vpop.f32.mrb[3].mxu1 }
 0x199   : > { %7496 = vmatpush1.bf16.msra.mxu1 %v7495_v10 }
 0x19a   : > { %7403 = vmatmul.mubr.msk.f32.gmra.mrb[16].mxu0 %vm277_vm1, %v8707_v41  ;;  %7497 = vmatprep.subr.bf16.mxu1 %v7908_v54 }
 0x19b   : > { %7405 = vmatprep.mubr.msk.f32.mxu0 %vm277_vm1, %v10666_v13  ;;  %v8978_v16 = vpop.f32.mrb[4].mxu1 }
 0x19c   : > { %v8980_v17 = vpop.f32.mrb[5].mxu1 }
 0x19e   : > { %7406 = vmatmul.mubr.msk.f32.gmra.mrb[18].mxu0 %vm277_vm1, %v8719_v40 }
 0x19f   : > { %7408 = vmatprep.mubr.msk.f32.mxu0 %vm277_vm1, %v8721_v46  ;;  %v8986_v18 = vpop.f32.mrb[6].mxu1  ;;  %v10668_v46 = vmov 0.0  }
 0x1a0   : > { %v8988_v19 = vpop.f32.mrb[7].mxu1  ;;  %3961 = vst.msk [vmem:[#allocation3 + $0x20] sm:$0xff] %vm3955_vm3, %v10668_v46  ;;  %3956 = vst.msk [vmem:[#allocation3] sm:$0xff] %vm3955_vm3, %v10668_v46 }
 0x1a1   : > { %3957 = vst.msk [vmem:[#allocation3 + $0x8] sm:$0xff] %vm3955_vm3, %v10668_v46  ;;  %3960 = vst.msk [vmem:[#allocation3 + $0x18] sm:$0xff] %vm3955_vm3, %v10668_v46 }
 0x1a2   : > { %7409 = vmatmul.mubr.msk.f32.gmra.mrb[20].mxu0 %vm277_vm1, %v8731_v29  ;;  %3963 = vst.msk [vmem:[#allocation3 + $0x30] sm:$0xff] %vm3955_vm3, %v10668_v46  ;;  %3964 = vst.msk [vmem:[#allocation3 + $0x38] sm:$0xff] %vm3955_vm3, %v10668_v46 }
 0x1a3   : > { %7411 = vmatprep.mubr.msk.f32.mxu0 %vm277_vm1, %v8733_v44  ;;  %v8994_v20 = vpop.f32.mrb[8].mxu1  ;;  %3966 = vst.msk [vmem:[#allocation3 + $0x48] sm:$0xff] %vm3955_vm3, %v10668_v46  ;;  %3967 = vst.msk [vmem:[#allocation3 + $0x50] sm:$0xff] %vm3955_vm3, %v10668_v46 }
 0x1a4   : > { %v8996_v21 = vpop.f32.mrb[9].mxu1  ;;  %3969 = vst.msk [vmem:[#allocation3 + $0x60] sm:$0xff] %vm3955_vm3, %v10668_v46  ;;  %3970 = vst.msk [vmem:[#allocation3 + $0x68] sm:$0xff] %vm3955_vm3, %v10668_v46 }
 0x1a5   : > { %3972 = vst.msk [vmem:[#allocation3 + $0x78] sm:$0xff] %vm3955_vm3, %v10668_v46  ;;  %3973 = vst.msk [vmem:[#allocation3 + $0x80] sm:$0xff] %vm3955_vm3, %v10668_v46 }
 0x1a6   : > { %7412 = vmatmul.mubr.msk.f32.gmra.mrb[22].mxu0 %vm277_vm1, %v8743_v31  ;;  %3975 = vst.msk [vmem:[#allocation3 + $0x90] sm:$0xff] %vm3955_vm3, %v10668_v46  ;;  %3976 = vst.msk [vmem:[#allocation3 + $0x98] sm:$0xff] %vm3955_vm3, %v10668_v46 }
 0x1a7   : > { %7414 = vmatprep.mubr.msk.f32.mxu0 %vm277_vm1, %v8745_v42  ;;  %v9002_v22 = vpop.f32.mrb[10].mxu1  ;;  %3978 = vst.msk [vmem:[#allocation3 + $0xa8] sm:$0xff] %vm3955_vm3, %v10668_v46  ;;  %3979 = vst.msk [vmem:[#allocation3 + $0xb0] sm:$0xff] %vm3955_vm3, %v10668_v46  ;;  %v4044_v59 = vld [vmem:[#allocation3] sm:$0xff] }
 0x1a8   : > { %v9004_v23 = vpop.f32.mrb[11].mxu1  ;;  %3981 = vst.msk [vmem:[#allocation3 + $0xc0] sm:$0xff] %vm3955_vm3, %v10668_v46  ;;  %3982 = vst.msk [vmem:[#allocation3 + $0xc8] sm:$0xff] %vm3955_vm3, %v10668_v46  ;;  %v4301_v32 = vld [vmem:[#allocation3 + $0x2] sm:$0xff] }
 0x1a9   : > { %3984 = vst.msk [vmem:[#allocation3 + $0xd8] sm:$0xff] %vm3955_vm3, %v10668_v46  ;;  %3985 = vst.msk [vmem:[#allocation3 + $0xe0] sm:$0xff] %vm3955_vm3, %v10668_v46  ;;  %v4108_v33 = vld [vmem:[#allocation3 + $0x1] sm:$0xff]  ;;  %4365 = vrot.lane.b32.xlu1 %v4301_v32, %s7905_s22 }
 0x1aa   : > { %7415 = vmatmul.mubr.msk.f32.gmra.mrb[24].mxu0 %vm277_vm1, %v8755_v28  ;;  %3987 = vst.msk [vmem:[#allocation3 + $0xf0] sm:$0xff] %vm3955_vm3, %v10668_v46  ;;  %3988 = vst.msk [vmem:[#allocation3 + $0xf8] sm:$0xff] %vm3955_vm3, %v10668_v46  ;;  %4172 = vrot.lane.b32.xlu0 %v4108_v33, %s7906_s23  ;;  %v4045_v3 = vld [vmem:[#allocation3 + $0x8] sm:$0xff]  ;;  %v5498_v32 = vld [vmem:[%s10576_s4 + $0x50] sm:$0xff] }
 0x1ab   : > { %7417 = vmatprep.mubr.msk.f32.mxu0 %vm277_vm1, %v8757_v50  ;;  %v9010_v25 = vpop.f32.mrb[12].mxu1  ;;  %3990 = vst.msk [vmem:[#allocation3 + $0x108] sm:$0xff] %vm3955_vm3, %v10668_v46  ;;  %3991 = vst.msk [vmem:[#allocation3 + $0x110] sm:$0xff] %vm3955_vm3, %v10668_v46  ;;  %v5499_v33 = vld [vmem:[%s10576_s4 + $0x58] sm:$0xff] }
 0x1ac   : > { %v9012_v27 = vpop.f32.mrb[13].mxu1  ;;  %3993 = vst.msk [vmem:[#allocation3 + $0x120] sm:$0xff] %vm3955_vm3, %v10668_v46  ;;  %3994 = vst.msk [vmem:[#allocation3 + $0x128] sm:$0xff] %vm3955_vm3, %v10668_v46 }
 0x1ad   : > { %3996 = vst.msk [vmem:[#allocation3 + $0x138] sm:$0xff] %vm3955_vm3, %v10668_v46  ;;  %3997 = vst.msk [vmem:[#allocation3 + $0x140] sm:$0xff] %vm3955_vm3, %v10668_v46 }
 0x1ae   : > { %7418 = vmatmul.mubr.msk.f32.gmra.mrb[26].mxu0 %vm277_vm1, %v8767_v61  ;;  %3999 = vst.msk [vmem:[#allocation3 + $0x150] sm:$0xff] %vm3955_vm3, %v10668_v46  ;;  %4000 = vst.msk [vmem:[#allocation3 + $0x158] sm:$0xff] %vm3955_vm3, %v10668_v46 }
 0x1af   : > { %7420 = vmatprep.mubr.msk.f32.mxu0 %vm277_vm1, %v10667_v24  ;;  %v9017_v37 = vpop.f32.mrb[14].mxu1  ;;  %4002 = vst.msk [vmem:[#allocation3 + $0x168] sm:$0xff] %vm3955_vm3, %v10668_v46  ;;  %4003 = vst.msk [vmem:[#allocation3 + $0x170] sm:$0xff] %vm3955_vm3, %v10668_v46 }
 0x1b0   : > { %v9019_v38 = vpop.f32.mrb[15].mxu1  ;;  %4005 = vst.msk [vmem:[#allocation3 + $0x180] sm:$0xff] %vm3955_vm3, %v10668_v46  ;;  %4006 = vst.msk [vmem:[#allocation3 + $0x188] sm:$0xff] %vm3955_vm3, %v10668_v46 }
 0x1b1   : > { %4008 = vst.msk [vmem:[#allocation3 + $0x198] sm:$0xff] %vm3955_vm3, %v10668_v46  ;;  %4009 = vst.msk [vmem:[#allocation3 + $0x1a0] sm:$0xff] %vm3955_vm3, %v10668_v46 }
 0x1b2   : > { %7421 = vmatmul.mubr.msk.f32.gmra.mrb[28].mxu0 %vm277_vm1, %v8779_v43  ;;  %3962 = vst.msk [vmem:[#allocation3 + $0x28] sm:$0x3] %vm3958_vm4, %v10668_v46  ;;  %3959 = vst.msk [vmem:[#allocation3 + $0x10] sm:$0x3] %vm3958_vm4, %v10668_v46 }
 0x1b3   : > { %7423 = vmatprep.mubr.msk.f32.mxu0 %vm277_vm1, %v3485_v26  ;;  %v9022_v39 = vpop.f32.mrb[16].mxu1  ;;  %3965 = vst.msk [vmem:[#allocation3 + $0x40] sm:$0x3] %vm3958_vm4, %v10668_v46  ;;  %3968 = vst.msk [vmem:[#allocation3 + $0x58] sm:$0x3] %vm3958_vm4, %v10668_v46 }
 0x1b4   : > { %v9024_v40 = vpop.f32.mrb[17].mxu1  ;;  %3971 = vst.msk [vmem:[#allocation3 + $0x70] sm:$0x3] %vm3958_vm4, %v10668_v46  ;;  %3974 = vst.msk [vmem:[#allocation3 + $0x88] sm:$0x3] %vm3958_vm4, %v10668_v46 }
 0x1b5   : > { %3977 = vst.msk [vmem:[#allocation3 + $0xa0] sm:$0x3] %vm3958_vm4, %v10668_v46  ;;  %3980 = vst.msk [vmem:[#allocation3 + $0xb8] sm:$0x3] %vm3958_vm4, %v10668_v46  ;;  %v9211_v26 = vld [vmem:[%s10574_s2] ss:$0 sm:$0xff] }
 0x1b6   : > { %7424 = vmatmul.mubr.msk.f32.gmra.mrb[30].mxu0 %vm277_vm1, %v3486_v36  ;;  %3983 = vst.msk [vmem:[#allocation3 + $0xd0] sm:$0x3] %vm3958_vm4, %v10668_v46  ;;  %3986 = vst.msk [vmem:[#allocation3 + $0xe8] sm:$0x3] %vm3958_vm4, %v10668_v46 }
 0x1b7   : > { %v9026_v41 = vpop.f32.mrb[18].mxu1  ;;  %3989 = vst.msk [vmem:[#allocation3 + $0x100] sm:$0x3] %vm3958_vm4, %v10668_v46  ;;  %3992 = vst.msk [vmem:[#allocation3 + $0x118] sm:$0x3] %vm3958_vm4, %v10668_v46 }
 0x1b8   : > { %v9028_v48 = vpop.f32.mrb[19].mxu1  ;;  %3995 = vst.msk [vmem:[#allocation3 + $0x130] sm:$0x3] %vm3958_vm4, %v10668_v46  ;;  %3998 = vst.msk [vmem:[#allocation3 + $0x148] sm:$0x3] %vm3958_vm4, %v10668_v46  ;;  %v4974_v47 = vld [vmem:[#allocation3 + $0x198] sm:$0xff] }
 0x1b9   : > { %4001 = vst.msk [vmem:[#allocation3 + $0x160] sm:$0x3] %vm3958_vm4, %v10668_v46  ;;  %4004 = vst.msk [vmem:[#allocation3 + $0x178] sm:$0x3] %vm3958_vm4, %v10668_v46  ;;  %v4109_v45 = vld [vmem:[#allocation3 + $0x9] sm:$0xff]  ;;  %5068 = vrot.lane.b32.xlu0 %v4974_v47, %s7905_s22  ;;  %v5166_v51 = vld [vmem:[#allocation3 + $0x199] sm:$0xff] }
 0x1ba   : > { %4007 = vst.msk [vmem:[#allocation3 + $0x190] sm:$0x3] %vm3958_vm4, %v10668_v46  ;;  %4010 = vst.msk [vmem:[#allocation3 + $0x1a8] sm:$0x3] %vm3958_vm4, %v10668_v46  ;;  %4174 = vrot.lane.b32.xlu1 %v4109_v45, %s7906_s23  ;;  %v4302_v49 = vld [vmem:[#allocation3 + $0xa] sm:$0xff] }
 0x1bb   : > { %v9030_v61 = vpop.f32.mrb[20].mxu1  ;;  %4076 = vst.msk [vmem:[#allocation4] sm:$0xff] %vm3955_vm3, %v4044_v59  ;;  %4077 = vst.msk [vmem:[#allocation4 + $0x18] sm:$0xff] %vm3955_vm3, %v4045_v3  ;;  %v9225_v45 = vld [vmem:[%s10575_s3] ss:$0 sm:$0xff] }
 0x1bc   : > { %v9032_v43 = vpop.f32.mrb[21].mxu1 }
 0x1bd   : > { %5260 = vrot.lane.b32.xlu0 %v5166_v51, %s7907_s29 }
 0x1be   : > { %4367 = vrot.lane.b32.xlu1 %v4302_v49, %s7905_s22  ;;  %v7498_v49 = vpack.c.bf16 %v5499_v33, %v5498_v32 }
 0x1bf   : > { %v9034_v50 = vpop.f32.mrb[22].mxu1 }
 0x1c0   : > { %v9036_v1 = vpop.f32.mrb[23].mxu1  ;;  %7499 = vmatpush1.bf16.msra.mxu1 %v7498_v49 }
 0x1c1   : > { %7500 = vmatprep.subr.bf16.mxu1 %v7908_v54 }
 0x1c3   : > { %v9038_v28 = vpop.f32.mrb[24].mxu1 }
 0x1c4   : > { %v9040_v31 = vpop.f32.mrb[25].mxu1 }
 0x1c7   : > { %v9114_v44 = vpop.f32.mrb[26].mxu1 }
 0x1c8   : > { %v9116_v29 = vpop.f32.mrb[27].mxu1 }
 0x1cb   : > { %v9154_v42 = vpop.f32.mrb[28].mxu1 }
 0x1cc   : > { %v9156_v30 = vpop.f32.mrb[29].mxu1 }
 0x1cf   : > { %v9160_v34 = vpop.f32.mrb[30].mxu1 }
 0x1d0   : > { %v9162_v35 = vpop.f32.mrb[31].mxu1 }
 0x21b   : > { %v4366_v0 = vpop.permute.xlu1 %4365 }
 0x21c   : > { %v4173_v2 = vpop.permute.xlu0 %4172 }
 0x21d   : > { %4269 = vst.msk [vmem:[#allocation4] sm:$0xff] %vm4268_vm5, %v4173_v2 }
 0x21e   : > { %4462 = vst.msk [vmem:[#allocation4] sm:$0xff] %vm4461_vm6, %v4366_v0 }
 0x22c   : > { %v4175_v7 = vpop.permute.xlu1 %4174 }
 0x22d   : > { %4270 = vst.msk [vmem:[#allocation4 + $0x18] sm:$0xff] %vm4268_vm5, %v4175_v7 }
 0x230   : > { %v4368_v13 = vpop.permute.xlu1 %4367 }
 0x231   : > { %4463 = vst.msk [vmem:[#allocation4 + $0x18] sm:$0xff] %vm4461_vm6, %v4368_v13 }
 0x24d   : > { %v7380_v24 = vpop.f32.mrb[0].mxu0 }
 0x24e   : > { %v7538_v36 = vadd.f32 %v7380_v24, %v8962_v11  ;;  %v3654_v46 = vpop.f32.mrb[1].mxu0 }
 0x24f   : > { %v7539_v47 = vadd.f32 %v3654_v46, %v8964_v12  ;;  %v5501_v12 = vld [vmem:[%s10576_s4 + $0x68] sm:$0xff] }
 0x250   : > { %v3853_v11 = vmul.f32 %v7538_v36, %v9211_v26  ;;  %v7501_v60 = vpack.c.bf16 %v5501_v12, %v5500_v57 }
 0x251   : > { %v3852_v51 = vmul.f32 %v7539_v47, %v9211_v26  ;;  %v7383_v52 = vpop.f32.mrb[2].mxu0  ;;  %v5505_v47 = vld [vmem:[%s10576_s4 + $0x88] sm:$0xff] }
 0x252   : > { %v3892_v53 = vadd.f32 %v9225_v45, %v3853_v11  ;;  %v7540_v55 = vadd.f32 %v7383_v52, %v8970_v14  ;;  %v3664_v56 = vpop.f32.mrb[3].mxu0  ;;  %7502 = vmatpush1.bf16.msra.mxu1 %v7501_v60 }
 0x253   : > { %v3891_v58 = vadd.f32 %v9225_v45, %v3852_v51  ;;  %v7541_v59 = vadd.f32 %v3664_v56, %v8972_v15  ;;  %7503 = vmatprep.subr.bf16.mxu1 %v7908_v54  ;;  %v5502_v15 = vld [vmem:[%s10576_s4 + $0x70] sm:$0xff] }
 0x254   : > { %v3924_v62 = vmax.f32 %v3892_v53, 0.0  ;;  %v3855_v63 = vmul.f32 %v7540_v55, %v9211_v26  ;;  %v7504_v9 = vpack.c.bf16 %v5503_v6, %v5502_v15 }
 0x255   : > { %v3923_v14 = vmax.f32 %v3891_v58, 0.0  ;;  %v3854_v0 = vmul.f32 %v7541_v59, %v9211_v26  ;;  %v7386_v2 = vpop.f32.mrb[4].mxu0 }
 0x256   : > { %4013 = vst.msk [vmem:[#allocation3 + $0x21] sm:$0xff] %vm3955_vm3, %v3924_v62  ;;  %v3894_v3 = vadd.f32 %v9225_v45, %v3855_v63  ;;  %v7542_v4 = vadd.f32 %v7386_v2, %v8978_v16  ;;  %v3674_v5 = vpop.f32.mrb[5].mxu0  ;;  %7505 = vmatpush1.bf16.msra.mxu1 %v7504_v9  ;;  %v5507_v2 = vld [vmem:[%s10576_s4 + $0x98] sm:$0xff] }
 0x257   : > { %4012 = vst.msk [vmem:[#allocation3 + $0x19] sm:$0xff] %vm3955_vm3, %v3923_v14  ;;  %v3893_v7 = vadd.f32 %v9225_v45, %v3854_v0  ;;  %v7543_v8 = vadd.f32 %v3674_v5, %v8980_v17  ;;  %7506 = vmatprep.subr.bf16.mxu1 %v7908_v54  ;;  %v5504_v17 = vld [vmem:[%s10576_s4 + $0x80] sm:$0xff] }
 0x258   : > { %v3926_v10 = vmax.f32 %v3894_v3, 0.0  ;;  %v3857_v16 = vmul.f32 %v7542_v4, %v9211_v26  ;;  %v7507_v51 = vpack.c.bf16 %v5505_v47, %v5504_v17  ;;  %v5509_v17 = vld [vmem:[%s10576_s4 + $0xa8] sm:$0xff] }
 0x259   : > { %v3925_v13 = vmax.f32 %v3893_v7, 0.0  ;;  %v3856_v24 = vmul.f32 %v7543_v8, %v9211_v26  ;;  %v7389_v36 = vpop.f32.mrb[6].mxu0 }
 0x25a   : > { %4015 = vst.msk [vmem:[#allocation3 + $0x39] sm:$0xff] %vm3955_vm3, %v3926_v10  ;;  %v3896_v46 = vadd.f32 %v9225_v45, %v3857_v16  ;;  %v7544_v32 = vadd.f32 %v7389_v36, %v8986_v18  ;;  %v3684_v33 = vpop.f32.mrb[7].mxu0  ;;  %7508 = vmatpush1.bf16.msra.mxu1 %v7507_v51 }
 0x25b   : > { %4014 = vst.msk [vmem:[#allocation3 + $0x31] sm:$0xff] %vm3955_vm3, %v3925_v13  ;;  %v3895_v49 = vadd.f32 %v9225_v45, %v3856_v24  ;;  %v7545_v11 = vadd.f32 %v3684_v33, %v8988_v19  ;;  %7509 = vmatprep.subr.bf16.mxu1 %v7908_v54  ;;  %v5508_v33 = vld [vmem:[%s10576_s4 + $0xa0] sm:$0xff] }
 0x25c   : > { %v3928_v52 = vmax.f32 %v3896_v46, 0.0  ;;  %v3859_v18 = vmul.f32 %v7544_v32, %v9211_v26 }
 0x25d   : > { %v3927_v53 = vmax.f32 %v3895_v49, 0.0  ;;  %v3858_v55 = vmul.f32 %v7545_v11, %v9211_v26  ;;  %v7392_v56 = vpop.f32.mrb[8].mxu0  ;;  %v4752_v57 = vld [vmem:[#allocation3 + $0x22] sm:$0xff]  ;;  %v7513_v49 = vpack.c.bf16 %v5509_v17, %v5508_v33  ;;  %v5513_v17 = vld [vmem:[%s10576_s4 + $0xc8] sm:$0xff] }
 0x25e   : > { %v4111_v12 = vld [vmem:[#allocation3 + $0x21] sm:$0xff]  ;;  %4017 = vst.msk [vmem:[#allocation3 + $0x51] sm:$0xff] %vm3955_vm3, %v3928_v52  ;;  %v3898_v58 = vadd.f32 %v9225_v45, %v3859_v18  ;;  %v7546_v59 = vadd.f32 %v7392_v56, %v8994_v20  ;;  %v3694_v60 = vpop.f32.mrb[9].mxu0  ;;  %4817 = vrot.lane.b32.xlu0 %v4752_v57, %s7906_s23  ;;  %v4494_v19 = vld [vmem:[#allocation3 + $0x18] sm:$0xff] }
 0x25f   : > { %4178 = vrot.lane.b32.xlu1 %v4111_v12, %s7906_s23  ;;  %v9278_v62 = vld [vmem:[#allocation3 + $0x20] sm:$0xff]  ;;  %4720 = vst.msk [vmem:[#allocation4 + $0x20] sm:$0xff] %vm3955_vm3, %v4111_v12  ;;  %4016 = vst.msk [vmem:[#allocation3 + $0x49] sm:$0xff] %vm3955_vm3, %v3927_v53  ;;  %v3897_v63 = vadd.f32 %v9225_v45, %v3858_v55  ;;  %v7547_v14 = vadd.f32 %v3694_v60, %v8996_v21 }
 0x260   : > { %v9284_v0 = vld [vmem:[#allocation3 + $0x19] sm:$0xff]  ;;  %4079 = vst.msk [vmem:[#allocation4 + $0x48] sm:$0xff] %vm3955_vm3, %v9278_v62  ;;  %4078 = vst.msk [vmem:[#allocation4 + $0x30] sm:$0xff] %vm3955_vm3, %v4494_v19  ;;  %v3930_v3 = vmax.f32 %v3898_v58, 0.0  ;;  %v3861_v21 = vmul.f32 %v7546_v59, %v9211_v26 }
 0x261   : > { %v5506_v20 = vld [vmem:[%s10576_s4 + $0x90] sm:$0xff]  ;;  %4719 = vst.msk [vmem:[#allocation4 + $0x8] sm:$0xff] %vm3955_vm3, %v9284_v0  ;;  %v3929_v5 = vmax.f32 %v3897_v63, 0.0  ;;  %v3860_v15 = vmul.f32 %v7547_v14, %v9211_v26  ;;  %v7395_v6 = vpop.f32.mrb[10].mxu0  ;;  %v5511_v14 = vld [vmem:[%s10576_s4 + $0xb8] sm:$0xff] }
 0x262   : > { %v7510_v4 = vpack.c.bf16 %v5507_v2, %v5506_v20  ;;  %v9300_v7 = vld [vmem:[#allocation3 + $0x1a] sm:$0xff]  ;;  %4019 = vst.msk [vmem:[#allocation3 + $0x69] sm:$0xff] %vm3955_vm3, %v3930_v3  ;;  %v3900_v10 = vadd.f32 %v9225_v45, %v3861_v21  ;;  %v7548_v16 = vadd.f32 %v7395_v6, %v9002_v22  ;;  %v3704_v13 = vpop.f32.mrb[11].mxu0  ;;  %v9310_v24 = vld [vmem:[#allocation3 + $0x31] sm:$0xff] }
 0x263   : > { %v9302_v8 = vld [vmem:[#allocation3 + $0x39] sm:$0xff]  ;;  %4371 = vrot.lane.b32.xlu1 %v4752_v57, %s7905_s22  ;;  %4815 = vrot.lane.b32.xlu0 %v9300_v7, %s7906_s23  ;;  %4018 = vst.msk [vmem:[#allocation3 + $0x61] sm:$0xff] %vm3955_vm3, %v3929_v5  ;;  %v3899_v46 = vadd.f32 %v9225_v45, %v3860_v15  ;;  %v7549_v22 = vadd.f32 %v3704_v13, %v9004_v23  ;;  %v9320_v32 = vld [vmem:[#allocation3 + $0x30] sm:$0xff]  ;;  %4721 = vst.msk [vmem:[#allocation4 + $0x38] sm:$0xff] %vm3955_vm3, %v9310_v24 }
 0x264   : > { %v5329_v9 = vld [vmem:[#allocation3 + $0x3a] sm:$0xff]  ;;  %4722 = vst.msk [vmem:[#allocation4 + $0x50] sm:$0xff] %vm3955_vm3, %v9302_v8  ;;  %7511 = vmatpush1.bf16.msra.mxu1 %v7510_v4  ;;  %v3932_v47 = vmax.f32 %v3900_v10, 0.0  ;;  %v3863_v23 = vmul.f32 %v7548_v16, %v9211_v26  ;;  %4080 = vst.msk [vmem:[#allocation4 + $0x60] sm:$0xff] %vm3955_vm3, %v9320_v32  ;;  %v5328_v11 = vld [vmem:[#allocation3 + $0x32] sm:$0xff] }
 0x265   : > { %v9312_v36 = vld [vmem:[#allocation3 + $0x38] sm:$0xff]  ;;  %5361 = vst.msk [vmem:[#allocation4 + $0x28] sm:$0xff] %vm3955_vm3, %v5329_v9  ;;  %7512 = vmatprep.subr.bf16.mxu1 %v7908_v54  ;;  %v3931_v51 = vmax.f32 %v3899_v46, 0.0  ;;  %v3862_v52 = vmul.f32 %v7549_v22, %v9211_v26  ;;  %v7398_v18 = vpop.f32.mrb[12].mxu0  ;;  %5360 = vst.msk [vmem:[#allocation4 + $0x10] sm:$0xff] %vm3955_vm3, %v5328_v11  ;;  %v5510_v63 = vld [vmem:[%s10576_s4 + $0xb0] sm:$0xff] }
 0x266   : > { %4081 = vst.msk [vmem:[#allocation4 + $0x78] sm:$0xff] %vm3955_vm3, %v9312_v36  ;;  %v9337_v53 = vld [vmem:[#allocation3 + $0x51] sm:$0xff]  ;;  %4021 = vst.msk [vmem:[#allocation3 + $0x81] sm:$0xff] %vm3955_vm3, %v3932_v47  ;;  %v3902_v56 = vadd.f32 %v9225_v45, %v3863_v23  ;;  %v7550_v57 = vadd.f32 %v7398_v18, %v9010_v25  ;;  %v3714_v12 = vpop.f32.mrb[13].mxu0  ;;  %v9346_v58 = vld [vmem:[#allocation3 + $0x48] sm:$0xff]  ;;  %v7516_v2 = vpack.c.bf16 %v5511_v14, %v5510_v63 }
 0x267   : > { %v5331_v55 = vld [vmem:[#allocation3 + $0x52] sm:$0xff]  ;;  %4558 = vrot.lane.b32.xlu1 %v4494_v19, %s7907_s29  ;;  %5202 = vrot.lane.b32.xlu0 %v9302_v8, %s7907_s29  ;;  %v9348_v59 = vld [vmem:[#allocation3 + $0x49] sm:$0xff]  ;;  %4724 = vst.msk [vmem:[#allocation4 + $0x80] sm:$0xff] %vm3955_vm3, %v9337_v53  ;;  %4020 = vst.msk [vmem:[#allocation3 + $0x79] sm:$0xff] %vm3955_vm3, %v3931_v51  ;;  %v3901_v25 = vadd.f32 %v9225_v45, %v3862_v52  ;;  %v7551_v19 = vadd.f32 %v3714_v12, %v9012_v27 }
 0x268   : > { %v9350_v60 = vld [vmem:[#allocation3 + $0x50] sm:$0xff]  ;;  %5363 = vst.msk [vmem:[#allocation4 + $0x58] sm:$0xff] %vm3955_vm3, %v5331_v55  ;;  %7514 = vmatpush1.bf16.msra.mxu1 %v7513_v49  ;;  %4723 = vst.msk [vmem:[#allocation4 + $0x68] sm:$0xff] %vm3955_vm3, %v9348_v59  ;;  %v3934_v20 = vmax.f32 %v3902_v56, 0.0  ;;  %v3865_v27 = vmul.f32 %v7550_v57, %v9211_v26  ;;  %v9373_v15 = vld [vmem:[#allocation3 + $0x3a] sm:$0xff] }
 0x269   : > { %4083 = vst.msk [vmem:[#allocation4 + $0xa8] sm:$0xff] %vm3955_vm3, %v9350_v60  ;;  %4082 = vst.msk [vmem:[#allocation4 + $0x90] sm:$0xff] %vm3955_vm3, %v9346_v58  ;;  %7515 = vmatprep.subr.bf16.mxu1 %v7908_v54  ;;  %v5330_v3 = vld [vmem:[#allocation3 + $0x4a] sm:$0xff]  ;;  %v3933_v21 = vmax.f32 %v3901_v25, 0.0  ;;  %v3864_v4 = vmul.f32 %v7551_v19, %v9211_v26  ;;  %v7401_v5 = vpop.f32.mrb[14].mxu0 }
 0x26a   : > { %v9375_v6 = vld [vmem:[#allocation3 + $0x69] sm:$0xff]  ;;  %5362 = vst.msk [vmem:[#allocation4 + $0x40] sm:$0xff] %vm3955_vm3, %v5330_v3  ;;  %4023 = vst.msk [vmem:[#allocation3 + $0x99] sm:$0xff] %vm3955_vm3, %v3934_v20  ;;  %v3904_v9 = vadd.f32 %v9225_v45, %v3865_v27  ;;  %v7552_v10 = vadd.f32 %v7401_v5, %v9017_v37  ;;  %v3724_v16 = vpop.f32.mrb[15].mxu0  ;;  %v9385_v13 = vld [vmem:[#allocation3 + $0x60] sm:$0xff] }
 0x26b   : > { %4560 = vrot.lane.b32.xlu1 %v9278_v62, %s7907_s29  ;;  %4821 = vrot.lane.b32.xlu0 %v9373_v15, %s7906_s23  ;;  %v9387_v46 = vld [vmem:[#allocation3 + $0x61] sm:$0xff]  ;;  %4726 = vst.msk [vmem:[#allocation4 + $0xb0] sm:$0xff] %vm3955_vm3, %v9375_v6  ;;  %4022 = vst.msk [vmem:[#allocation3 + $0x91] sm:$0xff] %vm3955_vm3, %v3933_v21  ;;  %v3903_v37 = vadd.f32 %v9225_v45, %v3864_v4  ;;  %v7553_v33 = vadd.f32 %v3724_v16, %v9019_v38  ;;  %v5512_v62 = vld [vmem:[%s10576_s4 + $0xc0] sm:$0xff] }
 0x26c   : > { %v9389_v22 = vld [vmem:[#allocation3 + $0x68] sm:$0xff]  ;;  %7517 = vmatpush1.bf16.msra.mxu1 %v7516_v2  ;;  %4725 = vst.msk [vmem:[#allocation4 + $0x98] sm:$0xff] %vm3955_vm3, %v9387_v46  ;;  %4084 = vst.msk [vmem:[#allocation4 + $0xc0] sm:$0xff] %vm3955_vm3, %v9385_v13  ;;  %v3936_v47 = vmax.f32 %v3904_v9, 0.0  ;;  %v3867_v38 = vmul.f32 %v7552_v10, %v9211_v26  ;;  %v7519_v23 = vpack.c.bf16 %v5513_v17, %v5512_v62 }
 0x26d   : > { %4085 = vst.msk [vmem:[#allocation4 + $0xd8] sm:$0xff] %vm3955_vm3, %v9389_v22  ;;  %7518 = vmatprep.subr.bf16.mxu1 %v7908_v54  ;;  %v5332_v49 = vld [vmem:[#allocation3 + $0x62] sm:$0xff]  ;;  %v5333_v11 = vld [vmem:[#allocation3 + $0x6a] sm:$0xff]  ;;  %v3935_v51 = vmax.f32 %v3903_v37, 0.0  ;;  %v3866_v52 = vmul.f32 %v7553_v33, %v9211_v26  ;;  %v7404_v18 = vpop.f32.mrb[16].mxu0 }
 0x26e   : > { %v9411_v55 = vld [vmem:[#allocation3 + $0x81] sm:$0xff]  ;;  %5364 = vst.msk [vmem:[#allocation4 + $0x70] sm:$0xff] %vm3955_vm3, %v5332_v49  ;;  %5365 = vst.msk [vmem:[#allocation4 + $0x88] sm:$0xff] %vm3955_vm3, %v5333_v11  ;;  %v3906_v56 = vadd.f32 %v9225_v45, %v3867_v38  ;;  %v7554_v57 = vadd.f32 %v7404_v18, %v9022_v39  ;;  %v3734_v12 = vpop.f32.mrb[17].mxu0  ;;  %v9422_v25 = vld [vmem:[#allocation3 + $0x78] sm:$0xff] }
 0x26f   : > { %4025 = vst.msk [vmem:[#allocation3 + $0xb1] sm:$0xff] %vm3955_vm3, %v3936_v47  ;;  %4176 = vrot.lane.b32.xlu1 %v9284_v0, %s7906_s23  ;;  %5200 = vrot.lane.b32.xlu0 %v9310_v24, %s7907_s29  ;;  %v9424_v19 = vld [vmem:[#allocation3 + $0x79] sm:$0xff]  ;;  %4728 = vst.msk [vmem:[#allocation4 + $0xe0] sm:$0xff] %vm3955_vm3, %v9411_v55  ;;  %v3905_v39 = vadd.f32 %v9225_v45, %v3866_v52  ;;  %v7555_v14 = vadd.f32 %v3734_v12, %v9024_v40  ;;  %v5515_v20 = vld [vmem:[%s10576_s4 + $0xd8] sm:$0xff] }
 0x270   : > { %v9426_v63 = vld [vmem:[#allocation3 + $0x80] sm:$0xff]  ;;  %4024 = vst.msk [vmem:[#allocation3 + $0xa9] sm:$0xff] %vm3955_vm3, %v3935_v51  ;;  %7520 = vmatpush1.bf16.msra.mxu1 %v7519_v23  ;;  %4727 = vst.msk [vmem:[#allocation4 + $0xc8] sm:$0xff] %vm3955_vm3, %v9424_v19  ;;  %v3938_v27 = vmax.f32 %v3906_v56, 0.0  ;;  %v3869_v40 = vmul.f32 %v7554_v57, %v9211_v26  ;;  %v5516_v23 = vld [vmem:[%s10576_s4 + $0xe0] sm:$0xff] }
 0x271   : > { %v5514_v0 = vld [vmem:[%s10576_s4 + $0xd0] sm:$0xff]  ;;  %4087 = vst.msk [vmem:[#allocation4 + $0x108] sm:$0xff] %vm3955_vm3, %v9426_v63  ;;  %4086 = vst.msk [vmem:[#allocation4 + $0xf0] sm:$0xff] %vm3955_vm3, %v9422_v25  ;;  %7521 = vmatprep.subr.bf16.mxu1 %v7908_v54  ;;  %v3937_v4 = vmax.f32 %v3905_v39, 0.0  ;;  %v3868_v5 = vmul.f32 %v7555_v14, %v9211_v26  ;;  %v7407_v9 = vpop.f32.mrb[18].mxu0  ;;  %v5517_v49 = vld [vmem:[%s10576_s4 + $0xe8] sm:$0xff] }
 0x272   : > { %v7522_v2 = vpack.c.bf16 %v5515_v20, %v5514_v0  ;;  %v5334_v3 = vld [vmem:[#allocation3 + $0x7a] sm:$0xff]  ;;  %v5335_v21 = vld [vmem:[#allocation3 + $0x82] sm:$0xff]  ;;  %4027 = vst.msk [vmem:[#allocation3 + $0xc9] sm:$0xff] %vm3955_vm3, %v3938_v27  ;;  %v3908_v37 = vadd.f32 %v9225_v45, %v3869_v40  ;;  %v7556_v33 = vadd.f32 %v7407_v9, %v9026_v41  ;;  %v3744_v62 = vpop.f32.mrb[19].mxu0  ;;  %v9459_v17 = vld [vmem:[#allocation3 + $0x90] sm:$0xff]  ;;  %v7525_v51 = vpack.c.bf16 %v5517_v49, %v5516_v23 }
 0x273   : > { %v9448_v10 = vld [vmem:[#allocation3 + $0x99] sm:$0xff]  ;;  %5366 = vst.msk [vmem:[#allocation4 + $0xa0] sm:$0xff] %vm3955_vm3, %v5334_v3  ;;  %5367 = vst.msk [vmem:[#allocation4 + $0xb8] sm:$0xff] %vm3955_vm3, %v5335_v21  ;;  %4369 = vrot.lane.b32.xlu1 %v9300_v7, %s7905_s22  ;;  %5010 = vrot.lane.b32.xlu0 %v9312_v36, %s7905_s22  ;;  %v9461_v47 = vld [vmem:[#allocation3 + $0x91] sm:$0xff]  ;;  %v3907_v41 = vadd.f32 %v9225_v45, %v3868_v5  ;;  %v7557_v7 = vadd.f32 %v3744_v62, %v9028_v48 }
 0x274   : > { %v5337_v16 = vld [vmem:[#allocation3 + $0x9a] sm:$0xff]  ;;  %4730 = vst.msk [vmem:[#allocation4 + $0x110] sm:$0xff] %vm3955_vm3, %v9448_v10  ;;  %4026 = vst.msk [vmem:[#allocation3 + $0xc1] sm:$0xff] %vm3955_vm3, %v3937_v4  ;;  %7523 = vmatpush1.bf16.msra.mxu1 %v7522_v2  ;;  %v3940_v11 = vmax.f32 %v3908_v37, 0.0  ;;  %v3871_v48 = vmul.f32 %v7556_v33, %v9211_v26  ;;  %v5336_v52 = vld [vmem:[#allocation3 + $0x92] sm:$0xff] }
 0x275   : > { %v9463_v38 = vld [vmem:[#allocation3 + $0x98] sm:$0xff]  ;;  %5369 = vst.msk [vmem:[#allocation4 + $0xe8] sm:$0xff] %vm3955_vm3, %v5337_v16  ;;  %4729 = vst.msk [vmem:[#allocation4 + $0xf8] sm:$0xff] %vm3955_vm3, %v9461_v47  ;;  %7524 = vmatprep.subr.bf16.mxu1 %v7908_v54  ;;  %v3939_v18 = vmax.f32 %v3907_v41, 0.0  ;;  %v3870_v56 = vmul.f32 %v7557_v7, %v9211_v26  ;;  %v7410_v57 = vpop.f32.mrb[20].mxu0  ;;  %v5518_v21 = vld [vmem:[%s10576_s4 + $0xf0] sm:$0xff] }
 0x276   : > { %4089 = vst.msk [vmem:[#allocation4 + $0x138] sm:$0xff] %vm3955_vm3, %v9463_v38  ;;  %4088 = vst.msk [vmem:[#allocation4 + $0x120] sm:$0xff] %vm3955_vm3, %v9459_v17  ;;  %v9486_v12 = vld [vmem:[#allocation3 + $0x32] sm:$0xff]  ;;  %v3910_v0 = vadd.f32 %v9225_v45, %v3871_v48  ;;  %v7558_v20 = vadd.f32 %v7410_v57, %v9030_v61  ;;  %v3754_v27 = vpop.f32.mrb[21].mxu0  ;;  %v5519_v4 = vld [vmem:[%s10576_s4 + $0xf8] sm:$0xff] }
 0x277   : > { %v9488_v39 = vld [vmem:[#allocation3 + $0xb1] sm:$0xff]  ;;  %5368 = vst.msk [vmem:[#allocation4 + $0xd0] sm:$0xff] %vm3955_vm3, %v5336_v52  ;;  %4029 = vst.msk [vmem:[#allocation3 + $0xe1] sm:$0xff] %vm3955_vm3, %v3940_v11  ;;  %4182 = vrot.lane.b32.xlu1 %v9302_v8, %s7906_s23  ;;  %4819 = vrot.lane.b32.xlu0 %v9486_v12, %s7906_s23  ;;  %v9498_v40 = vld [vmem:[#allocation3 + $0xa8] sm:$0xff]  ;;  %v3909_v61 = vadd.f32 %v9225_v45, %v3870_v56  ;;  %v7559_v8 = vadd.f32 %v3754_v27, %v9032_v43 }
 0x278   : > { %v5339_v14 = vld [vmem:[#allocation3 + $0xb2] sm:$0xff]  ;;  %v9500_v2 = vld [vmem:[#allocation3 + $0xa9] sm:$0xff]  ;;  %4732 = vst.msk [vmem:[#allocation4 + $0x140] sm:$0xff] %vm3955_vm3, %v9488_v39  ;;  %4028 = vst.msk [vmem:[#allocation3 + $0xd9] sm:$0xff] %vm3955_vm3, %v3939_v18  ;;  %7526 = vmatpush1.bf16.msra.mxu1 %v7525_v51  ;;  %v3942_v5 = vmax.f32 %v3910_v0, 0.0  ;;  %v3873_v43 = vmul.f32 %v7558_v20, %v9211_v26  ;;  %v7528_v9 = vpack.c.bf16 %v5519_v4, %v5518_v21 }
 0x279   : > { %v9502_v3 = vld [vmem:[#allocation3 + $0xb0] sm:$0xff]  ;;  %5371 = vst.msk [vmem:[#allocation4 + $0x118] sm:$0xff] %vm3955_vm3, %v5339_v14  ;;  %4731 = vst.msk [vmem:[#allocation4 + $0x128] sm:$0xff] %vm3955_vm3, %v9500_v2  ;;  %7527 = vmatprep.subr.bf16.mxu1 %v7908_v54  ;;  %v3941_v37 = vmax.f32 %v3909_v61, 0.0  ;;  %v3872_v33 = vmul.f32 %v7559_v8, %v9211_v26  ;;  %v7413_v62 = vpop.f32.mrb[22].mxu0 }
 0x27a   : > { %4091 = vst.msk [vmem:[#allocation4 + $0x168] sm:$0xff] %vm3955_vm3, %v9502_v3  ;;  %4090 = vst.msk [vmem:[#allocation4 + $0x150] sm:$0xff] %vm3955_vm3, %v9498_v40  ;;  %v5338_v16 = vld [vmem:[#allocation3 + $0xaa] sm:$0xff]  ;;  %v3912_v7 = vadd.f32 %v9225_v45, %v3873_v43  ;;  %v7560_v23 = vadd.f32 %v7413_v62, %v9034_v50  ;;  %v3764_v49 = vpop.f32.mrb[23].mxu0  ;;  %v9556_v0 = vld [vmem:[#allocation3 + $0x52] sm:$0xff] }
 0x27b   : > { %v9525_v41 = vld [vmem:[#allocation3 + $0xc9] sm:$0xff]  ;;  %5370 = vst.msk [vmem:[#allocation4 + $0x100] sm:$0xff] %vm3955_vm3, %v5338_v16  ;;  %4031 = vst.msk [vmem:[#allocation3 + $0xf9] sm:$0xff] %vm3955_vm3, %v3942_v5  ;;  %4375 = vrot.lane.b32.xlu1 %v9373_v15, %s7905_s22  ;;  %5206 = vrot.lane.b32.xlu0 %v9337_v53, %s7907_s29  ;;  %v9535_v54 = vld [vmem:[#allocation3 + $0xc0] sm:$0xff]  ;;  %v3911_v50 = vadd.f32 %v9225_v45, %v3872_v33  ;;  %v7561_v51 = vadd.f32 %v3764_v49, %v9036_v1 }
 0x27c   : > { %v9537_v11 = vld [vmem:[#allocation3 + $0xc1] sm:$0xff]  ;;  %4734 = vst.msk [vmem:[#allocation4 + $0x170] sm:$0xff] %vm3955_vm3, %v9525_v41  ;;  %4030 = vst.msk [vmem:[#allocation3 + $0xf1] sm:$0xff] %vm3955_vm3, %v3941_v37  ;;  %7529 = vmatpush1.bf16.msra.mxu1 %v7528_v9  ;;  %v5341_v52 = vld [vmem:[#allocation3 + $0xca] sm:$0xff]  ;;  %v3944_v18 = vmax.f32 %v3912_v7, 0.0  ;;  %v3875_v56 = vmul.f32 %v7560_v23, %v9211_v26 }
 0x27d   : > { %v9539_v48 = vld [vmem:[#allocation3 + $0xc8] sm:$0xff]  ;;  %4733 = vst.msk [vmem:[#allocation4 + $0x158] sm:$0xff] %vm3955_vm3, %v9537_v11  ;;  %4092 = vst.msk [vmem:[#allocation4 + $0x180] sm:$0xff] %vm3955_vm3, %v9535_v54  ;;  %v3943_v1 = vmax.f32 %v3911_v50, 0.0  ;;  %v3874_v57 = vmul.f32 %v7561_v51, %v9211_v26  ;;  %v7416_v14 = vpop.f32.mrb[24].mxu0 }
 0x27e   : > { %4093 = vst.msk [vmem:[#allocation4 + $0x198] sm:$0xff] %vm3955_vm3, %v9539_v48  ;;  %v5340_v15 = vld [vmem:[#allocation3 + $0xc2] sm:$0xff]  ;;  %5373 = vst.msk [vmem:[#allocation4 + $0x148] sm:$0xff] %vm3955_vm3, %v5341_v52  ;;  %v3914_v27 = vadd.f32 %v9225_v45, %v3875_v56  ;;  %v7562_v61 = vadd.f32 %v7416_v14, %v9038_v28  ;;  %v3774_v8 = vpop.f32.mrb[25].mxu0 }
 0x27f   : > { %5372 = vst.msk [vmem:[#allocation4 + $0x130] sm:$0xff] %vm3955_vm3, %v5340_v15  ;;  %v9558_v20 = vld [vmem:[#allocation3 + $0xe1] sm:$0xff]  ;;  %4033 = vst.msk [vmem:[#allocation3 + $0x111] sm:$0xff] %vm3955_vm3, %v3944_v18  ;;  %5008 = vrot.lane.b32.xlu1 %v9320_v32, %s7905_s22  ;;  %4825 = vrot.lane.b32.xlu0 %v9556_v0, %s7906_s23  ;;  %v9567_v21 = vld [vmem:[#allocation3 + $0xd8] sm:$0xff]  ;;  %v3913_v28 = vadd.f32 %v9225_v45, %v3874_v57  ;;  %v7563_v43 = vadd.f32 %v3774_v8, %v9040_v31 }
 0x280   : > { %v9569_v4 = vld [vmem:[#allocation3 + $0xd9] sm:$0xff]  ;;  %4736 = vst.msk [vmem:[#allocation4 + $0x1a0] sm:$0xff] %vm3955_vm3, %v9558_v20  ;;  %4032 = vst.msk [vmem:[#allocation3 + $0x109] sm:$0xff] %vm3955_vm3, %v3943_v1  ;;  %v5343_v16 = vld [vmem:[#allocation3 + $0xe2] sm:$0xff]  ;;  %v3946_v37 = vmax.f32 %v3914_v27, 0.0  ;;  %v3877_v33 = vmul.f32 %v7562_v61, %v9211_v26 }
 0x281   : > { %v9571_v5 = vld [vmem:[#allocation3 + $0xe0] sm:$0xff]  ;;  %4735 = vst.msk [vmem:[#allocation4 + $0x188] sm:$0xff] %vm3955_vm3, %v9569_v4  ;;  %4094 = vst.msk [vmem:[#allocation4 + $0x1b0] sm:$0xff] %vm3955_vm3, %v9567_v21  ;;  %v3945_v62 = vmax.f32 %v3913_v28, 0.0  ;;  %v3876_v31 = vmul.f32 %v7563_v43, %v9211_v26  ;;  %v7419_v7 = vpop.f32.mrb[26].mxu0 }
 0x282   : > { %4095 = vst.msk [vmem:[#allocation4 + $0x1c8] sm:$0xff] %vm3955_vm3, %v9571_v5  ;;  %v5342_v9 = vld [vmem:[#allocation3 + $0xda] sm:$0xff]  ;;  %5375 = vst.msk [vmem:[#allocation4 + $0x178] sm:$0xff] %vm3955_vm3, %v5343_v16  ;;  %v3916_v50 = vadd.f32 %v9225_v45, %v3877_v33  ;;  %v7564_v51 = vadd.f32 %v7419_v7, %v9114_v44  ;;  %v3784_v15 = vpop.f32.mrb[27].mxu0 }
 0x283   : > { %5374 = vst.msk [vmem:[#allocation4 + $0x160] sm:$0xff] %vm3955_vm3, %v5342_v9  ;;  %v9588_v23 = vld [vmem:[#allocation3 + $0xf9] sm:$0xff]  ;;  %4035 = vst.msk [vmem:[#allocation3 + $0x129] sm:$0xff] %vm3955_vm3, %v3946_v37  ;;  %4562 = vrot.lane.b32.xlu1 %v9320_v32, %s7907_s29  ;;  %5012 = vrot.lane.b32.xlu0 %v9346_v58, %s7905_s22  ;;  %v9597_v52 = vld [vmem:[#allocation3 + $0xf0] sm:$0xff]  ;;  %v3915_v44 = vadd.f32 %v9225_v45, %v3876_v31  ;;  %v7565_v32 = vadd.f32 %v3784_v15, %v9116_v29 }
 0x284   : > { %v5345_v49 = vld [vmem:[#allocation3 + $0xfa] sm:$0xff]  ;;  %v9599_v18 = vld [vmem:[#allocation3 + $0xf1] sm:$0xff]  ;;  %4738 = vst.msk [vmem:[#allocation4 + $0x1d0] sm:$0xff] %vm3955_vm3, %v9588_v23  ;;  %4034 = vst.msk [vmem:[#allocation3 + $0x121] sm:$0xff] %vm3955_vm3, %v3945_v62  ;;  %v3948_v1 = vmax.f32 %v3916_v50, 0.0  ;;  %v3879_v57 = vmul.f32 %v7564_v51, %v9211_v26 }
 0x285   : > { %v9601_v56 = vld [vmem:[#allocation3 + $0xf8] sm:$0xff]  ;;  %5377 = vst.msk [vmem:[#allocation4 + $0x1a8] sm:$0xff] %vm3955_vm3, %v5345_v49  ;;  %4737 = vst.msk [vmem:[#allocation4 + $0x1b8] sm:$0xff] %vm3955_vm3, %v9599_v18  ;;  %v3947_v27 = vmax.f32 %v3915_v44, 0.0  ;;  %v3878_v61 = vmul.f32 %v7565_v32, %v9211_v26  ;;  %v7422_v8 = vpop.f32.mrb[28].mxu0 }
 0x286   : > { %4097 = vst.msk [vmem:[#allocation4 + $0x1f8] sm:$0xff] %vm3955_vm3, %v9601_v56  ;;  %4096 = vst.msk [vmem:[#allocation4 + $0x1e0] sm:$0xff] %vm3955_vm3, %v9597_v52  ;;  %v5344_v14 = vld [vmem:[#allocation3 + $0xf2] sm:$0xff]  ;;  %v3918_v43 = vadd.f32 %v9225_v45, %v3879_v57  ;;  %v7566_v9 = vadd.f32 %v7422_v8, %v9154_v42  ;;  %v3794_v16 = vpop.f32.mrb[29].mxu0 }
 0x287   : > { %v9617_v28 = vld [vmem:[#allocation3 + $0x111] sm:$0xff]  ;;  %5376 = vst.msk [vmem:[#allocation4 + $0x190] sm:$0xff] %vm3955_vm3, %v5344_v14  ;;  %4037 = vst.msk [vmem:[#allocation3 + $0x141] sm:$0xff] %vm3955_vm3, %v3948_v1  ;;  %4564 = vrot.lane.b32.xlu1 %v9312_v36, %s7907_s29  ;;  %5204 = vrot.lane.b32.xlu0 %v9348_v59, %s7907_s29  ;;  %v9627_v37 = vld [vmem:[#allocation3 + $0x108] sm:$0xff]  ;;  %v3917_v42 = vadd.f32 %v9225_v45, %v3878_v61  ;;  %v7567_v36 = vadd.f32 %v3794_v16, %v9156_v30 }
 0x288   : > { %v5347_v29 = vld [vmem:[#allocation3 + $0x112] sm:$0xff]  ;;  %v9629_v33 = vld [vmem:[#allocation3 + $0x109] sm:$0xff]  ;;  %4740 = vst.msk [vmem:[#allocation4 + $0x200] sm:$0xff] %vm3955_vm3, %v9617_v28  ;;  %4036 = vst.msk [vmem:[#allocation3 + $0x139] sm:$0xff] %vm3955_vm3, %v3947_v27  ;;  %v3950_v31 = vmax.f32 %v3918_v43, 0.0  ;;  %v3881_v7 = vmul.f32 %v7566_v9, %v9211_v26 }
 0x289   : > { %v9631_v62 = vld [vmem:[#allocation3 + $0x110] sm:$0xff]  ;;  %5379 = vst.msk [vmem:[#allocation4 + $0x1d8] sm:$0xff] %vm3955_vm3, %v5347_v29  ;;  %4739 = vst.msk [vmem:[#allocation4 + $0x1e8] sm:$0xff] %vm3955_vm3, %v9629_v33  ;;  %v3949_v50 = vmax.f32 %v3917_v42, 0.0  ;;  %v3880_v51 = vmul.f32 %v7567_v36, %v9211_v26  ;;  %v7425_v15 = vpop.f32.mrb[30].mxu0 }
 0x28a   : > { %4099 = vst.msk [vmem:[#allocation4 + $0x228] sm:$0xff] %vm3955_vm3, %v9631_v62  ;;  %4098 = vst.msk [vmem:[#allocation4 + $0x210] sm:$0xff] %vm3955_vm3, %v9627_v37  ;;  %v5346_v49 = vld [vmem:[#allocation3 + $0x10a] sm:$0xff]  ;;  %v3920_v30 = vadd.f32 %v9225_v45, %v3881_v7  ;;  %v7568_v32 = vadd.f32 %v7425_v15, %v9160_v34  ;;  %v3804_v1 = vpop.f32.mrb[31].mxu0 }
 0x28b   : > { %v9647_v44 = vld [vmem:[#allocation3 + $0x129] sm:$0xff]  ;;  %5378 = vst.msk [vmem:[#allocation4 + $0x1c0] sm:$0xff] %vm3955_vm3, %v5346_v49  ;;  %4039 = vst.msk [vmem:[#allocation3 + $0x159] sm:$0xff] %vm3955_vm3, %v3950_v31  ;;  %4180 = vrot.lane.b32.xlu1 %v9310_v24, %s7906_s23  ;;  %5014 = vrot.lane.b32.xlu0 %v9350_v60, %s7905_s22  ;;  %v9657_v57 = vld [vmem:[#allocation3 + $0x120] sm:$0xff]  ;;  %v3919_v34 = vadd.f32 %v9225_v45, %v3880_v51  ;;  %v7569_v61 = vadd.f32 %v3804_v1, %v9162_v35 }
 0x28c   : > { %v9659_v14 = vld [vmem:[#allocation3 + $0x121] sm:$0xff]  ;;  %4742 = vst.msk [vmem:[#allocation4 + $0x230] sm:$0xff] %vm3955_vm3, %v9647_v44  ;;  %4038 = vst.msk [vmem:[#allocation3 + $0x151] sm:$0xff] %vm3955_vm3, %v3949_v50  ;;  %v5349_v8 = vld [vmem:[#allocation3 + $0x12a] sm:$0xff]  ;;  %v3952_v29 = vmax.f32 %v3920_v30, 0.0  ;;  %v3883_v43 = vmul.f32 %v7568_v32, %v9211_v26 }
 0x28d   : > { %v9661_v27 = vld [vmem:[#allocation3 + $0x128] sm:$0xff]  ;;  %4741 = vst.msk [vmem:[#allocation4 + $0x218] sm:$0xff] %vm3955_vm3, %v9659_v14  ;;  %4100 = vst.msk [vmem:[#allocation4 + $0x240] sm:$0xff] %vm3955_vm3, %v9657_v57  ;;  %v3951_v9 = vmax.f32 %v3919_v34, 0.0  ;;  %v3882_v35 = vmul.f32 %v7569_v61, %v9211_v26 }
 0x28e   : > { %4101 = vst.msk [vmem:[#allocation4 + $0x258] sm:$0xff] %vm3955_vm3, %v9661_v27  ;;  %v5348_v24 = vld [vmem:[#allocation3 + $0x122] sm:$0xff]  ;;  %5381 = vst.msk [vmem:[#allocation4 + $0x208] sm:$0xff] %vm3955_vm3, %v5349_v8  ;;  %v9678_v16 = vld [vmem:[#allocation3 + $0x4a] sm:$0xff]  ;;  %v3922_v36 = vadd.f32 %v9225_v45, %v3883_v43 }
 0x28f   : > { %5380 = vst.msk [vmem:[#allocation4 + $0x1f0] sm:$0xff] %vm3955_vm3, %v5348_v24  ;;  %v9680_v42 = vld [vmem:[#allocation3 + $0x141] sm:$0xff]  ;;  %4041 = vst.msk [vmem:[#allocation3 + $0x171] sm:$0xff] %vm3955_vm3, %v3952_v29  ;;  %4373 = vrot.lane.b32.xlu1 %v9486_v12, %s7905_s22  ;;  %4823 = vrot.lane.b32.xlu0 %v9678_v16, %s7906_s23  ;;  %v9688_v31 = vld [vmem:[#allocation3 + $0x138] sm:$0xff]  ;;  %v3921_v26 = vadd.f32 %v9225_v45, %v3882_v35 }
 0x290   : > { %v9690_v7 = vld [vmem:[#allocation3 + $0x139] sm:$0xff]  ;;  %4744 = vst.msk [vmem:[#allocation4 + $0x260] sm:$0xff] %vm3955_vm3, %v9680_v42  ;;  %4040 = vst.msk [vmem:[#allocation3 + $0x169] sm:$0xff] %vm3955_vm3, %v3951_v9  ;;  %v5351_v50 = vld [vmem:[#allocation3 + $0x142] sm:$0xff]  ;;  %v3954_v51 = vmax.f32 %v3922_v36, 0.0 }
 0x291   : > { %v9692_v49 = vld [vmem:[#allocation3 + $0x140] sm:$0xff]  ;;  %4743 = vst.msk [vmem:[#allocation4 + $0x248] sm:$0xff] %vm3955_vm3, %v9690_v7  ;;  %4102 = vst.msk [vmem:[#allocation4 + $0x270] sm:$0xff] %vm3955_vm3, %v9688_v31  ;;  %v3953_v15 = vmax.f32 %v3921_v26, 0.0 }
 0x292   : > { %4103 = vst.msk [vmem:[#allocation4 + $0x288] sm:$0xff] %vm3955_vm3, %v9692_v49  ;;  %v5350_v12 = vld [vmem:[#allocation3 + $0x13a] sm:$0xff]  ;;  %5383 = vst.msk [vmem:[#allocation4 + $0x238] sm:$0xff] %vm3955_vm3, %v5351_v50 }
 0x293   : > { %5382 = vst.msk [vmem:[#allocation4 + $0x220] sm:$0xff] %vm3955_vm3, %v5350_v12  ;;  %v9706_v30 = vld [vmem:[#allocation3 + $0x159] sm:$0xff]  ;;  %4043 = vst.msk [vmem:[#allocation3 + $0x189] sm:$0xff] %vm3955_vm3, %v3954_v51  ;;  %4186 = vrot.lane.b32.xlu1 %v9337_v53, %s7906_s23  ;;  %5210 = vrot.lane.b32.xlu0 %v9375_v6, %s7907_s29  ;;  %v9713_v32 = vld [vmem:[#allocation3 + $0x150] sm:$0xff] }
 0x294   : > { %v5353_v45 = vld [vmem:[#allocation3 + $0x15a] sm:$0xff]  ;;  %v9715_v1 = vld [vmem:[#allocation3 + $0x151] sm:$0xff]  ;;  %4746 = vst.msk [vmem:[#allocation4 + $0x290] sm:$0xff] %vm3955_vm3, %v9706_v30  ;;  %4042 = vst.msk [vmem:[#allocation3 + $0x181] sm:$0xff] %vm3955_vm3, %v3953_v15 }
 0x295   : > { %v9717_v34 = vld [vmem:[#allocation3 + $0x158] sm:$0xff]  ;;  %5385 = vst.msk [vmem:[#allocation4 + $0x268] sm:$0xff] %vm3955_vm3, %v5353_v45  ;;  %4745 = vst.msk [vmem:[#allocation4 + $0x278] sm:$0xff] %vm3955_vm3, %v9715_v1  ;;  %v4758_v53 = vld [vmem:[#allocation3 + $0x6a] sm:$0xff] }
 0x296   : > { %v9723_v61 = vld [vmem:[#allocation3 + $0x152] sm:$0xff]  ;;  %4105 = vst.msk [vmem:[#allocation4 + $0x2b8] sm:$0xff] %vm3955_vm3, %v9717_v34  ;;  %4104 = vst.msk [vmem:[#allocation4 + $0x2a0] sm:$0xff] %vm3955_vm3, %v9713_v32 }
 0x297   : > { %5384 = vst.msk [vmem:[#allocation4 + $0x250] sm:$0xff] %vm3955_vm3, %v9723_v61  ;;  %v9733_v24 = vld [vmem:[#allocation3 + $0x171] sm:$0xff]  ;;  %4379 = vrot.lane.b32.xlu1 %v9556_v0, %s7905_s22  ;;  %4829 = vrot.lane.b32.xlu0 %v4758_v53, %s7906_s23  ;;  %v9740_v29 = vld [vmem:[#allocation3 + $0x168] sm:$0xff] }
 0x298   : > { %v9735_v8 = vld [vmem:[#allocation3 + $0x172] sm:$0xff]  ;;  %v9742_v43 = vld [vmem:[#allocation3 + $0x169] sm:$0xff]  ;;  %4748 = vst.msk [vmem:[#allocation4 + $0x2c0] sm:$0xff] %vm3955_vm3, %v9733_v24  ;;  %4106 = vst.msk [vmem:[#allocation4 + $0x2d0] sm:$0xff] %vm3955_vm3, %v9740_v29 }
 0x299   : > { %v9744_v9 = vld [vmem:[#allocation3 + $0x170] sm:$0xff]  ;;  %5387 = vst.msk [vmem:[#allocation4 + $0x298] sm:$0xff] %vm3955_vm3, %v9735_v8  ;;  %4747 = vst.msk [vmem:[#allocation4 + $0x2a8] sm:$0xff] %vm3955_vm3, %v9742_v43 }
 0x29a   : > { %v9750_v35 = vld [vmem:[#allocation3 + $0x16a] sm:$0xff]  ;;  %4107 = vst.msk [vmem:[#allocation4 + $0x2e8] sm:$0xff] %vm3955_vm3, %v9744_v9  ;;  %v4764_v45 = vld [vmem:[#allocation3 + $0xb2] sm:$0xff] }
 0x29b   : > { %5386 = vst.msk [vmem:[#allocation4 + $0x280] sm:$0xff] %vm3955_vm3, %v9750_v35  ;;  %v9760_v0 = vld [vmem:[#allocation3 + $0x189] sm:$0xff]  ;;  %4566 = vrot.lane.b32.xlu1 %v9346_v58, %s7907_s29  ;;  %5016 = vrot.lane.b32.xlu0 %v9385_v13, %s7905_s22  ;;  %v9768_v26 = vld [vmem:[#allocation3 + $0x181] sm:$0xff] }
 0x29c   : > { %v9762_v36 = vld [vmem:[#allocation3 + $0x18a] sm:$0xff]  ;;  %4750 = vst.msk [vmem:[#allocation4 + $0x2f0] sm:$0xff] %vm3955_vm3, %v9760_v0  ;;  %v9774_v12 = vld [vmem:[#allocation3 + $0x182] sm:$0xff]  ;;  %4749 = vst.msk [vmem:[#allocation4 + $0x2d8] sm:$0xff] %vm3955_vm3, %v9768_v26 }
 0x29d   : > { %5389 = vst.msk [vmem:[#allocation4 + $0x2c8] sm:$0xff] %vm3955_vm3, %v9762_v36  ;;  %5388 = vst.msk [vmem:[#allocation4 + $0x2b0] sm:$0xff] %vm3955_vm3, %v9774_v12  ;;  %v4757_v58 = vld [vmem:[#allocation3 + $0x62] sm:$0xff] }
 0x29f   : > { %4568 = vrot.lane.b32.xlu1 %v9350_v60, %s7907_s29  ;;  %5208 = vrot.lane.b32.xlu0 %v9387_v46, %s7907_s29  ;;  %v4760_v60 = vld [vmem:[#allocation3 + $0x82] sm:$0xff] }
 0x2a3   : > { %4184 = vrot.lane.b32.xlu1 %v9348_v59, %s7906_s23  ;;  %5018 = vrot.lane.b32.xlu0 %v9389_v22, %s7905_s22  ;;  %v4759_v59 = vld [vmem:[#allocation3 + $0x7a] sm:$0xff] }
 0x2a7   : > { %4377 = vrot.lane.b32.xlu1 %v9678_v16, %s7905_s22  ;;  %4827 = vrot.lane.b32.xlu0 %v4757_v58, %s7906_s23 }
 0x2ab   : > { %4190 = vrot.lane.b32.xlu1 %v9375_v6, %s7906_s23  ;;  %5214 = vrot.lane.b32.xlu0 %v9411_v55, %s7907_s29  ;;  %v9815_v6 = vpop.permute.xlu0 %5068 }
 0x2af   : > { %4383 = vrot.lane.b32.xlu1 %v4758_v53, %s7905_s22  ;;  %4833 = vrot.lane.b32.xlu0 %v4760_v60, %s7906_s23 }
 0x2b3   : > { %4570 = vrot.lane.b32.xlu1 %v9385_v13, %s7907_s29  ;;  %5020 = vrot.lane.b32.xlu0 %v9422_v25, %s7905_s22  ;;  %v4762_v13 = vld [vmem:[#allocation3 + $0x9a] sm:$0xff] }
 0x2b7   : > { %4572 = vrot.lane.b32.xlu1 %v9389_v22, %s7907_s29  ;;  %5212 = vrot.lane.b32.xlu0 %v9424_v19, %s7907_s29 }
 0x2bb   : > { %4188 = vrot.lane.b32.xlu1 %v9387_v46, %s7906_s23  ;;  %5022 = vrot.lane.b32.xlu0 %v9426_v63, %s7905_s22  ;;  %v9823_v46 = vpop.permute.xlu0 %5260 }
 0x2bf   : > { %4381 = vrot.lane.b32.xlu1 %v4757_v58, %s7905_s22  ;;  %4831 = vrot.lane.b32.xlu0 %v4759_v59, %s7906_s23 }
 0x2c3   : > { %4194 = vrot.lane.b32.xlu1 %v9411_v55, %s7906_s23  ;;  %5218 = vrot.lane.b32.xlu0 %v9448_v10, %s7907_s29 }
 0x2c7   : > { %4387 = vrot.lane.b32.xlu1 %v4760_v60, %s7905_s22  ;;  %4837 = vrot.lane.b32.xlu0 %v4762_v13, %s7906_s23 }
 0x2cb   : > { %4574 = vrot.lane.b32.xlu1 %v9422_v25, %s7907_s29  ;;  %5024 = vrot.lane.b32.xlu0 %v9459_v17, %s7905_s22 }
 0x2cf   : > { %4576 = vrot.lane.b32.xlu1 %v9426_v63, %s7907_s29  ;;  %5216 = vrot.lane.b32.xlu0 %v9461_v47, %s7907_s29  ;;  %v4761_v63 = vld [vmem:[#allocation3 + $0x92] sm:$0xff] }
 0x2d0   : > { %v4818_v22 = vpop.permute.xlu0 %4817 }
 0x2d1   : > { %v4179_v55 = vpop.permute.xlu1 %4178  ;;  %4912 = vst.msk [vmem:[#allocation4 + $0x20] sm:$0xff] %vm4268_vm5, %v4818_v22 }
 0x2d2   : > { %4272 = vst.msk [vmem:[#allocation4 + $0x48] sm:$0xff] %vm4268_vm5, %v4179_v55 }
 0x2d3   : > { %4192 = vrot.lane.b32.xlu1 %v9424_v19, %s7906_s23  ;;  %5026 = vrot.lane.b32.xlu0 %v9463_v38, %s7905_s22 }
 0x2d5   : > { %v4372_v25 = vpop.permute.xlu1 %4371  ;;  %v4816_v16 = vpop.permute.xlu0 %4815 }
 0x2d6   : > { %4465 = vst.msk [vmem:[#allocation4 + $0x48] sm:$0xff] %vm4461_vm6, %v4372_v25 }
 0x2d7   : > { %4911 = vst.msk [vmem:[#allocation4 + $0x8] sm:$0xff] %vm4268_vm5, %v4816_v16  ;;  %4385 = vrot.lane.b32.xlu1 %v4759_v59, %s7905_s22  ;;  %4835 = vrot.lane.b32.xlu0 %v4761_v63, %s7906_s23 }
 0x2d9   : > { %v4559_v50 = vpop.permute.xlu1 %4558  ;;  %v5203_v51 = vpop.permute.xlu0 %5202 }
 0x2da   : > { %4655 = vst.msk [vmem:[#allocation4] sm:$0xff] %vm4654_vm7, %v4559_v50 }
 0x2db   : > { %4198 = vrot.lane.b32.xlu1 %v9448_v10, %s7906_s23  ;;  %5222 = vrot.lane.b32.xlu0 %v9488_v39, %s7907_s29 }
 0x2dd   : > { %v4561_v19 = vpop.permute.xlu1 %4560  ;;  %v4822_v15 = vpop.permute.xlu0 %4821 }
 0x2de   : > { %4656 = vst.msk [vmem:[#allocation4 + $0x18] sm:$0xff] %vm4654_vm7, %v4561_v19 }
 0x2df   : > { %4914 = vst.msk [vmem:[#allocation4 + $0x50] sm:$0xff] %vm4268_vm5, %v4822_v15  ;;  %4391 = vrot.lane.b32.xlu1 %v4762_v13, %s7905_s22  ;;  %4841 = vrot.lane.b32.xlu0 %v4764_v45, %s7906_s23 }
 0x2e1   : > { %v4177_v53 = vpop.permute.xlu1 %4176  ;;  %v5201_v58 = vpop.permute.xlu0 %5200  ;;  %v5392_v19 = vld [vmem:[#allocation4] sm:$0xff] }
 0x2e2   : > { %4271 = vst.msk [vmem:[#allocation4 + $0x30] sm:$0xff] %vm4268_vm5, %v4177_v53 }
 0x2e3   : > { %4578 = vrot.lane.b32.xlu1 %v9459_v17, %s7907_s29  ;;  %5028 = vrot.lane.b32.xlu0 %v9498_v40, %s7905_s22 }
 0x2e5   : > { %v4370_v10 = vpop.permute.xlu1 %4369  ;;  %v5011_v60 = vpop.permute.xlu0 %5010 }
 0x2e6   : > { %4464 = vst.msk [vmem:[#allocation4 + $0x30] sm:$0xff] %vm4461_vm6, %v4370_v10  ;;  %5105 = vst.msk [vmem:[#allocation4 + $0x20] sm:$0xff] %vm4461_vm6, %v5011_v60 }
 0x2e7   : > { %5297 = vst.msk [vmem:[#allocation4 + $0x20] sm:$0xff] %vm4654_vm7, %v5203_v51  ;;  %4580 = vrot.lane.b32.xlu1 %v9463_v38, %s7907_s29  ;;  %5220 = vrot.lane.b32.xlu0 %v9500_v2, %s7907_s29  ;;  %v4763_v38 = vld [vmem:[#allocation3 + $0xaa] sm:$0xff] }
 0x2e9   : > { %v4183_v59 = vpop.permute.xlu1 %4182  ;;  %v4820_v13 = vpop.permute.xlu0 %4819 }
 0x2ea   : > { %4274 = vst.msk [vmem:[#allocation4 + $0x78] sm:$0xff] %vm4268_vm5, %v4183_v59  ;;  %4913 = vst.msk [vmem:[#allocation4 + $0x38] sm:$0xff] %vm4268_vm5, %v4820_v13 }
 0x2eb   : > { %4196 = vrot.lane.b32.xlu1 %v9461_v47, %s7906_s23  ;;  %5030 = vrot.lane.b32.xlu0 %v9502_v3, %s7905_s22 }
 0x2ed   : > { %v4376_v17 = vpop.permute.xlu1 %4375  ;;  %v5207_v22 = vpop.permute.xlu0 %5206 }
 0x2ee   : > { %4467 = vst.msk [vmem:[#allocation4 + $0x78] sm:$0xff] %vm4461_vm6, %v4376_v17  ;;  %v5396_v15 = vld [vmem:[#allocation4 + $0x20] sm:$0xff] }
 0x2ef   : > { %4389 = vrot.lane.b32.xlu1 %v4761_v63, %s7905_s22  ;;  %4839 = vrot.lane.b32.xlu0 %v4763_v38, %s7906_s23  ;;  %v4766_v63 = vld [vmem:[#allocation3 + $0xca] sm:$0xff] }
 0x2f1   : > { %v5009_v55 = vpop.permute.xlu1 %5008  ;;  %v4826_v25 = vpop.permute.xlu0 %4825 }
 0x2f2   : > { %5104 = vst.msk [vmem:[#allocation4 + $0x8] sm:$0xff] %vm4461_vm6, %v5009_v55 }
 0x2f3   : > { %4916 = vst.msk [vmem:[#allocation4 + $0x80] sm:$0xff] %vm4268_vm5, %v4826_v25  ;;  %4202 = vrot.lane.b32.xlu1 %v9488_v39, %s7906_s23  ;;  %5226 = vrot.lane.b32.xlu0 %v9525_v41, %s7907_s29 }
 0x2f4   : > { %5296 = vst.msk [vmem:[#allocation4 + $0x8] sm:$0xff] %vm4654_vm7, %v5201_v58  ;;  %v5395_v58 = vld [vmem:[#allocation4 + $0x18] sm:$0xff] }
 0x2f5   : > { %v4563_v47 = vpop.permute.xlu1 %4562  ;;  %v5013_v16 = vpop.permute.xlu0 %5012 }
 0x2f6   : > { %4657 = vst.msk [vmem:[#allocation4 + $0x30] sm:$0xff] %vm4654_vm7, %v4563_v47 }
 0x2f7   : > { %5106 = vst.msk [vmem:[#allocation4 + $0x38] sm:$0xff] %vm4461_vm6, %v5013_v16  ;;  %4395 = vrot.lane.b32.xlu1 %v4764_v45, %s7905_s22  ;;  %4845 = vrot.lane.b32.xlu0 %v4766_v63, %s7906_s23 }
 0x2f9   : > { %v4565_v50 = vpop.permute.xlu1 %4564  ;;  %v5205_v51 = vpop.permute.xlu0 %5204 }
 0x2fa   : > { %4658 = vst.msk [vmem:[#allocation4 + $0x48] sm:$0xff] %vm4654_vm7, %v4565_v50  ;;  %5298 = vst.msk [vmem:[#allocation4 + $0x38] sm:$0xff] %vm4654_vm7, %v5205_v51 }
 0x2fb   : > { %v5393_v39 = vld [vmem:[#allocation4 + $0x8] sm:$0xff]  ;;  %4582 = vrot.lane.b32.xlu1 %v9498_v40, %s7907_s29  ;;  %5032 = vrot.lane.b32.xlu0 %v9535_v54, %s7905_s22 }
 0x2fc   : > { %5684 = vmatprep.mubr.f32.mxu1 %v5393_v39 }
 0x2fd   : > { %5685 = vmatmul.mubr.f32.vlgmr.msra.gmra.mrb[32].mxu1 %v5392_v19  ;;  %v4181_v45 = vpop.permute.xlu1 %4180  ;;  %v5015_v53 = vpop.permute.xlu0 %5014  ;;  %v5398_v59 = vld [vmem:[#allocation4 + $0x30] sm:$0xff] }
 0x2fe   : > { %5689 = vmatprep.mubr.f32.mxu1 %v5396_v15  ;;  %4273 = vst.msk [vmem:[#allocation4 + $0x60] sm:$0xff] %vm4268_vm5, %v4181_v45 }
 0x2ff   : > { %5107 = vst.msk [vmem:[#allocation4 + $0x50] sm:$0xff] %vm4461_vm6, %v5015_v53  ;;  %4584 = vrot.lane.b32.xlu1 %v9502_v3, %s7907_s29  ;;  %5224 = vrot.lane.b32.xlu0 %v9537_v11, %s7907_s29 }
 0x300   : > { %5299 = vst.msk [vmem:[#allocation4 + $0x50] sm:$0xff] %vm4654_vm7, %v5207_v22  ;;  %v4765_v22 = vld [vmem:[#allocation3 + $0xc2] sm:$0xff] }
 0x301   : > { %5690 = vmatmul.mubr.f32.gmra.mrb[34].mxu1 %v5395_v58  ;;  %v4374_v40 = vpop.permute.xlu1 %4373  ;;  %v4824_v10 = vpop.permute.xlu0 %4823  ;;  %v5399_v60 = vld [vmem:[#allocation4 + $0x38] sm:$0xff]  ;;  %v5401_v55 = vld [vmem:[#allocation4 + $0x48] sm:$0xff] }
 0x302   : > { %4466 = vst.msk [vmem:[#allocation4 + $0x60] sm:$0xff] %vm4461_vm6, %v4374_v40  ;;  %5694 = vmatprep.mubr.f32.mxu1 %v5399_v60  ;;  %v4767_v58 = vld [vmem:[#allocation3 + $0xda] sm:$0xff] }
 0x303   : > { %4915 = vst.msk [vmem:[#allocation4 + $0x68] sm:$0xff] %vm4268_vm5, %v4824_v10  ;;  %4200 = vrot.lane.b32.xlu1 %v9500_v2, %s7906_s23  ;;  %5034 = vrot.lane.b32.xlu0 %v9539_v48, %s7905_s22 }
 0x305   : > { %5695 = vmatmul.mubr.f32.gmra.mrb[36].mxu1 %v5398_v59  ;;  %v4187_v3 = vpop.permute.xlu1 %4186  ;;  %v5211_v13 = vpop.permute.xlu0 %5210 }
 0x306   : > { %4276 = vst.msk [vmem:[#allocation4 + $0xa8] sm:$0xff] %vm4268_vm5, %v4187_v3  ;;  %v4770_v3 = vld [vmem:[#allocation3 + $0xfa] sm:$0xff] }
 0x307   : > { %v5402_v17 = vld [vmem:[#allocation4 + $0x50] sm:$0xff]  ;;  %4393 = vrot.lane.b32.xlu1 %v4763_v38, %s7905_s22  ;;  %4843 = vrot.lane.b32.xlu0 %v4765_v22, %s7906_s23 }
 0x308   : > { %5699 = vmatprep.mubr.f32.mxu1 %v5402_v17  ;;  %v4768_v38 = vld [vmem:[#allocation3 + $0xe2] sm:$0xff] }
 0x309   : > { %5700 = vmatmul.mubr.f32.gmra.mrb[38].mxu1 %v5401_v55  ;;  %v4380_v25 = vpop.permute.xlu1 %4379  ;;  %v4830_v2 = vpop.permute.xlu0 %4829 }
 0x30a   : > { %4469 = vst.msk [vmem:[#allocation4 + $0xa8] sm:$0xff] %vm4461_vm6, %v4380_v25 }
 0x30b   : > { %4918 = vst.msk [vmem:[#allocation4 + $0xb0] sm:$0xff] %vm4268_vm5, %v4830_v2  ;;  %4206 = vrot.lane.b32.xlu1 %v9525_v41, %s7906_s23  ;;  %5230 = vrot.lane.b32.xlu0 %v9558_v20, %s7907_s29 }
 0x30d   : > { %v4567_v47 = vpop.permute.xlu1 %4566  ;;  %v5017_v16 = vpop.permute.xlu0 %5016 }
 0x30e   : > { %4659 = vst.msk [vmem:[#allocation4 + $0x60] sm:$0xff] %vm4654_vm7, %v4567_v47 }
 0x30f   : > { %5108 = vst.msk [vmem:[#allocation4 + $0x68] sm:$0xff] %vm4461_vm6, %v5017_v16  ;;  %4399 = vrot.lane.b32.xlu1 %v4766_v63, %s7905_s22  ;;  %4849 = vrot.lane.b32.xlu0 %v4768_v38, %s7906_s23 }
 0x311   : > { %v4569_v50 = vpop.permute.xlu1 %4568  ;;  %v5209_v51 = vpop.permute.xlu0 %5208 }
 0x312   : > { %4660 = vst.msk [vmem:[#allocation4 + $0x78] sm:$0xff] %vm4654_vm7, %v4569_v50  ;;  %5300 = vst.msk [vmem:[#allocation4 + $0x68] sm:$0xff] %vm4654_vm7, %v5209_v51 }
 0x313   : > { %4586 = vrot.lane.b32.xlu1 %v9535_v54, %s7907_s29  ;;  %5036 = vrot.lane.b32.xlu0 %v9567_v21, %s7905_s22 }
 0x315   : > { %v4185_v41 = vpop.permute.xlu1 %4184  ;;  %v5019_v39 = vpop.permute.xlu0 %5018  ;;  %v5404_v15 = vld [vmem:[#allocation4 + $0x60] sm:$0xff] }
 0x316   : > { %4275 = vst.msk [vmem:[#allocation4 + $0x90] sm:$0xff] %vm4268_vm5, %v4185_v41 }
 0x317   : > { %5109 = vst.msk [vmem:[#allocation4 + $0x80] sm:$0xff] %vm4461_vm6, %v5019_v39  ;;  %4588 = vrot.lane.b32.xlu1 %v9539_v48, %s7907_s29  ;;  %5228 = vrot.lane.b32.xlu0 %v9569_v4, %s7907_s29 }
 0x318   : > { %5301 = vst.msk [vmem:[#allocation4 + $0x80] sm:$0xff] %vm4654_vm7, %v5211_v13 }
 0x319   : > { %v4378_v63 = vpop.permute.xlu1 %4377  ;;  %v4828_v19 = vpop.permute.xlu0 %4827  ;;  %v5405_v54 = vld [vmem:[#allocation4 + $0x68] sm:$0xff]  ;;  %v5407_v40 = vld [vmem:[#allocation4 + $0x78] sm:$0xff] }
 0x31a   : > { %4468 = vst.msk [vmem:[#allocation4 + $0x90] sm:$0xff] %vm4461_vm6, %v4378_v63  ;;  %5704 = vmatprep.mubr.f32.mxu1 %v5405_v54  ;;  %v4772_v63 = vld [vmem:[#allocation3 + $0x112] sm:$0xff] }
 0x31b   : > { %4917 = vst.msk [vmem:[#allocation4 + $0x98] sm:$0xff] %vm4268_vm5, %v4828_v19  ;;  %5705 = vmatmul.mubr.f32.gmra.mrb[40].mxu1 %v5404_v15  ;;  %4204 = vrot.lane.b32.xlu1 %v9537_v11, %s7906_s23 }
 0x31c   : > { %5038 = vrot.lane.b32.xlu0 %v9571_v5, %s7905_s22 }
 0x31d   : > { %v4191_v48 = vpop.permute.xlu1 %4190  ;;  %v5215_v45 = vpop.permute.xlu0 %5214 }
 0x31e   : > { %4278 = vst.msk [vmem:[#allocation4 + $0xd8] sm:$0xff] %vm4268_vm5, %v4191_v48 }
 0x31f   : > { %v5408_v53 = vld [vmem:[#allocation4 + $0x80] sm:$0xff]  ;;  %4397 = vrot.lane.b32.xlu1 %v4765_v22, %s7905_s22 }
 0x320   : > { %5709 = vmatprep.mubr.f32.mxu1 %v5408_v53  ;;  %4847 = vrot.lane.b32.xlu0 %v4767_v58, %s7906_s23 }
 0x321   : > { %5710 = vmatmul.mubr.f32.gmra.mrb[42].mxu1 %v5407_v40  ;;  %v4384_v10 = vpop.permute.xlu1 %4383  ;;  %v4834_v60 = vpop.permute.xlu0 %4833 }
 0x322   : > { %4471 = vst.msk [vmem:[#allocation4 + $0xd8] sm:$0xff] %vm4461_vm6, %v4384_v10  ;;  %v4771_v10 = vld [vmem:[#allocation3 + $0x10a] sm:$0xff] }
 0x323   : > { %4920 = vst.msk [vmem:[#allocation4 + $0xe0] sm:$0xff] %vm4268_vm5, %v4834_v60  ;;  %4210 = vrot.lane.b32.xlu1 %v9558_v20, %s7906_s23 }
 0x324   : > { %5234 = vrot.lane.b32.xlu0 %v9588_v23, %s7907_s29 }
 0x325   : > { %v4571_v11 = vpop.permute.xlu1 %4570  ;;  %v5021_v59 = vpop.permute.xlu0 %5020 }
 0x326   : > { %4661 = vst.msk [vmem:[#allocation4 + $0x90] sm:$0xff] %vm4654_vm7, %v4571_v11  ;;  %v5520_v11 = vld [vmem:[%s10576_s4 + $0x100] sm:$0xff] }
 0x327   : > { %5110 = vst.msk [vmem:[#allocation4 + $0x98] sm:$0xff] %vm4461_vm6, %v5021_v59  ;;  %4403 = vrot.lane.b32.xlu1 %v4768_v38, %s7905_s22  ;;  %v4769_v38 = vld [vmem:[#allocation3 + $0xf2] sm:$0xff] }
 0x328   : > { %4853 = vrot.lane.b32.xlu0 %v4770_v3, %s7906_s23 }
 0x329   : > { %v4573_v13 = vpop.permute.xlu1 %4572  ;;  %v5213_v17 = vpop.permute.xlu0 %5212 }
 0x32a   : > { %4662 = vst.msk [vmem:[#allocation4 + $0xa8] sm:$0xff] %vm4654_vm7, %v4573_v13  ;;  %5302 = vst.msk [vmem:[#allocation4 + $0x98] sm:$0xff] %vm4654_vm7, %v5213_v17 }
 0x32b   : > { %4590 = vrot.lane.b32.xlu1 %v9567_v21, %s7907_s29 }
 0x32c   : > { %5040 = vrot.lane.b32.xlu0 %v9597_v52, %s7905_s22 }
 0x32d   : > { %v4189_v20 = vpop.permute.xlu1 %4188  ;;  %v5023_v22 = vpop.permute.xlu0 %5022  ;;  %v5410_v2 = vld [vmem:[#allocation4 + $0x90] sm:$0xff] }
 0x32e   : > { %4277 = vst.msk [vmem:[#allocation4 + $0xc0] sm:$0xff] %vm4268_vm5, %v4189_v20 }
 0x32f   : > { %5111 = vst.msk [vmem:[#allocation4 + $0xb0] sm:$0xff] %vm4461_vm6, %v5023_v22  ;;  %4592 = vrot.lane.b32.xlu1 %v9571_v5, %s7907_s29  ;;  %v4774_v22 = vld [vmem:[#allocation3 + $0x12a] sm:$0xff] }
 0x330   : > { %5303 = vst.msk [vmem:[#allocation4 + $0xb0] sm:$0xff] %vm4654_vm7, %v5215_v45  ;;  %5232 = vrot.lane.b32.xlu0 %v9599_v18, %s7907_s29 }
 0x331   : > { %v4382_v55 = vpop.permute.xlu1 %4381  ;;  %v4832_v25 = vpop.permute.xlu0 %4831  ;;  %v5411_v21 = vld [vmem:[#allocation4 + $0x98] sm:$0xff]  ;;  %v5413_v50 = vld [vmem:[#allocation4 + $0xa8] sm:$0xff] }
 0x332   : > { %4470 = vst.msk [vmem:[#allocation4 + $0xc0] sm:$0xff] %vm4461_vm6, %v4382_v55  ;;  %5714 = vmatprep.mubr.f32.mxu1 %v5411_v21 }
 0x333   : > { %4919 = vst.msk [vmem:[#allocation4 + $0xc8] sm:$0xff] %vm4268_vm5, %v4832_v25  ;;  %5715 = vmatmul.mubr.f32.gmra.mrb[44].mxu1 %v5410_v2  ;;  %4208 = vrot.lane.b32.xlu1 %v9569_v4, %s7906_s23 }
 0x334   : > { %5042 = vrot.lane.b32.xlu0 %v9601_v56, %s7905_s22 }
 0x335   : > { %v4195_v5 = vpop.permute.xlu1 %4194  ;;  %v5219_v47 = vpop.permute.xlu0 %5218 }
 0x336   : > { %4280 = vst.msk [vmem:[#allocation4 + $0x108] sm:$0xff] %vm4268_vm5, %v4195_v5 }
 0x337   : > { %v5414_v16 = vld [vmem:[#allocation4 + $0xb0] sm:$0xff]  ;;  %4401 = vrot.lane.b32.xlu1 %v4767_v58, %s7905_s22 }
 0x338   : > { %5719 = vmatprep.mubr.f32.mxu1 %v5414_v16  ;;  %4851 = vrot.lane.b32.xlu0 %v4769_v38, %s7906_s23 }
 0x339   : > { %5720 = vmatmul.mubr.f32.gmra.mrb[46].mxu1 %v5413_v50  ;;  %v4388_v51 = vpop.permute.xlu1 %4387  ;;  %v4838_v41 = vpop.permute.xlu0 %4837  ;;  %v4773_v50 = vld [vmem:[#allocation3 + $0x122] sm:$0xff] }
 0x33a   : > { %4473 = vst.msk [vmem:[#allocation4 + $0x108] sm:$0xff] %vm4461_vm6, %v4388_v51 }
 0x33b   : > { %4922 = vst.msk [vmem:[#allocation4 + $0x110] sm:$0xff] %vm4268_vm5, %v4838_v41  ;;  %4214 = vrot.lane.b32.xlu1 %v9588_v23, %s7906_s23 }
 0x33c   : > { %5238 = vrot.lane.b32.xlu0 %v9617_v28, %s7907_s29 }
 0x33d   : > { %v4575_v4 = vpop.permute.xlu1 %4574  ;;  %v5025_v39 = vpop.permute.xlu0 %5024 }
 0x33e   : > { %4663 = vst.msk [vmem:[#allocation4 + $0xc0] sm:$0xff] %vm4654_vm7, %v4575_v4 }
 0x33f   : > { %5112 = vst.msk [vmem:[#allocation4 + $0xc8] sm:$0xff] %vm4461_vm6, %v5025_v39  ;;  %4407 = vrot.lane.b32.xlu1 %v4770_v3, %s7905_s22 }
 0x340   : > { %4857 = vrot.lane.b32.xlu0 %v4772_v63, %s7906_s23 }
 0x341   : > { %v4577_v19 = vpop.permute.xlu1 %4576  ;;  %v5217_v54 = vpop.permute.xlu0 %5216 }
 0x342   : > { %4664 = vst.msk [vmem:[#allocation4 + $0xd8] sm:$0xff] %vm4654_vm7, %v4577_v19  ;;  %5304 = vst.msk [vmem:[#allocation4 + $0xc8] sm:$0xff] %vm4654_vm7, %v5217_v54 }
 0x343   : > { %4594 = vrot.lane.b32.xlu1 %v9597_v52, %s7907_s29 }
 0x344   : > { %5044 = vrot.lane.b32.xlu0 %v9627_v37, %s7905_s22 }
 0x345   : > { %v4193_v23 = vpop.permute.xlu1 %4192  ;;  %v5027_v15 = vpop.permute.xlu0 %5026  ;;  %v5416_v53 = vld [vmem:[#allocation4 + $0xc0] sm:$0xff] }
 0x346   : > { %4279 = vst.msk [vmem:[#allocation4 + $0xf0] sm:$0xff] %vm4268_vm5, %v4193_v23 }
 0x347   : > { %5113 = vst.msk [vmem:[#allocation4 + $0xe0] sm:$0xff] %vm4461_vm6, %v5027_v15  ;;  %4596 = vrot.lane.b32.xlu1 %v9601_v56, %s7907_s29 }
 0x348   : > { %5305 = vst.msk [vmem:[#allocation4 + $0xe0] sm:$0xff] %vm4654_vm7, %v5219_v47  ;;  %5236 = vrot.lane.b32.xlu0 %v9629_v33, %s7907_s29 }
 0x349   : > { %v4386_v48 = vpop.permute.xlu1 %4385  ;;  %v4836_v45 = vpop.permute.xlu0 %4835  ;;  %v5417_v52 = vld [vmem:[#allocation4 + $0xc8] sm:$0xff]  ;;  %v5419_v60 = vld [vmem:[#allocation4 + $0xd8] sm:$0xff] }
 0x34a   : > { %4472 = vst.msk [vmem:[#allocation4 + $0xf0] sm:$0xff] %vm4461_vm6, %v4386_v48  ;;  %5724 = vmatprep.mubr.f32.mxu1 %v5417_v52 }
 0x34b   : > { %4921 = vst.msk [vmem:[#allocation4 + $0xf8] sm:$0xff] %vm4268_vm5, %v4836_v45  ;;  %5725 = vmatmul.mubr.f32.gmra.mrb[48].mxu1 %v5416_v53  ;;  %4212 = vrot.lane.b32.xlu1 %v9599_v18, %s7906_s23  ;;  %v5521_v18 = vld [vmem:[%s10576_s4 + $0x108] sm:$0xff] }
 0x34c   : > { %5046 = vrot.lane.b32.xlu0 %v9631_v62, %s7905_s22  ;;  %v7530_v59 = vpack.c.bf16 %v5521_v18, %v5520_v11  ;;  %v4778_v11 = vld [vmem:[#allocation3 + $0x15a] sm:$0xff] }
 0x34d   : > { %v4199_v56 = vpop.permute.xlu1 %4198  ;;  %v5223_v58 = vpop.permute.xlu0 %5222 }
 0x34e   : > { %4282 = vst.msk [vmem:[#allocation4 + $0x138] sm:$0xff] %vm4268_vm5, %v4199_v56  ;;  %7531 = vmatprep.subr.bf16.mxu1 %v7530_v59  ;;  %v4775_v56 = vld [vmem:[#allocation3 + $0x13a] sm:$0xff] }
 0x34f   : > { %v5420_v40 = vld [vmem:[#allocation4 + $0xe0] sm:$0xff]  ;;  %4405 = vrot.lane.b32.xlu1 %v4769_v38, %s7905_s22  ;;  %7533 = vmatpush3.bf16.msra.mxu1 %v7530_v59 }
 0x350   : > { %5729 = vmatprep.mubr.f32.mxu1 %v5420_v40  ;;  %4855 = vrot.lane.b32.xlu0 %v4771_v10, %s7906_s23 }
 0x351   : > { %5730 = vmatmul.mubr.f32.gmra.mrb[50].mxu1 %v5419_v60  ;;  %v4392_v3 = vpop.permute.xlu1 %4391  ;;  %v4842_v13 = vpop.permute.xlu0 %4841 }
 0x352   : > { %4475 = vst.msk [vmem:[#allocation4 + $0x138] sm:$0xff] %vm4461_vm6, %v4392_v3 }
 0x353   : > { %4924 = vst.msk [vmem:[#allocation4 + $0x140] sm:$0xff] %vm4268_vm5, %v4842_v13  ;;  %4218 = vrot.lane.b32.xlu1 %v9617_v28, %s7906_s23  ;;  %v5522_v13 = vld [vmem:[%s10576_s4 + $0x110] sm:$0xff] }
 0x354   : > { %5242 = vrot.lane.b32.xlu0 %v9647_v44, %s7907_s29 }
 0x355   : > { %v4579_v17 = vpop.permute.xlu1 %4578  ;;  %v5029_v20 = vpop.permute.xlu0 %5028 }
 0x356   : > { %4665 = vst.msk [vmem:[#allocation4 + $0xf0] sm:$0xff] %vm4654_vm7, %v4579_v17  ;;  %v5523_v17 = vld [vmem:[%s10576_s4 + $0x118] sm:$0xff] }
 0x357   : > { %5114 = vst.msk [vmem:[#allocation4 + $0xf8] sm:$0xff] %vm4461_vm6, %v5029_v20  ;;  %4411 = vrot.lane.b32.xlu1 %v4772_v63, %s7905_s22  ;;  %v4776_v63 = vld [vmem:[#allocation3 + $0x142] sm:$0xff] }
 0x358   : > { %4861 = vrot.lane.b32.xlu0 %v4774_v22, %s7906_s23 }
 0x359   : > { %v4581_v55 = vpop.permute.xlu1 %4580  ;;  %v5221_v25 = vpop.permute.xlu0 %5220 }
 0x35a   : > { %4666 = vst.msk [vmem:[#allocation4 + $0x108] sm:$0xff] %vm4654_vm7, %v4581_v55  ;;  %5306 = vst.msk [vmem:[#allocation4 + $0xf8] sm:$0xff] %vm4654_vm7, %v5221_v25 }
 0x35b   : > { %4598 = vrot.lane.b32.xlu1 %v9627_v37, %s7907_s29 }
 0x35c   : > { %5048 = vrot.lane.b32.xlu0 %v9657_v57, %s7905_s22 }
 0x35d   : > { %v4197_v28 = vpop.permute.xlu1 %4196  ;;  %v5031_v21 = vpop.permute.xlu0 %5030  ;;  %v5422_v47 = vld [vmem:[#allocation4 + $0xf0] sm:$0xff] }
 0x35e   : > { %4281 = vst.msk [vmem:[#allocation4 + $0x120] sm:$0xff] %vm4268_vm5, %v4197_v28 }
 0x35f   : > { %5115 = vst.msk [vmem:[#allocation4 + $0x110] sm:$0xff] %vm4461_vm6, %v5031_v21  ;;  %4600 = vrot.lane.b32.xlu1 %v9631_v62, %s7907_s29 }
 0x360   : > { %5307 = vst.msk [vmem:[#allocation4 + $0x110] sm:$0xff] %vm4654_vm7, %v5223_v58  ;;  %5240 = vrot.lane.b32.xlu0 %v9659_v14, %s7907_s29 }
 0x361   : > { %v4390_v2 = vpop.permute.xlu1 %4389  ;;  %v4840_v5 = vpop.permute.xlu0 %4839  ;;  %v5423_v37 = vld [vmem:[#allocation4 + $0xf8] sm:$0xff]  ;;  %v5425_v51 = vld [vmem:[#allocation4 + $0x108] sm:$0xff] }
 0x362   : > { %4474 = vst.msk [vmem:[#allocation4 + $0x120] sm:$0xff] %vm4461_vm6, %v4390_v2  ;;  %5734 = vmatprep.mubr.f32.mxu1 %v5423_v37 }
 0x363   : > { %4923 = vst.msk [vmem:[#allocation4 + $0x128] sm:$0xff] %vm4268_vm5, %v4840_v5  ;;  %5735 = vmatmul.mubr.f32.gmra.mrb[52].mxu1 %v5422_v47  ;;  %4216 = vrot.lane.b32.xlu1 %v9629_v33, %s7906_s23 }
 0x364   : > { %5050 = vrot.lane.b32.xlu0 %v9661_v27, %s7905_s22 }
 0x365   : > { %v4203_v62 = vpop.permute.xlu1 %4202  ;;  %v5227_v16 = vpop.permute.xlu0 %5226 }
 0x366   : > { %4284 = vst.msk [vmem:[#allocation4 + $0x168] sm:$0xff] %vm4268_vm5, %v4203_v62 }
 0x367   : > { %v5426_v38 = vld [vmem:[#allocation4 + $0x110] sm:$0xff]  ;;  %4409 = vrot.lane.b32.xlu1 %v4771_v10, %s7905_s22 }
 0x368   : > { %5739 = vmatprep.mubr.f32.mxu1 %v5426_v38  ;;  %4859 = vrot.lane.b32.xlu0 %v4773_v50, %s7906_s23 }
 0x369   : > { %5740 = vmatmul.mubr.f32.gmra.mrb[54].mxu1 %v5425_v51  ;;  %v4396_v41 = vpop.permute.xlu1 %4395  ;;  %v4846_v4 = vpop.permute.xlu0 %4845 }
 0x36a   : > { %4477 = vst.msk [vmem:[#allocation4 + $0x168] sm:$0xff] %vm4461_vm6, %v4396_v41 }
 0x36b   : > { %4926 = vst.msk [vmem:[#allocation4 + $0x170] sm:$0xff] %vm4268_vm5, %v4846_v4  ;;  %4222 = vrot.lane.b32.xlu1 %v9647_v44, %s7906_s23 }
 0x36c   : > { %5246 = vrot.lane.b32.xlu0 %v9680_v42, %s7907_s29 }
 0x36d   : > { %v4583_v33 = vpop.permute.xlu1 %4582  ;;  %v5033_v39 = vpop.permute.xlu0 %5032 }
 0x36e   : > { %4667 = vst.msk [vmem:[#allocation4 + $0x120] sm:$0xff] %vm4654_vm7, %v4583_v33 }
 0x36f   : > { %5116 = vst.msk [vmem:[#allocation4 + $0x128] sm:$0xff] %vm4461_vm6, %v5033_v39  ;;  %4415 = vrot.lane.b32.xlu1 %v4774_v22, %s7905_s22 }
 0x370   : > { %4865 = vrot.lane.b32.xlu0 %v4776_v63, %s7906_s23 }
 0x371   : > { %v4585_v19 = vpop.permute.xlu1 %4584  ;;  %v5225_v54 = vpop.permute.xlu0 %5224 }
 0x372   : > { %4668 = vst.msk [vmem:[#allocation4 + $0x138] sm:$0xff] %vm4654_vm7, %v4585_v19  ;;  %5308 = vst.msk [vmem:[#allocation4 + $0x128] sm:$0xff] %vm4654_vm7, %v5225_v54 }
 0x373   : > { %4602 = vrot.lane.b32.xlu1 %v9657_v57, %s7907_s29 }
 0x374   : > { %5052 = vrot.lane.b32.xlu0 %v9688_v31, %s7905_s22 }
 0x375   : > { %v4201_v44 = vpop.permute.xlu1 %4200  ;;  %v5035_v23 = vpop.permute.xlu0 %5034  ;;  %v5428_v45 = vld [vmem:[#allocation4 + $0x120] sm:$0xff] }
 0x376   : > { %4283 = vst.msk [vmem:[#allocation4 + $0x150] sm:$0xff] %vm4268_vm5, %v4201_v44 }
 0x377   : > { %5117 = vst.msk [vmem:[#allocation4 + $0x140] sm:$0xff] %vm4461_vm6, %v5035_v23  ;;  %4604 = vrot.lane.b32.xlu1 %v9661_v27, %s7907_s29 }
 0x378   : > { %5309 = vst.msk [vmem:[#allocation4 + $0x140] sm:$0xff] %vm4654_vm7, %v5227_v16  ;;  %5244 = vrot.lane.b32.xlu0 %v9690_v7, %s7907_s29 }
 0x379   : > { %v4394_v15 = vpop.permute.xlu1 %4393  ;;  %v4844_v57 = vpop.permute.xlu0 %4843  ;;  %v5429_v48 = vld [vmem:[#allocation4 + $0x128] sm:$0xff]  ;;  %v5431_v58 = vld [vmem:[#allocation4 + $0x138] sm:$0xff] }
 0x37a   : > { %4476 = vst.msk [vmem:[#allocation4 + $0x150] sm:$0xff] %vm4461_vm6, %v4394_v15  ;;  %5744 = vmatprep.mubr.f32.mxu1 %v5429_v48 }
 0x37b   : > { %4925 = vst.msk [vmem:[#allocation4 + $0x158] sm:$0xff] %vm4268_vm5, %v4844_v57  ;;  %4220 = vrot.lane.b32.xlu1 %v9659_v14, %s7906_s23  ;;  %5745 = vmatmul.mubr.f32.gmra.mrb[56].mxu1 %v5428_v45  ;;  %v4973_v57 = vld [vmem:[#allocation3 + $0x188] sm:$0xff] }
 0x37c   : > { %5054 = vrot.lane.b32.xlu0 %v9692_v49, %s7905_s22 }
 0x37d   : > { %v4207_v27 = vpop.permute.xlu1 %4206  ;;  %v5231_v52 = vpop.permute.xlu0 %5230 }
 0x37e   : > { %4286 = vst.msk [vmem:[#allocation4 + $0x198] sm:$0xff] %vm4268_vm5, %v4207_v27 }
 0x37f   : > { %v5432_v53 = vld [vmem:[#allocation4 + $0x140] sm:$0xff]  ;;  %4413 = vrot.lane.b32.xlu1 %v4773_v50, %s7905_s22 }
 0x380   : > { %5749 = vmatprep.mubr.f32.mxu1 %v5432_v53  ;;  %4863 = vrot.lane.b32.xlu0 %v4775_v56, %s7906_s23 }
 0x381   : > { %5750 = vmatmul.mubr.f32.gmra.mrb[58].mxu1 %v5431_v58  ;;  %v4400_v40 = vpop.permute.xlu1 %4399  ;;  %v4850_v14 = vpop.permute.xlu0 %4849 }
 0x382   : > { %4479 = vst.msk [vmem:[#allocation4 + $0x198] sm:$0xff] %vm4461_vm6, %v4400_v40 }
 0x383   : > { %4928 = vst.msk [vmem:[#allocation4 + $0x1a0] sm:$0xff] %vm4268_vm5, %v4850_v14  ;;  %4226 = vrot.lane.b32.xlu1 %v9680_v42, %s7906_s23 }
 0x384   : > { %5250 = vrot.lane.b32.xlu0 %v9706_v30, %s7907_s29 }
 0x385   : > { %v4587_v10 = vpop.permute.xlu1 %4586  ;;  %v5037_v60 = vpop.permute.xlu0 %5036 }
 0x386   : > { %4669 = vst.msk [vmem:[#allocation4 + $0x150] sm:$0xff] %vm4654_vm7, %v4587_v10 }
 0x387   : > { %5118 = vst.msk [vmem:[#allocation4 + $0x158] sm:$0xff] %vm4461_vm6, %v5037_v60  ;;  %4419 = vrot.lane.b32.xlu1 %v4776_v63, %s7905_s22 }
 0x388   : > { %4869 = vrot.lane.b32.xlu0 %v4778_v11, %s7906_s23 }
 0x389   : > { %v4589_v18 = vpop.permute.xlu1 %4588  ;;  %v5229_v59 = vpop.permute.xlu0 %5228 }
 0x38a   : > { %4670 = vst.msk [vmem:[#allocation4 + $0x168] sm:$0xff] %vm4654_vm7, %v4589_v18  ;;  %5310 = vst.msk [vmem:[#allocation4 + $0x158] sm:$0xff] %vm4654_vm7, %v5229_v59 }
 0x38b   : > { %4606 = vrot.lane.b32.xlu1 %v9688_v31, %s7907_s29  ;;  %v7534_v31 = vpack.c.bf16 %v5523_v17, %v5522_v13 }
 0x38c   : > { %5056 = vrot.lane.b32.xlu0 %v9713_v32, %s7905_s22 }
 0x38d   : > { %v4205_v42 = vpop.permute.xlu1 %4204  ;;  %7535 = vmatprep.subr.bf16.mxu1 %v7534_v31  ;;  %v5434_v25 = vld [vmem:[#allocation4 + $0x150] sm:$0xff] }
 0x38e   : > { %4285 = vst.msk [vmem:[#allocation4 + $0x180] sm:$0xff] %vm4268_vm5, %v4205_v42  ;;  %v5039_v3 = vpop.permute.xlu0 %5038  ;;  %7537 = vmatpush3.bf16.msra.mxu1 %v7534_v31 }
 0x38f   : > { %5119 = vst.msk [vmem:[#allocation4 + $0x170] sm:$0xff] %vm4461_vm6, %v5039_v3  ;;  %4608 = vrot.lane.b32.xlu1 %v9692_v49, %s7907_s29 }
 0x390   : > { %5311 = vst.msk [vmem:[#allocation4 + $0x170] sm:$0xff] %vm4654_vm7, %v5231_v52  ;;  %5248 = vrot.lane.b32.xlu0 %v9715_v1, %s7907_s29 }
 0x391   : > { %v4398_v20 = vpop.permute.xlu1 %4397  ;;  %v5435_v55 = vld [vmem:[#allocation4 + $0x158] sm:$0xff]  ;;  %v5437_v2 = vld [vmem:[#allocation4 + $0x168] sm:$0xff] }
 0x392   : > { %4478 = vst.msk [vmem:[#allocation4 + $0x180] sm:$0xff] %vm4461_vm6, %v4398_v20  ;;  %v4848_v22 = vpop.permute.xlu0 %4847  ;;  %5754 = vmatprep.mubr.f32.mxu1 %v5435_v55 }
 0x393   : > { %4927 = vst.msk [vmem:[#allocation4 + $0x188] sm:$0xff] %vm4268_vm5, %v4848_v22  ;;  %4224 = vrot.lane.b32.xlu1 %v9690_v7, %s7906_s23  ;;  %5755 = vmatmul.mubr.f32.gmra.mrb[60].mxu1 %v5434_v25 }
 0x394   : > { %5058 = vrot.lane.b32.xlu0 %v9717_v34, %s7905_s22 }
 0x395   : > { %v4211_v49 = vpop.permute.xlu1 %4210 }
 0x396   : > { %4288 = vst.msk [vmem:[#allocation4 + $0x1c8] sm:$0xff] %vm4268_vm5, %v4211_v49  ;;  %v5235_v28 = vpop.permute.xlu0 %5234 }
 0x397   : > { %v5438_v21 = vld [vmem:[#allocation4 + $0x170] sm:$0xff]  ;;  %4417 = vrot.lane.b32.xlu1 %v4775_v56, %s7905_s22 }
 0x398   : > { %5759 = vmatprep.mubr.f32.mxu1 %v5438_v21  ;;  %4867 = vrot.lane.b32.xlu0 %v9723_v61, %s7906_s23  ;;  %v5167_v56 = vld [vmem:[#allocation3 + $0x1a1] sm:$0xff] }
 0x399   : > { %5760 = vmatmul.mubr.f32.gmra.mrb[62].mxu1 %v5437_v2  ;;  %v4404_v5 = vpop.permute.xlu1 %4403 }
 0x39a   : > { %4481 = vst.msk [vmem:[#allocation4 + $0x1c8] sm:$0xff] %vm4461_vm6, %v4404_v5  ;;  %v4854_v7 = vpop.permute.xlu0 %4853 }
 0x39b   : > { %4930 = vst.msk [vmem:[#allocation4 + $0x1d0] sm:$0xff] %vm4268_vm5, %v4854_v7  ;;  %4230 = vrot.lane.b32.xlu1 %v9706_v30, %s7906_s23 }
 0x39c   : > { %5254 = vrot.lane.b32.xlu0 %v9733_v24, %s7907_s29 }
 0x39d   : > { %v4591_v37 = vpop.permute.xlu1 %4590 }
 0x39e   : > { %4671 = vst.msk [vmem:[#allocation4 + $0x180] sm:$0xff] %vm4654_vm7, %v4591_v37  ;;  %v5041_v47 = vpop.permute.xlu0 %5040 }
 0x39f   : > { %5120 = vst.msk [vmem:[#allocation4 + $0x188] sm:$0xff] %vm4461_vm6, %v5041_v47  ;;  %4423 = vrot.lane.b32.xlu1 %v4778_v11, %s7905_s22 }
 0x3a0   : > { %4873 = vrot.lane.b32.xlu0 %v9735_v8, %s7906_s23 }
 0x3a1   : > { %v4593_v62 = vpop.permute.xlu1 %4592 }
 0x3a2   : > { %4672 = vst.msk [vmem:[#allocation4 + $0x198] sm:$0xff] %vm4654_vm7, %v4593_v62  ;;  %v5233_v16 = vpop.permute.xlu0 %5232 }
 0x3a3   : > { %5312 = vst.msk [vmem:[#allocation4 + $0x188] sm:$0xff] %vm4654_vm7, %v5233_v16  ;;  %4610 = vrot.lane.b32.xlu1 %v9713_v32, %s7907_s29 }
 0x3a4   : > { %5060 = vrot.lane.b32.xlu0 %v9740_v29, %s7905_s22 }
 0x3a5   : > { %v4209_v30 = vpop.permute.xlu1 %4208  ;;  %v5440_v41 = vld [vmem:[#allocation4 + $0x180] sm:$0xff] }
 0x3a6   : > { %4287 = vst.msk [vmem:[#allocation4 + $0x1b0] sm:$0xff] %vm4268_vm5, %v4209_v30  ;;  %v5043_v38 = vpop.permute.xlu0 %5042 }
 0x3a7   : > { %5121 = vst.msk [vmem:[#allocation4 + $0x1a0] sm:$0xff] %vm4461_vm6, %v5043_v38  ;;  %4612 = vrot.lane.b32.xlu1 %v9717_v34, %s7907_s29 }
 0x3a8   : > { %5313 = vst.msk [vmem:[#allocation4 + $0x1a0] sm:$0xff] %vm4654_vm7, %v5235_v28  ;;  %5252 = vrot.lane.b32.xlu0 %v9742_v43, %s7907_s29 }
 0x3a9   : > { %v4402_v50 = vpop.permute.xlu1 %4401  ;;  %v5443_v39 = vld [vmem:[#allocation4 + $0x198] sm:$0xff] }
 0x3aa   : > { %4480 = vst.msk [vmem:[#allocation4 + $0x1b0] sm:$0xff] %vm4461_vm6, %v4402_v50  ;;  %v4852_v32 = vpop.permute.xlu0 %4851  ;;  %v5441_v51 = vld [vmem:[#allocation4 + $0x188] sm:$0xff] }
 0x3ab   : > { %4929 = vst.msk [vmem:[#allocation4 + $0x1b8] sm:$0xff] %vm4268_vm5, %v4852_v32  ;;  %5764 = vmatprep.mubr.f32.mxu1 %v5441_v51  ;;  %4228 = vrot.lane.b32.xlu1 %v9715_v1, %s7906_s23 }
 0x3ac   : > { %5765 = vmatmul.mubr.f32.gmra.mrb[64].mxu1 %v5440_v41  ;;  %5062 = vrot.lane.b32.xlu0 %v9744_v9, %s7905_s22 }
 0x3ad   : > { %v4215_v34 = vpop.permute.xlu1 %4214 }
 0x3ae   : > { %4290 = vst.msk [vmem:[#allocation4 + $0x1f8] sm:$0xff] %vm4268_vm5, %v4215_v34  ;;  %v5239_v4 = vpop.permute.xlu0 %5238 }
 0x3af   : > { %v5444_v33 = vld [vmem:[#allocation4 + $0x1a0] sm:$0xff]  ;;  %4421 = vrot.lane.b32.xlu1 %v9723_v61, %s7905_s22 }
 0x3b0   : > { %5769 = vmatprep.mubr.f32.mxu1 %v5444_v33  ;;  %4871 = vrot.lane.b32.xlu0 %v9750_v35, %s7906_s23 }
 0x3b1   : > { %5770 = vmatmul.mubr.f32.gmra.mrb[66].mxu1 %v5443_v39  ;;  %v4408_v63 = vpop.permute.xlu1 %4407 }
 0x3b2   : > { %4483 = vst.msk [vmem:[#allocation4 + $0x1f8] sm:$0xff] %vm4461_vm6, %v4408_v63  ;;  %v4858_v1 = vpop.permute.xlu0 %4857 }
 0x3b3   : > { %4932 = vst.msk [vmem:[#allocation4 + $0x200] sm:$0xff] %vm4268_vm5, %v4858_v1  ;;  %4234 = vrot.lane.b32.xlu1 %v9733_v24, %s7906_s23  ;;  %v4972_v24 = vld [vmem:[#allocation3 + $0x180] sm:$0xff] }
 0x3b4   : > { %5258 = vrot.lane.b32.xlu0 %v9760_v0, %s7907_s29 }
 0x3b5   : > { %v4595_v19 = vpop.permute.xlu1 %4594 }
 0x3b6   : > { %4673 = vst.msk [vmem:[#allocation4 + $0x1b0] sm:$0xff] %vm4654_vm7, %v4595_v19  ;;  %v5045_v61 = vpop.permute.xlu0 %5044 }
 0x3b7   : > { %5122 = vst.msk [vmem:[#allocation4 + $0x1b8] sm:$0xff] %vm4461_vm6, %v5045_v61  ;;  %4614 = vrot.lane.b32.xlu1 %v9740_v29, %s7907_s29 }
 0x3b8   : > { %4877 = vrot.lane.b32.xlu0 %v9762_v36, %s7906_s23 }
 0x3b9   : > { %v4597_v54 = vpop.permute.xlu1 %4596 }
 0x3ba   : > { %4674 = vst.msk [vmem:[#allocation4 + $0x1c8] sm:$0xff] %vm4654_vm7, %v4597_v54  ;;  %v5237_v44 = vpop.permute.xlu0 %5236 }
 0x3bb   : > { %5314 = vst.msk [vmem:[#allocation4 + $0x1b8] sm:$0xff] %vm4654_vm7, %v5237_v44  ;;  %4616 = vrot.lane.b32.xlu1 %v9744_v9, %s7907_s29 }
 0x3bc   : > { %5064 = vrot.lane.b32.xlu0 %v4972_v24, %s7905_s22 }
 0x3bd   : > { %v4213_v0 = vpop.permute.xlu1 %4212  ;;  %v5446_v15 = vld [vmem:[#allocation4 + $0x1b0] sm:$0xff] }
 0x3be   : > { %4289 = vst.msk [vmem:[#allocation4 + $0x1e0] sm:$0xff] %vm4268_vm5, %v4213_v0  ;;  %v5047_v23 = vpop.permute.xlu0 %5046 }
 0x3bf   : > { %5123 = vst.msk [vmem:[#allocation4 + $0x1d0] sm:$0xff] %vm4461_vm6, %v5047_v23  ;;  %4232 = vrot.lane.b32.xlu1 %v9742_v43, %s7906_s23  ;;  %v5358_v23 = vld [vmem:[#allocation3 + $0x19a] sm:$0xff] }
 0x3c0   : > { %5315 = vst.msk [vmem:[#allocation4 + $0x1d0] sm:$0xff] %vm4654_vm7, %v5239_v4  ;;  %5256 = vrot.lane.b32.xlu0 %v9768_v26, %s7907_s29 }
 0x3c1   : > { %v4406_v29 = vpop.permute.xlu1 %4405  ;;  %v5449_v45 = vld [vmem:[#allocation4 + $0x1c8] sm:$0xff]  ;;  %5390 = vst.msk [vmem:[#allocation4 + $0x2e0] sm:$0xff] %vm3955_vm3, %v5358_v23 }
 0x3c2   : > { %4482 = vst.msk [vmem:[#allocation4 + $0x1e0] sm:$0xff] %vm4461_vm6, %v4406_v29  ;;  %v4856_v9 = vpop.permute.xlu0 %4855  ;;  %v5447_v36 = vld [vmem:[#allocation4 + $0x1b8] sm:$0xff] }
 0x3c3   : > { %4931 = vst.msk [vmem:[#allocation4 + $0x1e8] sm:$0xff] %vm4268_vm5, %v4856_v9  ;;  %5774 = vmatprep.mubr.f32.mxu1 %v5447_v36  ;;  %4425 = vrot.lane.b32.xlu1 %v9750_v35, %s7905_s22  ;;  %v4975_v35 = vld [vmem:[#allocation3 + $0x1a0] sm:$0xff] }
 0x3c4   : > { %5775 = vmatmul.mubr.f32.gmra.mrb[68].mxu1 %v5446_v15  ;;  %5066 = vrot.lane.b32.xlu0 %v4973_v57, %s7905_s22  ;;  %v5359_v9 = vld [vmem:[#allocation3 + $0x1a2] sm:$0xff] }
 0x3c5   : > { %v4219_v43 = vpop.permute.xlu1 %4218  ;;  %5391 = vst.msk [vmem:[#allocation4 + $0x2f8] sm:$0xff] %vm3955_vm3, %v5359_v9 }
 0x3c6   : > { %4292 = vst.msk [vmem:[#allocation4 + $0x228] sm:$0xff] %vm4268_vm5, %v4219_v43  ;;  %v5243_v26 = vpop.permute.xlu0 %5242 }
 0x3c7   : > { %v5450_v48 = vld [vmem:[#allocation4 + $0x1d0] sm:$0xff]  ;;  %4427 = vrot.lane.b32.xlu1 %v9735_v8, %s7905_s22 }
 0x3c8   : > { %5779 = vmatprep.mubr.f32.mxu1 %v5450_v48  ;;  %4875 = vrot.lane.b32.xlu0 %v9774_v12, %s7906_s23  ;;  %s7844_s23 = sshll.u32 %s7909_s20, 4  ;;  %s7845_s23 = int_to_ptr.vmem [resolvable:$false] %s7844_s23 }
 0x3c9   : > { %5780 = vmatmul.mubr.f32.gmra.mrb[70].mxu1 %v5449_v45  ;;  %v4412_v27 = vpop.permute.xlu1 %4411 }
 0x3ca   : > { %4485 = vst.msk [vmem:[#allocation4 + $0x228] sm:$0xff] %vm4461_vm6, %v4412_v27  ;;  %v4862_v52 = vpop.permute.xlu0 %4861 }
 0x3cb   : > { %4934 = vst.msk [vmem:[#allocation4 + $0x230] sm:$0xff] %vm4268_vm5, %v4862_v52  ;;  %4618 = vrot.lane.b32.xlu1 %v4972_v24, %s7907_s29 }
 0x3cc   : > { %5070 = vrot.lane.b32.xlu0 %v4975_v35, %s7905_s22  ;;  %s269_s22 = sand.u32 1, %s7894_s25  }
 0x3cd   : > { %v4599_v53 = vpop.permute.xlu1 %4598  ;;  %s6292_s9 = sshll.u32 %s269_s22, 8  ;;  %s10531_s28 = scalar_lea.sflag [#allocation6], %s269_s22 }
 0x3ce   : > { %4675 = vst.msk [vmem:[#allocation4 + $0x1e0] sm:$0xff] %vm4654_vm7, %v4599_v53  ;;  %v5049_v8 = vpop.permute.xlu0 %5048  ;;  %s10368_s13 = scalar_lea.vmem [#allocation5], %s6292_s9 }
 0x3cf   : > { %5124 = vst.msk [vmem:[#allocation4 + $0x1e8] sm:$0xff] %vm4461_vm6, %v5049_v8  ;;  %4620 = vrot.lane.b32.xlu1 %v4973_v57, %s7907_s29  ;;  %s6226_s15 = sshll.u32 %s10368_s13, 4  ;;  %s10523_s15 = int_to_ptr.vmem [resolvable:$true] %s6226_s15 }
 0x3d0   : > { %v10182_v12 = vpop.f32.mrb[32].mxu1  ;;  %5262 = vrot.lane.b32.xlu0 %v5167_v56, %s7907_s29  ;;  %s7840_s19 = scalar_lea.vmem %s10523_s15, 4096  ;;  %s7846_s29 = scalar_lea.vmem %s7845_s23, 8192 }
 0x3d1   : > { %v5688_v58 = vpop.f32.mrb[33].mxu1  ;;  %v4601_v40 = vpop.permute.xlu1 %4600  ;;  %p7841_p11 = scmp.ne.s32.totalorder %s10523_s15, %s7840_s19  ;;  %p7847_p0 = scmp.lt.s32.totalorder %s10523_s15, %s7845_s23 }
 0x3d2   : > { %4676 = vst.msk [vmem:[#allocation4 + $0x1f8] sm:$0xff] %vm4654_vm7, %v4601_v40  ;;  %v5241_v14 = vpop.permute.xlu0 %5240  ;;  %p7848_p1 = scmp.lt.s32.totalorder %s7846_s29, %s7840_s19 }
 0x3d3   : > { %5316 = vst.msk [vmem:[#allocation4 + $0x1e8] sm:$0xff] %vm4654_vm7, %v5241_v14  ;;  %p7842_p12 = pnand %p7841_p11, %p7990_p5 }
 0x3d4   : > { %v10188_v10 = vpop.f32.mrb[34].mxu1  ;;  %p7849_p2 = por %p7848_p1, %p7847_p0 }
 0x3d5   : > { %v5693_v60 = vpop.f32.mrb[35].mxu1  ;;  %v4217_v11 = vpop.permute.xlu1 %4216  ;;  %v5452_v20 = vld [vmem:[#allocation4 + $0x1e0] sm:$0xff]  ;;  %p7843_p13 = pneg %p7842_p12 }
 0x3d6   : > { %4291 = vst.msk [vmem:[#allocation4 + $0x210] sm:$0xff] %vm4268_vm5, %v4217_v11  ;;  %v5051_v18 = vpop.permute.xlu0 %5050 }
 0x3d7   : > { %5125 = vst.msk [vmem:[#allocation4 + $0x200] sm:$0xff] %vm4461_vm6, %v5051_v18  ;;  %p7850_p3 = pnand %p7849_p2, %p7843_p13 }
 0x3d8   : > { %v10192_v59 = vpop.f32.mrb[36].mxu1  ;;  %5317 = vst.msk [vmem:[#allocation4 + $0x200] sm:$0xff] %vm4654_vm7, %v5243_v26 }
 0x3d9   : > { %v5698_v42 = vpop.f32.mrb[37].mxu1  ;;  %v4410_v3 = vpop.permute.xlu1 %4409  ;;  %v5455_v28 = vld [vmem:[#allocation4 + $0x1f8] sm:$0xff] }
 0x3da   : > { %4484 = vst.msk [vmem:[#allocation4 + $0x210] sm:$0xff] %vm4461_vm6, %v4410_v3  ;;  %v4860_v13 = vpop.permute.xlu0 %4859  ;;  %v5453_v17 = vld [vmem:[#allocation4 + $0x1e8] sm:$0xff] }
 0x3db   : > { %4933 = vst.msk [vmem:[#allocation4 + $0x218] sm:$0xff] %vm4268_vm5, %v4860_v13  ;;  %5784 = vmatprep.mubr.f32.mxu1 %v5453_v17 }
 0x3dc   : > { %v10197_v31 = vpop.f32.mrb[38].mxu1  ;;  %5785 = vmatmul.mubr.f32.gmra.mrb[72].mxu1 %v5452_v20 }
 0x3dd   : > { %v5703_v22 = vpop.f32.mrb[39].mxu1  ;;  %v4223_v55 = vpop.permute.xlu1 %4222 }
 0x3de   : > { %4294 = vst.msk [vmem:[#allocation4 + $0x258] sm:$0xff] %vm4268_vm5, %v4223_v55  ;;  %v5247_v25 = vpop.permute.xlu0 %5246 }
 0x3df   : > { %v5456_v49 = vld [vmem:[#allocation4 + $0x200] sm:$0xff] }
 0x3e0   : > { %5789 = vmatprep.mubr.f32.mxu1 %v5456_v49 }
 0x3e1   : > { %5790 = vmatmul.mubr.f32.gmra.mrb[74].mxu1 %v5455_v28  ;;  %v4416_v21 = vpop.permute.xlu1 %4415 }
 0x3e2   : > { %4487 = vst.msk [vmem:[#allocation4 + $0x258] sm:$0xff] %vm4461_vm6, %v4416_v21  ;;  %v4866_v2 = vpop.permute.xlu0 %4865 }
 0x3e3   : > { %4936 = vst.msk [vmem:[#allocation4 + $0x260] sm:$0xff] %vm4268_vm5, %v4866_v2 }
 0x3e5   : > { %v4603_v5 = vpop.permute.xlu1 %4602 }
 0x3e6   : > { %4677 = vst.msk [vmem:[#allocation4 + $0x210] sm:$0xff] %vm4654_vm7, %v4603_v5  ;;  %v5053_v7 = vpop.permute.xlu0 %5052 }
 0x3e7   : > { %5126 = vst.msk [vmem:[#allocation4 + $0x218] sm:$0xff] %vm4461_vm6, %v5053_v7 }
 0x3e9   : > { %v4605_v37 = vpop.permute.xlu1 %4604 }
 0x3ea   : > { %4678 = vst.msk [vmem:[#allocation4 + $0x228] sm:$0xff] %vm4654_vm7, %v4605_v37  ;;  %v5245_v47 = vpop.permute.xlu0 %5244 }
 0x3eb   : > { %5318 = vst.msk [vmem:[#allocation4 + $0x218] sm:$0xff] %vm4654_vm7, %v5245_v47 }
 0x3ed   : > { %v4221_v62 = vpop.permute.xlu1 %4220  ;;  %v5458_v34 = vld [vmem:[#allocation4 + $0x210] sm:$0xff] }
 0x3ee   : > { %4293 = vst.msk [vmem:[#allocation4 + $0x240] sm:$0xff] %vm4268_vm5, %v4221_v62  ;;  %v5055_v16 = vpop.permute.xlu0 %5054  ;;  %v10207_v30 = vpop.f32.mrb[40].mxu1 }
 0x3ef   : > { %5127 = vst.msk [vmem:[#allocation4 + $0x230] sm:$0xff] %vm4461_vm6, %v5055_v16  ;;  %v5708_v38 = vpop.f32.mrb[41].mxu1 }
 0x3f0   : > { %5319 = vst.msk [vmem:[#allocation4 + $0x230] sm:$0xff] %vm4654_vm7, %v5247_v25 }
 0x3f1   : > { %v4414_v50 = vpop.permute.xlu1 %4413  ;;  %v5461_v1 = vld [vmem:[#allocation4 + $0x228] sm:$0xff] }
 0x3f2   : > { %4486 = vst.msk [vmem:[#allocation4 + $0x240] sm:$0xff] %vm4461_vm6, %v4414_v50  ;;  %v4864_v32 = vpop.permute.xlu0 %4863  ;;  %v5459_v51 = vld [vmem:[#allocation4 + $0x218] sm:$0xff] }
 0x3f3   : > { %4935 = vst.msk [vmem:[#allocation4 + $0x248] sm:$0xff] %vm4268_vm5, %v4864_v32  ;;  %5794 = vmatprep.mubr.f32.mxu1 %v5459_v51 }
 0x3f4   : > { %v10213_v41 = vpop.f32.mrb[42].mxu1  ;;  %5795 = vmatmul.mubr.f32.gmra.mrb[76].mxu1 %v5458_v34 }
 0x3f5   : > { %v5713_v4 = vpop.f32.mrb[43].mxu1  ;;  %v4227_v33 = vpop.permute.xlu1 %4226 }
 0x3f6   : > { %4296 = vst.msk [vmem:[#allocation4 + $0x288] sm:$0xff] %vm4268_vm5, %v4227_v33  ;;  %v5251_v39 = vpop.permute.xlu0 %5250 }
 0x3f7   : > { %v5462_v63 = vld [vmem:[#allocation4 + $0x230] sm:$0xff] }
 0x3f8   : > { %5799 = vmatprep.mubr.f32.mxu1 %v5462_v63 }
 0x3f9   : > { %5800 = vmatmul.mubr.f32.gmra.mrb[78].mxu1 %v5461_v1  ;;  %v4420_v19 = vpop.permute.xlu1 %4419 }
 0x3fa   : > { %4489 = vst.msk [vmem:[#allocation4 + $0x288] sm:$0xff] %vm4461_vm6, %v4420_v19  ;;  %v4870_v61 = vpop.permute.xlu0 %4869 }
 0x3fb   : > { %4938 = vst.msk [vmem:[#allocation4 + $0x290] sm:$0xff] %vm4268_vm5, %v4870_v61 }
 0x3fd   : > { %v4607_v54 = vpop.permute.xlu1 %4606 }
 0x3fe   : > { %4679 = vst.msk [vmem:[#allocation4 + $0x240] sm:$0xff] %vm4654_vm7, %v4607_v54  ;;  %v5057_v44 = vpop.permute.xlu0 %5056 }
 0x3ff   : > { %5128 = vst.msk [vmem:[#allocation4 + $0x248] sm:$0xff] %vm4461_vm6, %v5057_v44 }
 0x401   : > { %v4609_v24 = vpop.permute.xlu1 %4608 }
 0x402   : > { %4680 = vst.msk [vmem:[#allocation4 + $0x258] sm:$0xff] %vm4654_vm7, %v4609_v24  ;;  %v5249_v0 = vpop.permute.xlu0 %5248 }
 0x403   : > { %5320 = vst.msk [vmem:[#allocation4 + $0x248] sm:$0xff] %vm4654_vm7, %v5249_v0 }
 0x405   : > { %v4225_v29 = vpop.permute.xlu1 %4224  ;;  %v5464_v27 = vld [vmem:[#allocation4 + $0x240] sm:$0xff] }
 0x406   : > { %4295 = vst.msk [vmem:[#allocation4 + $0x270] sm:$0xff] %vm4268_vm5, %v4225_v29  ;;  %v5059_v36 = vpop.permute.xlu0 %5058  ;;  %v10224_v15 = vpop.f32.mrb[44].mxu1 }
 0x407   : > { %5129 = vst.msk [vmem:[#allocation4 + $0x260] sm:$0xff] %vm4461_vm6, %v5059_v36  ;;  %v5718_v57 = vpop.f32.mrb[45].mxu1 }
 0x408   : > { %5321 = vst.msk [vmem:[#allocation4 + $0x260] sm:$0xff] %vm4654_vm7, %v5251_v39  ;;  %v5394_v57 = vld [vmem:[#allocation4 + $0x10] sm:$0xff] }
 0x409   : > { %v4418_v43 = vpop.permute.xlu1 %4417  ;;  %v5467_v8 = vld [vmem:[#allocation4 + $0x258] sm:$0xff] }
 0x40a   : > { %4488 = vst.msk [vmem:[#allocation4 + $0x270] sm:$0xff] %vm4461_vm6, %v4418_v43  ;;  %v4868_v26 = vpop.permute.xlu0 %4867  ;;  %v5465_v48 = vld [vmem:[#allocation4 + $0x248] sm:$0xff] }
 0x40b   : > { %4937 = vst.msk [vmem:[#allocation4 + $0x278] sm:$0xff] %vm4268_vm5, %v4868_v26  ;;  %5804 = vmatprep.mubr.f32.mxu1 %v5465_v48  ;;  %v5397_v26 = vld [vmem:[#allocation4 + $0x28] sm:$0xff] }
 0x40c   : > { %v10231_v45 = vpop.f32.mrb[46].mxu1  ;;  %5805 = vmatmul.mubr.f32.gmra.mrb[80].mxu1 %v5464_v27  ;;  %v5400_v27 = vld [vmem:[#allocation4 + $0x40] sm:$0xff] }
 0x40d   : > { %v5723_v35 = vpop.f32.mrb[47].mxu1  ;;  %v4231_v52 = vpop.permute.xlu1 %4230 }
 0x40e   : > { %4298 = vst.msk [vmem:[#allocation4 + $0x2b8] sm:$0xff] %vm4268_vm5, %v4231_v52  ;;  %v5255_v53 = vpop.permute.xlu0 %5254  ;;  %v5403_v35 = vld [vmem:[#allocation4 + $0x58] sm:$0xff] }
 0x40f   : > { %v5468_v56 = vld [vmem:[#allocation4 + $0x260] sm:$0xff] }
 0x410   : > { %5809 = vmatprep.mubr.f32.mxu1 %v5468_v56 }
 0x411   : > { %5810 = vmatmul.mubr.f32.gmra.mrb[82].mxu1 %v5467_v8  ;;  %v4424_v58 = vpop.permute.xlu1 %4423  ;;  %v5409_v8 = vld [vmem:[#allocation4 + $0x88] sm:$0xff] }
 0x412   : > { %4491 = vst.msk [vmem:[#allocation4 + $0x2b8] sm:$0xff] %vm4461_vm6, %v4424_v58  ;;  %v4874_v40 = vpop.permute.xlu0 %4873  ;;  %v5412_v58 = vld [vmem:[#allocation4 + $0xa0] sm:$0xff] }
 0x413   : > { %4940 = vst.msk [vmem:[#allocation4 + $0x2c0] sm:$0xff] %vm4268_vm5, %v4874_v40  ;;  %v5415_v40 = vld [vmem:[#allocation4 + $0xb8] sm:$0xff] }
 0x415   : > { %v4611_v14 = vpop.permute.xlu1 %4610 }
 0x416   : > { %4681 = vst.msk [vmem:[#allocation4 + $0x270] sm:$0xff] %vm4654_vm7, %v4611_v14  ;;  %v5061_v60 = vpop.permute.xlu0 %5060  ;;  %v5418_v14 = vld [vmem:[#allocation4 + $0xd0] sm:$0xff] }
 0x417   : > { %5130 = vst.msk [vmem:[#allocation4 + $0x278] sm:$0xff] %vm4461_vm6, %v5061_v60  ;;  %v5421_v60 = vld [vmem:[#allocation4 + $0xe8] sm:$0xff] }
 0x419   : > { %v4613_v11 = vpop.permute.xlu1 %4612 }
 0x41a   : > { %4682 = vst.msk [vmem:[#allocation4 + $0x288] sm:$0xff] %vm4654_vm7, %v4613_v11  ;;  %v5253_v18 = vpop.permute.xlu0 %5252  ;;  %v5424_v11 = vld [vmem:[#allocation4 + $0x100] sm:$0xff] }
 0x41b   : > { %5322 = vst.msk [vmem:[#allocation4 + $0x278] sm:$0xff] %vm4654_vm7, %v5253_v18  ;;  %v5427_v18 = vld [vmem:[#allocation4 + $0x118] sm:$0xff] }
 0x41d   : > { %v4229_v42 = vpop.permute.xlu1 %4228  ;;  %v5470_v49 = vld [vmem:[#allocation4 + $0x270] sm:$0xff] }
 0x41e   : > { %4297 = vst.msk [vmem:[#allocation4 + $0x2a0] sm:$0xff] %vm4268_vm5, %v4229_v42  ;;  %v5063_v3 = vpop.permute.xlu0 %5062  ;;  %v10241_v13 = vpop.f32.mrb[48].mxu1  ;;  %v5430_v42 = vld [vmem:[#allocation4 + $0x130] sm:$0xff] }
 0x41f   : > { %5131 = vst.msk [vmem:[#allocation4 + $0x290] sm:$0xff] %vm4461_vm6, %v5063_v3  ;;  %v5728_v17 = vpop.f32.mrb[49].mxu1 }
 0x420   : > { %5323 = vst.msk [vmem:[#allocation4 + $0x290] sm:$0xff] %vm4654_vm7, %v5255_v53  ;;  %v5406_v53 = vld [vmem:[#allocation4 + $0x70] sm:$0xff]  ;;  %v5433_v17 = vld [vmem:[#allocation4 + $0x148] sm:$0xff] }
 0x421   : > { %v4422_v20 = vpop.permute.xlu1 %4421  ;;  %v5473_v7 = vld [vmem:[#allocation4 + $0x288] sm:$0xff] }
 0x422   : > { %4490 = vst.msk [vmem:[#allocation4 + $0x2a0] sm:$0xff] %vm4461_vm6, %v4422_v20  ;;  %v4872_v22 = vpop.permute.xlu0 %4871  ;;  %v5471_v55 = vld [vmem:[#allocation4 + $0x278] sm:$0xff] }
 0x423   : > { %4939 = vst.msk [vmem:[#allocation4 + $0x2a8] sm:$0xff] %vm4268_vm5, %v4872_v22  ;;  %5814 = vmatprep.mubr.f32.mxu1 %v5471_v55  ;;  %v5436_v22 = vld [vmem:[#allocation4 + $0x160] sm:$0xff]  ;;  %v5439_v55 = vld [vmem:[#allocation4 + $0x178] sm:$0xff] }
 0x424   : > { %v10247_v25 = vpop.f32.mrb[50].mxu1  ;;  %5815 = vmatmul.mubr.f32.gmra.mrb[84].mxu1 %v5470_v49 }
 0x425   : > { %v5733_v28 = vpop.f32.mrb[51].mxu1  ;;  %v4235_v21 = vpop.permute.xlu1 %4234 }
 0x426   : > { %4300 = vst.msk [vmem:[#allocation4 + $0x2e8] sm:$0xff] %vm4268_vm5, %v4235_v21  ;;  %v5259_v2 = vpop.permute.xlu0 %5258  ;;  %v5442_v28 = vld [vmem:[#allocation4 + $0x190] sm:$0xff] }
 0x427   : > { %v5474_v5 = vld [vmem:[#allocation4 + $0x290] sm:$0xff] }
 0x428   : > { %5819 = vmatprep.mubr.f32.mxu1 %v5474_v5  ;;  %v5448_v5 = vld [vmem:[#allocation4 + $0x1c0] sm:$0xff] }
 0x429   : > { %5820 = vmatmul.mubr.f32.gmra.mrb[86].mxu1 %v5473_v7  ;;  %v4615_v37 = vpop.permute.xlu1 %4614  ;;  %v5451_v7 = vld [vmem:[#allocation4 + $0x1d8] sm:$0xff] }
 0x42a   : > { %4683 = vst.msk [vmem:[#allocation4 + $0x2a0] sm:$0xff] %vm4654_vm7, %v4615_v37  ;;  %v4878_v47 = vpop.permute.xlu0 %4877  ;;  %v5454_v37 = vld [vmem:[#allocation4 + $0x1f0] sm:$0xff] }
 0x42b   : > { %4942 = vst.msk [vmem:[#allocation4 + $0x2f0] sm:$0xff] %vm4268_vm5, %v4878_v47  ;;  %v5457_v47 = vld [vmem:[#allocation4 + $0x208] sm:$0xff] }
 0x42d   : > { %v4617_v62 = vpop.permute.xlu1 %4616 }
 0x42e   : > { %4684 = vst.msk [vmem:[#allocation4 + $0x2b8] sm:$0xff] %vm4654_vm7, %v4617_v62  ;;  %v5065_v16 = vpop.permute.xlu0 %5064  ;;  %v5460_v62 = vld [vmem:[#allocation4 + $0x220] sm:$0xff] }
 0x42f   : > { %5132 = vst.msk [vmem:[#allocation4 + $0x2a8] sm:$0xff] %vm4461_vm6, %v5065_v16  ;;  %v5463_v16 = vld [vmem:[#allocation4 + $0x238] sm:$0xff] }
 0x431   : > { %v4233_v38 = vpop.permute.xlu1 %4232  ;;  %v5476_v19 = vld [vmem:[#allocation4 + $0x2a0] sm:$0xff] }
 0x432   : > { %4299 = vst.msk [vmem:[#allocation4 + $0x2d0] sm:$0xff] %vm4268_vm5, %v4233_v38  ;;  %v5257_v50 = vpop.permute.xlu0 %5256  ;;  %v5466_v38 = vld [vmem:[#allocation4 + $0x250] sm:$0xff] }
 0x433   : > { %5324 = vst.msk [vmem:[#allocation4 + $0x2a8] sm:$0xff] %vm4654_vm7, %v5257_v50 }
 0x435   : > { %v4426_v32 = vpop.permute.xlu1 %4425  ;;  %v5479_v0 = vld [vmem:[#allocation4 + $0x2b8] sm:$0xff] }
 0x436   : > { %4492 = vst.msk [vmem:[#allocation4 + $0x2d0] sm:$0xff] %vm4461_vm6, %v4426_v32  ;;  %v5067_v51 = vpop.permute.xlu0 %5066  ;;  %v10257_v34 = vpop.f32.mrb[52].mxu1  ;;  %v5469_v32 = vld [vmem:[#allocation4 + $0x268] sm:$0xff] }
 0x437   : > { %5133 = vst.msk [vmem:[#allocation4 + $0x2c0] sm:$0xff] %vm4461_vm6, %v5067_v51  ;;  %v5738_v4 = vpop.f32.mrb[53].mxu1 }
 0x438   : > { %5325 = vst.msk [vmem:[#allocation4 + $0x2c0] sm:$0xff] %vm4654_vm7, %v5259_v2  ;;  %v5445_v2 = vld [vmem:[#allocation4 + $0x1a8] sm:$0xff]  ;;  %v5472_v4 = vld [vmem:[#allocation4 + $0x280] sm:$0xff] }
 0x439   : > { %v4428_v33 = vpop.permute.xlu1 %4427 }
 0x43a   : > { %4493 = vst.msk [vmem:[#allocation4 + $0x2e8] sm:$0xff] %vm4461_vm6, %v4428_v33  ;;  %v4876_v39 = vpop.permute.xlu0 %4875  ;;  %v5477_v63 = vld [vmem:[#allocation4 + $0x2a8] sm:$0xff]  ;;  %v5475_v33 = vld [vmem:[#allocation4 + $0x298] sm:$0xff] }
 0x43b   : > { %4941 = vst.msk [vmem:[#allocation4 + $0x2d8] sm:$0xff] %vm4268_vm5, %v4876_v39  ;;  %5824 = vmatprep.mubr.f32.mxu1 %v5477_v63  ;;  %v5478_v63 = vld [vmem:[#allocation4 + $0x2b0] sm:$0xff] }
 0x43c   : > { %v10263_v1 = vpop.f32.mrb[54].mxu1  ;;  %5134 = vst.msk [vmem:[#allocation4 + $0x2d8] sm:$0xff] %vm4461_vm6, %v9815_v6  ;;  %5825 = vmatmul.mubr.f32.gmra.mrb[88].mxu1 %v5476_v19 }
 0x43d   : > { %v5743_v61 = vpop.f32.mrb[55].mxu1  ;;  %5326 = vst.msk [vmem:[#allocation4 + $0x2d8] sm:$0xff] %vm4654_vm7, %v9823_v46  ;;  %v4619_v54 = vpop.permute.xlu1 %4618 }
 0x43e   : > { %v5071_v44 = vpop.permute.xlu0 %5070  ;;  %4685 = vst.msk [vmem:[#allocation4 + $0x2d0] sm:$0xff] %vm4654_vm7, %v4619_v54  ;;  %v5484_v61 = vld [vmem:[#allocation4 + $0x2e0] sm:$0xff]  ;;  %v5481_v54 = vld [vmem:[#allocation4 + $0x2c8] sm:$0xff] }
 0x43f   : > { %5135 = vst.msk [vmem:[#allocation4 + $0x2f0] sm:$0xff] %vm4461_vm6, %v5071_v44  ;;  %v5480_v24 = vld [vmem:[#allocation4 + $0x2c0] sm:$0xff]  ;;  %v5487_v44 = vld [vmem:[#allocation4 + $0x2f8] sm:$0xff] }
 0x440   : > { %5829 = vmatprep.mubr.f32.mxu1 %v5480_v24 }
 0x441   : > { %5830 = vmatmul.mubr.f32.gmra.mrb[90].mxu1 %v5479_v0  ;;  %v4621_v23 = vpop.permute.xlu1 %4620 }
 0x442   : > { %v5263_v29 = vpop.permute.xlu0 %5262  ;;  %4686 = vst.msk [vmem:[#allocation4 + $0x2e8] sm:$0xff] %vm4654_vm7, %v4621_v23 }
 0x443   : > { %5327 = vst.msk [vmem:[#allocation4 + $0x2f0] sm:$0xff] %vm4654_vm7, %v5263_v29 }
 0x444   : > { %v5483_v6 = vld [vmem:[#allocation4 + $0x2d8] sm:$0xff] }
 0x445   : > { %5834 = vmatprep.mubr.f32.mxu1 %v5483_v6  ;;  %v5482_v9 = vld [vmem:[#allocation4 + $0x2d0] sm:$0xff] }
 0x446   : > { %5835 = vmatmul.mubr.f32.gmra.mrb[92].mxu1 %v5482_v9 }
 0x449   : > { %v5485_v46 = vld [vmem:[#allocation4 + $0x2e8] sm:$0xff] }
 0x44a   : > { %v5486_v36 = vld [vmem:[#allocation4 + $0x2f0] sm:$0xff] }
 0x44b   : > { %5839 = vmatprep.mubr.f32.mxu1 %v5486_v36 }
 0x44c   : > { %5840 = vmatmul.mubr.f32.gmra.mrb[94].mxu1 %v5485_v46 }
 0x44d   : > { %7434 = vmatprep.mubr.msk.f32.mxu1 %vm3955_vm3, %v5394_v57 }
 0x44e   : > { %v10274_v43 = vpop.f32.mrb[56].mxu1 }
 0x44f   : > { %v5748_v48 = vpop.f32.mrb[57].mxu1 }
 0x450   : > { %7435 = vmatmul.mubr.msk.f32.vlgmr.msra.gmra.mrb[96].mxu1 %vm3955_vm3, %v5397_v26 }
 0x451   : > { %7437 = vmatprep.mubr.msk.f32.mxu1 %vm3955_vm3, %v5400_v27 }
 0x454   : > { %v10278_v52 = vpop.f32.mrb[58].mxu1  ;;  %7438 = vmatmul.mubr.msk.f32.gmra.mrb[98].mxu1 %vm3955_vm3, %v5403_v35 }
 0x455   : > { %v5753_v56 = vpop.f32.mrb[59].mxu1  ;;  %7440 = vmatprep.mubr.msk.f32.mxu1 %vm3955_vm3, %v5406_v53 }
 0x458   : > { %7441 = vmatmul.mubr.msk.f32.gmra.mrb[100].mxu1 %vm3955_vm3, %v5409_v8 }
 0x459   : > { %7443 = vmatprep.mubr.msk.f32.mxu1 %vm3955_vm3, %v5412_v58 }
 0x45c   : > { %7444 = vmatmul.mubr.msk.f32.gmra.mrb[102].mxu1 %vm3955_vm3, %v5415_v40 }
 0x45d   : > { %7446 = vmatprep.mubr.msk.f32.mxu1 %vm3955_vm3, %v5418_v14 }
 0x460   : > { %7447 = vmatmul.mubr.msk.f32.gmra.mrb[104].mxu1 %vm3955_vm3, %v5421_v60 }
 0x461   : > { %7449 = vmatprep.mubr.msk.f32.mxu1 %vm3955_vm3, %v5424_v11 }
 0x464   : > { %7450 = vmatmul.mubr.msk.f32.gmra.mrb[106].mxu1 %vm3955_vm3, %v5427_v18 }
 0x465   : > { %7452 = vmatprep.mubr.msk.f32.mxu1 %vm3955_vm3, %v5430_v42 }
 0x466   : > { %v10290_v3 = vpop.f32.mrb[60].mxu1 }
 0x467   : > { %v5758_v20 = vpop.f32.mrb[61].mxu1 }
 0x468   : > { %7453 = vmatmul.mubr.msk.f32.gmra.mrb[108].mxu1 %vm3955_vm3, %v5433_v17 }
 0x469   : > { %7455 = vmatprep.mubr.msk.f32.mxu1 %vm3955_vm3, %v5436_v22 }
 0x46c   : > { %v10294_v49 = vpop.f32.mrb[62].mxu1  ;;  %7456 = vmatmul.mubr.msk.f32.gmra.mrb[110].mxu1 %vm3955_vm3, %v5439_v55 }
 0x46d   : > { %v5763_v21 = vpop.f32.mrb[63].mxu1  ;;  %7458 = vmatprep.mubr.msk.f32.mxu1 %vm3955_vm3, %v5442_v28 }
 0x470   : > { %7459 = vmatmul.mubr.msk.f32.gmra.mrb[112].mxu1 %vm3955_vm3, %v5445_v2  ;;  %v10349_v2 = vld [vmem:[%s10577_s5] ss:$0 sm:$0xff] }
 0x471   : > { %7461 = vmatprep.mubr.msk.f32.mxu1 %vm3955_vm3, %v5448_v5 }
 0x474   : > { %7462 = vmatmul.mubr.msk.f32.gmra.mrb[114].mxu1 %vm3955_vm3, %v5451_v7 }
 0x475   : > { %7464 = vmatprep.mubr.msk.f32.mxu1 %vm3955_vm3, %v5454_v37  ;;  %v10355_v37 = vld [vmem:[%s10578_s6] ss:$0 sm:$0xff] }
 0x478   : > { %7465 = vmatmul.mubr.msk.f32.gmra.mrb[116].mxu1 %vm3955_vm3, %v5457_v47 }
 0x479   : > { %7467 = vmatprep.mubr.msk.f32.mxu1 %vm3955_vm3, %v5460_v62 }
 0x47c   : > { %7468 = vmatmul.mubr.msk.f32.gmra.mrb[118].mxu1 %vm3955_vm3, %v5463_v16 }
 0x47d   : > { %7470 = vmatprep.mubr.msk.f32.mxu1 %vm3955_vm3, %v5466_v38 }
 0x47f   : > { %v10306_v50 = vpop.f32.mrb[64].mxu1 }
 0x480   : > { %v5768_v51 = vpop.f32.mrb[65].mxu1  ;;  %7471 = vmatmul.mubr.msk.f32.gmra.mrb[120].mxu1 %vm3955_vm3, %v5469_v32 }
 0x481   : > { %7473 = vmatprep.mubr.msk.f32.mxu1 %vm3955_vm3, %v5472_v4 }
 0x484   : > { %v10310_v39 = vpop.f32.mrb[66].mxu1  ;;  %7474 = vmatmul.mubr.msk.f32.gmra.mrb[122].mxu1 %vm3955_vm3, %v5475_v33 }
 0x485   : > { %v5773_v19 = vpop.f32.mrb[67].mxu1  ;;  %7476 = vmatprep.mubr.msk.f32.mxu1 %vm3955_vm3, %v5478_v63 }
 0x488   : > { %7477 = vmatmul.mubr.msk.f32.gmra.mrb[124].mxu1 %vm3955_vm3, %v5481_v54 }
 0x489   : > { %7479 = vmatprep.mubr.msk.f32.mxu1 %vm3955_vm3, %v5484_v61 }
 0x48c   : > { %7480 = vmatmul.mubr.msk.f32.gmra.mrb[126].mxu1 %vm3955_vm3, %v5487_v44 }
 0x497   : > { %v10317_v24 = vpop.f32.mrb[68].mxu1 }
 0x498   : > { %v5778_v0 = vpop.f32.mrb[69].mxu1 }
 0x49c   : > { %v10319_v23 = vpop.f32.mrb[70].mxu1 }
 0x49d   : > { %v5783_v29 = vpop.f32.mrb[71].mxu1 }
 0x4af   : > { %v10321_v6 = vpop.f32.mrb[72].mxu1 }
 0x4b0   : > { %v5788_v9 = vpop.f32.mrb[73].mxu1 }
 0x4b4   : > { %v10323_v46 = vpop.f32.mrb[74].mxu1 }
 0x4b5   : > { %v5793_v36 = vpop.f32.mrb[75].mxu1 }
 0x4c7   : > { %v10325_v57 = vpop.f32.mrb[76].mxu1 }
 0x4c8   : > { %v5798_v26 = vpop.f32.mrb[77].mxu1 }
 0x4cc   : > { %v10327_v48 = vpop.f32.mrb[78].mxu1 }
 0x4cd   : > { %v5803_v27 = vpop.f32.mrb[79].mxu1 }
 0x4df   : > { %v10329_v35 = vpop.f32.mrb[80].mxu1 }
 0x4e0   : > { %v5808_v53 = vpop.f32.mrb[81].mxu1 }
 0x4e4   : > { %v10331_v56 = vpop.f32.mrb[82].mxu1 }
 0x4e5   : > { %v5813_v8 = vpop.f32.mrb[83].mxu1 }
 0x4f7   : > { %v10333_v58 = vpop.f32.mrb[84].mxu1 }
 0x4f8   : > { %v5818_v40 = vpop.f32.mrb[85].mxu1 }
 0x4fc   : > { %v10335_v14 = vpop.f32.mrb[86].mxu1 }
 0x4fd   : > { %v5823_v60 = vpop.f32.mrb[87].mxu1 }
 0x50f   : > { %v10337_v11 = vpop.f32.mrb[88].mxu1 }
 0x510   : > { %v5828_v18 = vpop.f32.mrb[89].mxu1 }
 0x514   : > { %v10339_v42 = vpop.f32.mrb[90].mxu1 }
 0x515   : > { %v5833_v17 = vpop.f32.mrb[91].mxu1 }
 0x519   : > { %v10341_v20 = vpop.f32.mrb[92].mxu1 }
 0x51a   : > { %v5838_v22 = vpop.f32.mrb[93].mxu1 }
 0x51f   : > { %v10343_v55 = vpop.f32.mrb[94].mxu1 }
 0x520   : > { %v5843_v28 = vpop.f32.mrb[95].mxu1 }
 0x523   : > { %v7436_v21 = vpop.f32.mrb[96].mxu1 }
 0x524   : > { %v5917_v5 = vadd.f32 %v7436_v21, %v10188_v10  ;;  %v5911_v7 = vpop.f32.mrb[97].mxu1 }
 0x525   : > { %v5912_v47 = vadd.f32 %v5911_v7, %v10182_v12 }
 0x526   : > { %v6078_v62 = vmul.f32 %v10349_v2, %v5917_v5 }
 0x527   : > { %v6077_v16 = vmul.f32 %v10349_v2, %v5912_v47  ;;  %v7439_v38 = vpop.f32.mrb[98].mxu1 }
 0x528   : > { %v6117_v32 = vadd.f32 %v10355_v37, %v6078_v62  ;;  %v5927_v51 = vadd.f32 %v7439_v38, %v10197_v31  ;;  %v5921_v10 = vpop.f32.mrb[99].mxu1 }
 0x529   : > { %v6116_v4 = vadd.f32 %v10355_v37, %v6077_v16  ;;  %v5922_v33 = vadd.f32 %v5921_v10, %v10192_v59 }
 0x52a   : > { %v6149_v63 = vmax.f32 %v6117_v32, 0.0  ;;  %v6080_v19 = vmul.f32 %v10349_v2, %v5927_v51 }
 0x52b   : > { %v6148_v12 = vmax.f32 %v6116_v4, 0.0  ;;  %v6079_v61 = vmul.f32 %v10349_v2, %v5922_v33  ;;  %v7442_v54 = vpop.f32.mrb[100].mxu1 }
 0x52c   : > { %6181 = vst.msk [vmem:[%s10368_s13 + $0x8] sm:$0xff] %vm3955_vm3, %v6149_v63  ;;  %v6119_v31 = vadd.f32 %v10355_v37, %v6080_v19  ;;  %v5937_v44 = vadd.f32 %v7442_v54, %v10213_v41  ;;  %v5931_v59 = vpop.f32.mrb[101].mxu1 }
 0x52d   : > { %6180 = vst.msk [vmem:[%s10368_s13] sm:$0xff] %vm3955_vm3, %v6148_v12  ;;  %v6118_v0 = vadd.f32 %v10355_v37, %v6079_v61  ;;  %v5932_v29 = vadd.f32 %v5931_v59, %v10207_v30 }
 0x52e   : > { %v6151_v9 = vmax.f32 %v6119_v31, 0.0  ;;  %v6082_v36 = vmul.f32 %v10349_v2, %v5937_v44 }
 0x52f   : > { %v6150_v26 = vmax.f32 %v6118_v0, 0.0  ;;  %v6081_v27 = vmul.f32 %v10349_v2, %v5932_v29  ;;  %v7445_v53 = vpop.f32.mrb[102].mxu1 }
 0x530   : > { %6183 = vst.msk [vmem:[%s10368_s13 + $0x18] sm:$0xff] %vm3955_vm3, %v6151_v9  ;;  %v6121_v41 = vadd.f32 %v10355_v37, %v6082_v36  ;;  %v5947_v8 = vadd.f32 %v7445_v53, %v10231_v45  ;;  %v5941_v40 = vpop.f32.mrb[103].mxu1 }
 0x531   : > { %6182 = vst.msk [vmem:[%s10368_s13 + $0x10] sm:$0xff] %vm3955_vm3, %v6150_v26  ;;  %v6120_v30 = vadd.f32 %v10355_v37, %v6081_v27  ;;  %v5942_v60 = vadd.f32 %v5941_v40, %v10224_v15 }
 0x532   : > { %v6153_v18 = vmax.f32 %v6121_v41, 0.0  ;;  %v6084_v17 = vmul.f32 %v10349_v2, %v5947_v8 }
 0x533   : > { %v6152_v22 = vmax.f32 %v6120_v30, 0.0  ;;  %v6083_v28 = vmul.f32 %v10349_v2, %v5942_v60  ;;  %v7448_v21 = vpop.f32.mrb[104].mxu1 }
 0x534   : > { %6185 = vst.msk [vmem:[%s10368_s13 + $0x28] sm:$0xff] %vm3955_vm3, %v6153_v18  ;;  %v6123_v45 = vadd.f32 %v10355_v37, %v6084_v17  ;;  %v5957_v5 = vadd.f32 %v7448_v21, %v10247_v25  ;;  %v5951_v7 = vpop.f32.mrb[105].mxu1 }
 0x535   : > { %6184 = vst.msk [vmem:[%s10368_s13 + $0x20] sm:$0xff] %vm3955_vm3, %v6152_v22  ;;  %v6122_v15 = vadd.f32 %v10355_v37, %v6083_v28  ;;  %v5952_v47 = vadd.f32 %v5951_v7, %v10241_v13 }
 0x536   : > { %v6155_v62 = vmax.f32 %v6123_v45, 0.0  ;;  %v6086_v16 = vmul.f32 %v10349_v2, %v5957_v5 }
 0x537   : > { %v6154_v38 = vmax.f32 %v6122_v15, 0.0  ;;  %v6085_v32 = vmul.f32 %v10349_v2, %v5952_v47  ;;  %v7451_v51 = vpop.f32.mrb[106].mxu1 }
 0x538   : > { %6187 = vst.msk [vmem:[%s10368_s13 + $0x38] sm:$0xff] %vm3955_vm3, %v6155_v62  ;;  %v6125_v25 = vadd.f32 %v10355_v37, %v6086_v16  ;;  %v5967_v10 = vadd.f32 %v7451_v51, %v10263_v1  ;;  %v5961_v4 = vpop.f32.mrb[107].mxu1 }
 0x539   : > { %6186 = vst.msk [vmem:[%s10368_s13 + $0x30] sm:$0xff] %vm3955_vm3, %v6154_v38  ;;  %v6124_v13 = vadd.f32 %v10355_v37, %v6085_v32  ;;  %v5962_v33 = vadd.f32 %v5961_v4, %v10257_v34 }
 0x53a   : > { %v6157_v63 = vmax.f32 %v6125_v25, 0.0  ;;  %v6088_v19 = vmul.f32 %v10349_v2, %v5967_v10 }
 0x53b   : > { %v6156_v12 = vmax.f32 %v6124_v13, 0.0  ;;  %v6087_v61 = vmul.f32 %v10349_v2, %v5962_v33  ;;  %v7454_v54 = vpop.f32.mrb[108].mxu1 }
 0x53c   : > { %6189 = vst.msk [vmem:[%s10368_s13 + $0x48] sm:$0xff] %vm3955_vm3, %v6157_v63  ;;  %v6127_v1 = vadd.f32 %v10355_v37, %v6088_v19  ;;  %v5977_v31 = vadd.f32 %v7454_v54, %v10278_v52  ;;  %v5971_v44 = vpop.f32.mrb[109].mxu1 }
 0x53d   : > { %6188 = vst.msk [vmem:[%s10368_s13 + $0x40] sm:$0xff] %vm3955_vm3, %v6156_v12  ;;  %v6126_v34 = vadd.f32 %v10355_v37, %v6087_v61  ;;  %v5972_v59 = vadd.f32 %v5971_v44, %v10274_v43 }
 0x53e   : > { %v6159_v0 = vmax.f32 %v6127_v1, 0.0  ;;  %v6090_v29 = vmul.f32 %v10349_v2, %v5977_v31 }
 0x53f   : > { %v6158_v9 = vmax.f32 %v6126_v34, 0.0  ;;  %v6089_v36 = vmul.f32 %v10349_v2, %v5972_v59  ;;  %v7457_v26 = vpop.f32.mrb[110].mxu1 }
 0x540   : > { %6191 = vst.msk [vmem:[%s10368_s13 + $0x58] sm:$0xff] %vm3955_vm3, %v6159_v0  ;;  %v6129_v52 = vadd.f32 %v10355_v37, %v6090_v29  ;;  %v5987_v27 = vadd.f32 %v7457_v26, %v10294_v49  ;;  %v5981_v53 = vpop.f32.mrb[111].mxu1 }
 0x541   : > { %6190 = vst.msk [vmem:[%s10368_s13 + $0x50] sm:$0xff] %vm3955_vm3, %v6158_v9  ;;  %v6128_v43 = vadd.f32 %v10355_v37, %v6089_v36  ;;  %v5982_v41 = vadd.f32 %v5981_v53, %v10290_v3 }
 0x542   : > { %v6161_v8 = vmax.f32 %v6129_v52, 0.0  ;;  %v6092_v40 = vmul.f32 %v10349_v2, %v5987_v27 }
 0x543   : > { %v6160_v30 = vmax.f32 %v6128_v43, 0.0  ;;  %v6091_v60 = vmul.f32 %v10349_v2, %v5982_v41  ;;  %v7460_v18 = vpop.f32.mrb[112].mxu1 }
 0x544   : > { %6193 = vst.msk [vmem:[%s10368_s13 + $0x68] sm:$0xff] %vm3955_vm3, %v6161_v8  ;;  %v6131_v49 = vadd.f32 %v10355_v37, %v6092_v40  ;;  %v5997_v17 = vadd.f32 %v7460_v18, %v10310_v39  ;;  %v5991_v22 = vpop.f32.mrb[113].mxu1 }
 0x545   : > { %6192 = vst.msk [vmem:[%s10368_s13 + $0x60] sm:$0xff] %vm3955_vm3, %v6160_v30  ;;  %v6130_v3 = vadd.f32 %v10355_v37, %v6091_v60  ;;  %v5992_v28 = vadd.f32 %v5991_v22, %v10306_v50 }
 0x546   : > { %v6163_v21 = vmax.f32 %v6131_v49, 0.0  ;;  %v6094_v45 = vmul.f32 %v10349_v2, %v5997_v17 }
 0x547   : > { %v6162_v5 = vmax.f32 %v6130_v3, 0.0  ;;  %v6093_v7 = vmul.f32 %v10349_v2, %v5992_v28  ;;  %v7463_v15 = vpop.f32.mrb[114].mxu1 }
 0x548   : > { %6195 = vst.msk [vmem:[%s10368_s13 + $0x78] sm:$0xff] %vm3955_vm3, %v6163_v21  ;;  %v6133_v39 = vadd.f32 %v10355_v37, %v6094_v45  ;;  %v6007_v47 = vadd.f32 %v7463_v15, %v10319_v23  ;;  %v6001_v62 = vpop.f32.mrb[115].mxu1 }
 0x549   : > { %6194 = vst.msk [vmem:[%s10368_s13 + $0x70] sm:$0xff] %vm3955_vm3, %v6162_v5  ;;  %v6132_v50 = vadd.f32 %v10355_v37, %v6093_v7  ;;  %v6002_v16 = vadd.f32 %v6001_v62, %v10317_v24 }
 0x54a   : > { %v6165_v38 = vmax.f32 %v6133_v39, 0.0  ;;  %v6096_v32 = vmul.f32 %v10349_v2, %v6007_v47 }
 0x54b   : > { %v6164_v51 = vmax.f32 %v6132_v50, 0.0  ;;  %v6095_v25 = vmul.f32 %v10349_v2, %v6002_v16  ;;  %v7466_v10 = vpop.f32.mrb[116].mxu1 }
 0x54c   : > { %6197 = vst.msk [vmem:[%s10368_s13 + $0x88] sm:$0xff] %vm3955_vm3, %v6165_v38  ;;  %v6135_v23 = vadd.f32 %v10355_v37, %v6096_v32  ;;  %v6017_v4 = vadd.f32 %v7466_v10, %v10323_v46  ;;  %v6011_v13 = vpop.f32.mrb[117].mxu1 }
 0x54d   : > { %6196 = vst.msk [vmem:[%s10368_s13 + $0x80] sm:$0xff] %vm3955_vm3, %v6164_v51  ;;  %v6134_v24 = vadd.f32 %v10355_v37, %v6095_v25  ;;  %v6012_v33 = vadd.f32 %v6011_v13, %v10321_v6 }
 0x54e   : > { %v6167_v63 = vmax.f32 %v6135_v23, 0.0  ;;  %v6098_v19 = vmul.f32 %v10349_v2, %v6017_v4 }
 0x54f   : > { %v6166_v12 = vmax.f32 %v6134_v24, 0.0  ;;  %v6097_v61 = vmul.f32 %v10349_v2, %v6012_v33  ;;  %v7469_v54 = vpop.f32.mrb[118].mxu1 }
 0x550   : > { %6199 = vst.msk [vmem:[%s10368_s13 + $0x98] sm:$0xff] %vm3955_vm3, %v6167_v63  ;;  %v6137_v46 = vadd.f32 %v10355_v37, %v6098_v19  ;;  %v6027_v1 = vadd.f32 %v7469_v54, %v10327_v48  ;;  %v6021_v31 = vpop.f32.mrb[119].mxu1 }
 0x551   : > { %6198 = vst.msk [vmem:[%s10368_s13 + $0x90] sm:$0xff] %vm3955_vm3, %v6166_v12  ;;  %v6136_v6 = vadd.f32 %v10355_v37, %v6097_v61  ;;  %v6022_v44 = vadd.f32 %v6021_v31, %v10325_v57 }
 0x552   : > { %v6169_v34 = vmax.f32 %v6137_v46, 0.0  ;;  %v6100_v59 = vmul.f32 %v10349_v2, %v6027_v1 }
 0x553   : > { %v6168_v0 = vmax.f32 %v6136_v6, 0.0  ;;  %v6099_v29 = vmul.f32 %v10349_v2, %v6022_v44  ;;  %v7472_v9 = vpop.f32.mrb[120].mxu1 }
 0x554   : > { %6201 = vst.msk [vmem:[%s10368_s13 + $0xa8] sm:$0xff] %vm3955_vm3, %v6169_v34  ;;  %v6139_v48 = vadd.f32 %v10355_v37, %v6100_v59  ;;  %v6037_v36 = vadd.f32 %v7472_v9, %v10331_v56  ;;  %v6031_v26 = vpop.f32.mrb[121].mxu1 }
 0x555   : > { %6200 = vst.msk [vmem:[%s10368_s13 + $0xa0] sm:$0xff] %vm3955_vm3, %v6168_v0  ;;  %v6138_v57 = vadd.f32 %v10355_v37, %v6099_v29  ;;  %v6032_v52 = vadd.f32 %v6031_v26, %v10329_v35 }
 0x556   : > { %v6171_v27 = vmax.f32 %v6139_v48, 0.0  ;;  %v6102_v53 = vmul.f32 %v10349_v2, %v6037_v36 }
 0x557   : > { %v6170_v43 = vmax.f32 %v6138_v57, 0.0  ;;  %v6101_v41 = vmul.f32 %v10349_v2, %v6032_v52  ;;  %v7475_v8 = vpop.f32.mrb[122].mxu1 }
 0x558   : > { %6203 = vst.msk [vmem:[%s10368_s13 + $0xb8] sm:$0xff] %vm3955_vm3, %v6171_v27  ;;  %v6141_v56 = vadd.f32 %v10355_v37, %v6102_v53  ;;  %v6047_v40 = vadd.f32 %v7475_v8, %v10335_v14  ;;  %v6041_v30 = vpop.f32.mrb[123].mxu1 }
 0x559   : > { %6202 = vst.msk [vmem:[%s10368_s13 + $0xb0] sm:$0xff] %vm3955_vm3, %v6170_v43  ;;  %v6140_v35 = vadd.f32 %v10355_v37, %v6101_v41  ;;  %v6042_v60 = vadd.f32 %v6041_v30, %v10333_v58 }
 0x55a   : > { %v6173_v18 = vmax.f32 %v6141_v56, 0.0  ;;  %v6104_v49 = vmul.f32 %v10349_v2, %v6047_v40 }
 0x55b   : > { %v6172_v17 = vmax.f32 %v6140_v35, 0.0  ;;  %v6103_v22 = vmul.f32 %v10349_v2, %v6042_v60  ;;  %v7478_v3 = vpop.f32.mrb[124].mxu1 }
 0x55c   : > { %6205 = vst.msk [vmem:[%s10368_s13 + $0xc8] sm:$0xff] %vm3955_vm3, %v6173_v18  ;;  %v6143_v14 = vadd.f32 %v10355_v37, %v6104_v49  ;;  %v6057_v28 = vadd.f32 %v7478_v3, %v10339_v42  ;;  %v6051_v21 = vpop.f32.mrb[125].mxu1 }
 0x55d   : > { %6204 = vst.msk [vmem:[%s10368_s13 + $0xc0] sm:$0xff] %vm3955_vm3, %v6172_v17  ;;  %v6142_v58 = vadd.f32 %v10355_v37, %v6103_v22  ;;  %v6052_v45 = vadd.f32 %v6051_v21, %v10337_v11 }
 0x55e   : > { %v6175_v5 = vmax.f32 %v6143_v14, 0.0  ;;  %v6106_v7 = vmul.f32 %v10349_v2, %v6057_v28 }
 0x55f   : > { %v6174_v15 = vmax.f32 %v6142_v58, 0.0  ;;  %v6105_v39 = vmul.f32 %v10349_v2, %v6052_v45  ;;  %v7481_v47 = vpop.f32.mrb[126].mxu1 }
 0x560   : > { %6207 = vst.msk [vmem:[%s10368_s13 + $0xd8] sm:$0xff] %vm3955_vm3, %v6175_v5  ;;  %v6145_v42 = vadd.f32 %v10355_v37, %v6106_v7  ;;  %v6067_v62 = vadd.f32 %v7481_v47, %v10343_v55  ;;  %v6061_v50 = vpop.f32.mrb[127].mxu1 }
 0x561   : > { %6206 = vst.msk [vmem:[%s10368_s13 + $0xd0] sm:$0xff] %vm3955_vm3, %v6174_v15  ;;  %v6144_v11 = vadd.f32 %v10355_v37, %v6105_v39  ;;  %v6062_v16 = vadd.f32 %v6061_v50, %v10341_v20 }
 0x562   : > { %v6177_v38 = vmax.f32 %v6145_v42, 0.0  ;;  %v6108_v32 = vmul.f32 %v10349_v2, %v6067_v62 }
 0x563   : > { %v6176_v51 = vmax.f32 %v6144_v11, 0.0  ;;  %v6107_v25 = vmul.f32 %v10349_v2, %v6062_v16 }
 0x564   : > { %6209 = vst.msk [vmem:[%s10368_s13 + $0xe8] sm:$0xff] %vm3955_vm3, %v6177_v38  ;;  %v6147_v55 = vadd.f32 %v10355_v37, %v6108_v32 }
 0x565   : > { %6208 = vst.msk [vmem:[%s10368_s13 + $0xe0] sm:$0xff] %vm3955_vm3, %v6176_v51  ;;  %v6146_v10 = vadd.f32 %v10355_v37, %v6107_v25 }
 0x566   : > { %v6179_v20 = vmax.f32 %v6147_v55, 0.0 }
 0x567   : > { %v6178_v2 = vmax.f32 %v6146_v10, 0.0 }
 0x568   : > { %6211 = vst.msk [vmem:[%s10368_s13 + $0xf8] sm:$0xff] %vm3955_vm3, %v6179_v20 }
 0x569   : > { %6210 = vst.msk [vmem:[%s10368_s13 + $0xf0] sm:$0xff] %vm3955_vm3, %v6178_v2 }
 0x56a   : > { %7853 = shalt.err (!%p7850_p3)
}
 0x56b   : > { %s7854_s22 = scalar_lea.hbm %s10521_s18, 4096  ;;  %s7858_s9 = scalar_lea.hbm %s10579_s7, 8192 }
 0x56c   : > { %p7855_p4 = scmp.ne.s32.totalorder %s10521_s18, %s7854_s22  ;;  %p7859_p9 = scmp.lt.u32.totalorder %s10521_s18, %s10579_s7 }
 0x56d   : > { %p7860_p10 = scmp.lt.u32.totalorder %s7858_s9, %s7854_s22  ;;  %p7862_p12 = scmp.lt.u32.totalorder %s7854_s22, %s10521_s18 }
 0x56e   : > { %p7856_p7 = pnand %p7855_p4, %p7990_p5 }
 0x56f   : > { %p7861_p11 = por %p7860_p10, %p7859_p9 }
 0x570   : > { %p7857_p8 = pneg %p7856_p7 }
 0x571   : > { %p7863_p13 = por %p7862_p12, %p7861_p11 }
 0x573   : > { %p7864_p0 = pnand %p7863_p13, %p7857_p8 }
 0x575   : > { %7867 = shalt.err (!%p7864_p0)
}
 0x576   : > { %s7910_s16 = smov 128   ;;  %s7911_s17 = smov 8  }
 0x577   : > { %7794 = dma.vmem_to_hbm [thread:$0]  (%p7990_p5), %s10523_s15, 4096, %s10521_s18, %s10531_s28, %s7910_s16, %s7910_s16, %s7911_s17  }
 0x578 PF: > { %p7800_p1 = scmp.ge.s32.totalorder %s7902_s27, 2  ;;  %s6241_s19 = sand.u32 1, %s7890_s24  }
 0x579   : > { %s6242_s20 = scalar_lea.sflag [#allocation6], %s6241_s19 }
 0x57a   : > { %p7797_p2 = pnand %p7800_p1, %p7994_p6 }
 0x57c   : > { %7885 = dma.done.wait (!%p7797_p2), %s6242_s20, 4096  }
 0x57d   : > { %7887 = vsyncadd (!%p7797_p2), %s6242_s20, 4294963200  ;;  %p17_p3 = scmp.ge.s32.totalorder %s7977_s30, 4   ;;  %s10669_s24 = smov %s7894_s25 }
 0x57e   : > { %s10670_s25 = smov %s7898_s26  ;;  %s10671_s26 = smov %s7988_s10 }
 0x57f   : > { %s10672_s27 = smov %s7977_s30  ;;  %19 = sbr.rel (!%p17_p3) target bundleno = 3 (0x3), region = 95 }
 0x586   :  { %6247 = vsyncpa [#allocation6], 1 }
 0x587   :  { %6249 = vsyncpa [#allocation6 + $0x1], 1 }

</bundles_post_ra>
